<compile_context>
chip_gen: v6e
topology: v6e:2x2x1
jax: 0.10.0
libtpu: 0.0.40
codegen_flags: <defaults>
</compile_context>

<pallas_src>
import functools
import numpy as np
import jax
import jax.numpy as jnp
from jax import lax
from jax.experimental import pallas as pl
from jax.experimental.pallas import tpu as pltpu


# ----------------------------- Pallas kernel -------------------------------

def fused_transformer_kernel(x_ref, a_ref, b_ref, wo_b_ref,
                             ff1_ref, ff1_b_ref, ff2_ref, ff2_b_ref,
                             cls_w_ref, cls_b_ref,
                             sa_ref, logp_ref,
                             *, num_layers, num_heads, seq_len, position_style):
    """Whole forward pass (all layers + classifier) in one kernel.

    x_ref:     [Sp, D]   f32   (rows >= seq_len are zero padding)
    a_ref:     [H, D, D] bf16  (scale * WQ_h @ WK_h^T, leading head axis)
    b_ref:     [H, D, D] bf16  (WV_h @ WO_h)
    wo_b_ref:  [1, D]    f32
    ff1_ref:   [D, Dff]  bf16   ff1_b_ref: [1, Dff] f32
    ff2_ref:   [Dff, D]  bf16   ff2_b_ref: [1, D]   f32
    cls_w_ref: [D, Cp]   bf16   cls_b_ref: [1, Cp]  f32 (pad cols = -1e30)
    sa_ref:    [L, H, Sp, Sp] f32      logp_ref: [Sp, Cp] f32
    """
    x = x_ref[...]                                        # [Sp, D] f32
    Sp, D = x.shape
    H = num_heads
    bf16 = jnp.bfloat16

    # --- constants shared by every layer / head (built ONCE) ---------------
    row = lax.broadcasted_iota(jnp.int32, (Sp, Sp), 0)
    col = lax.broadcasted_iota(jnp.int32, (Sp, Sp), 1)
    # causal mask AND mask of the padded key columns (col >= seq_len)
    mask = jnp.where((col > row) | (col >= seq_len),
                     -jnp.inf, 0.0).astype(jnp.float32)
    if position_style == 'alibi':
        neg_dist = -jnp.maximum(row - col, 0).astype(jnp.float32)   # [Sp, Sp]

    # per-head folded weights (leading-axis index -> no lane slicing)
    A = [a_ref[h] for h in range(H)]                      # each [D, D] bf16
    B = [b_ref[h] for h in range(H)]                      # each [D, D] bf16
    ff1 = ff1_ref[...]                                    # [D, Dff] bf16
    ff2 = ff2_ref[...]                                    # [Dff, D] bf16
    Dff = ff1.shape[1]

    # hoisted bias broadcasts (JAX does not CSE broadcast_in_dim in the
    # unrolled layer loop)
    wo_b = jnp.broadcast_to(wo_b_ref[...], (Sp, D))
    ff1_b = jnp.broadcast_to(ff1_b_ref[...], (Sp, Dff))
    ff2_b = jnp.broadcast_to(ff2_b_ref[...], (Sp, D))

    for layer in range(num_layers):          # static unroll (shared weights)
        x_b = x.astype(bf16)                              # MXU operand
        xT_b = jnp.transpose(x).astype(bf16)              # [D, Sp], once/layer

        att = x + wo_b                                    # residual + WO bias
        for h in range(H):                                # static head unroll
            # logits = (x @ A_h) @ x^T  (scale already folded into A_h)
            t = jnp.dot(x_b, A[h], preferred_element_type=jnp.float32)   # [Sp, D]
            logits = jnp.dot(t.astype(bf16), xT_b,
                             preferred_element_type=jnp.float32) + mask  # [Sp, Sp]
            if position_style == 'alibi':
                slope = np.float32((2.0 ** (-8.0 / H)) ** (h + 1))
                logits = logits + slope * neg_dist

            # row-wise softmax, exact normalization (f32 throughout)
            m = jnp.max(logits, axis=-1, keepdims=True)
            e = jnp.exp(logits - m)
            denom = jnp.sum(e, axis=-1, keepdims=True)
            sa = e / denom                                # [Sp, Sp]
            sa_ref[layer, h] = sa                         # dense 128-lane store

            # att += SA_h @ (x @ B_h)   (V and WO folded into B_h)
            u = jnp.dot(x_b, B[h], preferred_element_type=jnp.float32)   # [Sp, D]
            att = att + jnp.dot(sa.astype(bf16), u.astype(bf16),
                                preferred_element_type=jnp.float32)

        # feed-forward + residual
        h1 = jnp.maximum(
            jnp.dot(att.astype(bf16), ff1,
                    preferred_element_type=jnp.float32) + ff1_b, 0.0)
        x = att + jnp.dot(h1.astype(bf16), ff2,
                          preferred_element_type=jnp.float32) + ff2_b

    # --- classifier + log_softmax (padded class columns carry -1e30 bias) ---
    logits = jnp.dot(x.astype(bf16), cls_w_ref[...],
                     preferred_element_type=jnp.float32) + cls_b_ref[...]
    m = jnp.max(logits, axis=-1, keepdims=True)
    lse = jnp.log(jnp.sum(jnp.exp(logits - m), axis=-1, keepdims=True)) + m
    logp_ref[...] = logits - lse


# ------------------------------ JAX wrappers --------------------------------

_VMEM = pl.BlockSpec(memory_space=pltpu.MemorySpace.VMEM)


def get_position_encoding(seq_len, d, n=10000):
    k = np.arange(seq_len, dtype=np.float64)[:, None]
    i = np.arange(d // 2, dtype=np.float64)[None, :]
    denom = np.power(float(n), 2.0 * i / d)
    P = np.zeros((seq_len, d), dtype=np.float32)
    P[:, 0:2 * (d // 2):2] = np.sin(k / denom)
    P[:, 1:2 * (d // 2):2] = np.cos(k / denom)
    return P


def transformer_forward(indices, params, *, num_layers, num_heads, d_internal,
                        d_value, d_model, position_style):
    # Embedding gather + positional-encoding add stay as (tiny) JAX glue.
    V = params['emb'][indices]                            # [S, D]
    S = V.shape[0]
    if position_style == 'learned':
        V = V + params['pos_emb'][:S]
    if position_style == 'sinusoid':
        V = V + jnp.asarray(get_position_encoding(S, d_model))

    # Pad the sequence axis to a lane-dense 128 so every tile in the kernel is
    # (sublane, lane)-dense; padded rows never mix into real rows (padded key
    # columns are masked to -inf inside the kernel) and are sliced away below.
    S_pad = max(128, ((S + 127) // 128) * 128)
    x_pad = jnp.zeros((S_pad, d_model), jnp.float32).at[:S].set(
        V.astype(jnp.float32))

    H, Dv = num_heads, d_value
    scale = np.float32(1.0 / np.sqrt(d_internal))
    # Trace-time algebraic folds (exact reassociation of the same linear maps):
    #   A_h = scale * WQ_h @ WK_h^T     B_h = WV_h @ WO_h
    A = jnp.einsum('hmi,hni->hmn', params['WQs'], params['WKs']) * scale
    WO_resh = params['WO_w'].reshape(H, Dv, d_model)
    B = jnp.einsum('hmv,hvn->hmn', params['WVs'], WO_resh)

    C = params['W_w'].shape[1]
    C_pad = 128
    cls_w = jnp.zeros((d_model, C_pad), jnp.float32).at[:, :C].set(params['W_w'])
    cls_b = jnp.full((1, C_pad), -1e30, jnp.float32).at[:, :C].set(params['W_b'])

    bf = jnp.bfloat16
    kernel = functools.partial(
        fused_transformer_kernel, num_layers=num_layers, num_heads=num_heads,
        seq_len=S, position_style=position_style)

    sa, logp = pl.pallas_call(
        kernel,
        out_shape=(jax.ShapeDtypeStruct((num_layers, H, S_pad, S_pad), jnp.float32),
                   jax.ShapeDtypeStruct((S_pad, C_pad), jnp.float32)),
        in_specs=[_VMEM] * 10,
        out_specs=(_VMEM, _VMEM),
    )(x_pad, A.astype(bf), B.astype(bf), params['WO_b'],
      params['FF1_w'].astype(bf), params['FF1_b'],
      params['FF2_w'].astype(bf), params['FF2_b'],
      cls_w.astype(bf), cls_b)

    log_probs = logp[:S, :C]
    attn_maps = [sa[l, h, :S, :S]
                 for l in range(num_layers) for h in range(num_heads)]
    return log_probs, attn_maps


# --------------------------- deterministic params ---------------------------

def make_params(key, *, vocab_size, num_positions, d_model, d_internal,
                d_value, d_ff, num_classes, num_heads):
    ks = jax.random.split(key, 16)

    def xavier(k, shape, fan_in, fan_out):
        limit = np.sqrt(6.0 / (fan_in + fan_out))
        return jax.random.uniform(k, shape, jnp.float32, -limit, limit)

    return dict(
        emb=jax.random.normal(ks[0], (vocab_size, d_model), jnp.float32),
        pos_emb=jax.random.normal(ks[1], (num_positions, d_model), jnp.float32),
        WQs=xavier(ks[2], (num_heads, d_model, d_internal), d_model, d_internal),
        WKs=xavier(ks[3], (num_heads, d_model, d_internal), d_model, d_internal),
        WVs=xavier(ks[4], (num_heads, d_model, d_value), d_model, d_value),
        # Linear weights stored pre-transposed as [in, out]; biases as [1, out].
        WO_w=xavier(ks[5], (d_value * num_heads, d_model), d_value * num_heads, d_model),
        WO_b=jax.random.uniform(ks[6], (1, d_model), jnp.float32, -0.05, 0.05),
        FF1_w=xavier(ks[7], (d_model, d_ff), d_model, d_ff),
        FF1_b=jax.random.uniform(ks[8], (1, d_ff), jnp.float32, -0.05, 0.05),
        FF2_w=xavier(ks[9], (d_ff, d_model), d_ff, d_model),
        FF2_b=jax.random.uniform(ks[10], (1, d_model), jnp.float32, -0.05, 0.05),
        W_w=xavier(ks[11], (d_model, num_classes), d_model, num_classes),
        W_b=jax.random.uniform(ks[12], (1, num_classes), jnp.float32, -0.05, 0.05),
    )


# ---------------------------------- main ------------------------------------

if __name__ == "__main__":
    vocab_size = 16
    num_positions = 20        # max sequence length (module docs say 20)
    d_model = 32
    d_internal = 16
    num_classes = 3
    num_layers = 2
    num_heads = 2
    position_style = 'learned'
    d_value = d_internal
    d_ff = 512                # hard-coded in the PyTorch module
    seq_len = num_positions

    key = jax.random.PRNGKey(0)
    pkey, ikey = jax.random.split(key)
    params = make_params(pkey, vocab_size=vocab_size, num_positions=num_positions,
                         d_model=d_model, d_internal=d_internal, d_value=d_value,
                         d_ff=d_ff, num_classes=num_classes, num_heads=num_heads)
    indices = jax.random.randint(ikey, (seq_len,), 0, vocab_size)

    log_probs, attn_maps = transformer_forward(
        indices, params, num_layers=num_layers, num_heads=num_heads,
        d_internal=d_internal, d_value=d_value, d_model=d_model,
        position_style=position_style)

    log_probs = jax.block_until_ready(log_probs)
    for a in attn_maps:
        jax.block_until_ready(a)

    assert log_probs.shape == (seq_len, num_classes)
    assert len(attn_maps) == num_layers * num_heads
    assert all(a.shape == (seq_len, seq_len) for a in attn_maps)
    assert bool(jnp.all(jnp.isfinite(log_probs)))
    # log_softmax rows must exponentiate-sum to 1
    assert bool(jnp.allclose(jnp.sum(jnp.exp(log_probs), axis=-1), 1.0, atol=1e-3))
    # attention rows are probability distributions and causal
    assert bool(jnp.allclose(jnp.sum(attn_maps[0], axis=-1), 1.0, atol=1e-3))
    assert bool(jnp.allclose(jnp.triu(attn_maps[0], k=1), 0.0, atol=1e-6))

    print("KERNEL_OK")
</pallas_src>

<mosaic_0001>
module attributes {stable_mosaic.version = 11 : i64} {
  func.func @fused_transformer_kernel(%arg0: memref<128x32xf32, #tpu.memory_space<vmem>>, %arg1: memref<2x32x32xbf16, #tpu.memory_space<vmem>>, %arg2: memref<2x32x32xbf16, #tpu.memory_space<vmem>>, %arg3: memref<1x32xf32, #tpu.memory_space<vmem>>, %arg4: memref<32x512xbf16, #tpu.memory_space<vmem>>, %arg5: memref<1x512xf32, #tpu.memory_space<vmem>>, %arg6: memref<512x32xbf16, #tpu.memory_space<vmem>>, %arg7: memref<1x32xf32, #tpu.memory_space<vmem>>, %arg8: memref<32x128xbf16, #tpu.memory_space<vmem>>, %arg9: memref<1x128xf32, #tpu.memory_space<vmem>>, %arg10: memref<2x2x128x128xf32, #tpu.memory_space<vmem>>, %arg11: memref<128x128xf32, #tpu.memory_space<vmem>>) attributes {dimension_semantics = [], scalar_prefetch = 0 : i64, scratch_operands = 0 : i64, tpu.core_type = #tpu.core_type<tc>} {
    %c0 = arith.constant 0 : index
    %c0_0 = arith.constant 0 : index
    %0 = vector.load %arg0[%c0, %c0_0] : memref<128x32xf32, #tpu.memory_space<vmem>>, vector<128x32xf32>
    %1 = tpu.iota {dimensions = array<i32: 0>} : vector<128x128xi32>
    %2 = tpu.iota {dimensions = array<i32: 1>} : vector<128x128xi32>
    %3 = arith.cmpi sgt, %2, %1 : vector<128x128xi32>
    %c20_i32 = arith.constant 20 : i32
    %4 = vector.broadcast %c20_i32 : i32 to vector<128x128xi32>
    %5 = arith.cmpi sge, %2, %4 : vector<128x128xi32>
    %6 = arith.ori %3, %5 : vector<128x128xi1>
    %cst = arith.constant 0xFF800000 : f32
    %cst_1 = arith.constant 0.000000e+00 : f32
    %7 = vector.broadcast %cst : f32 to vector<128x128xf32>
    %8 = vector.broadcast %cst_1 : f32 to vector<128x128xf32>
    %9 = arith.select %6, %7, %8 : vector<128x128xi1>, vector<128x128xf32>
    %c0_2 = arith.constant 0 : index
    %c0_3 = arith.constant 0 : index
    %c0_4 = arith.constant 0 : index
    %10 = vector.load %arg1[%c0_2, %c0_3, %c0_4] : memref<2x32x32xbf16, #tpu.memory_space<vmem>>, vector<1x32x32xbf16>
    %11 = vector.shape_cast %10 : vector<1x32x32xbf16> to vector<32x32xbf16>
    %c1 = arith.constant 1 : index
    %c0_5 = arith.constant 0 : index
    %c0_6 = arith.constant 0 : index
    %12 = vector.load %arg1[%c1, %c0_5, %c0_6] : memref<2x32x32xbf16, #tpu.memory_space<vmem>>, vector<1x32x32xbf16>
    %13 = vector.shape_cast %12 : vector<1x32x32xbf16> to vector<32x32xbf16>
    %c0_7 = arith.constant 0 : index
    %c0_8 = arith.constant 0 : index
    %c0_9 = arith.constant 0 : index
    %14 = vector.load %arg2[%c0_7, %c0_8, %c0_9] : memref<2x32x32xbf16, #tpu.memory_space<vmem>>, vector<1x32x32xbf16>
    %15 = vector.shape_cast %14 : vector<1x32x32xbf16> to vector<32x32xbf16>
    %c1_10 = arith.constant 1 : index
    %c0_11 = arith.constant 0 : index
    %c0_12 = arith.constant 0 : index
    %16 = vector.load %arg2[%c1_10, %c0_11, %c0_12] : memref<2x32x32xbf16, #tpu.memory_space<vmem>>, vector<1x32x32xbf16>
    %17 = vector.shape_cast %16 : vector<1x32x32xbf16> to vector<32x32xbf16>
    %c0_13 = arith.constant 0 : index
    %c0_14 = arith.constant 0 : index
    %18 = vector.load %arg4[%c0_13, %c0_14] : memref<32x512xbf16, #tpu.memory_space<vmem>>, vector<32x512xbf16>
    %c0_15 = arith.constant 0 : index
    %c0_16 = arith.constant 0 : index
    %19 = vector.load %arg6[%c0_15, %c0_16] : memref<512x32xbf16, #tpu.memory_space<vmem>>, vector<512x32xbf16>
    %c0_17 = arith.constant 0 : index
    %c0_18 = arith.constant 0 : index
    %20 = vector.load %arg3[%c0_17, %c0_18] : memref<1x32xf32, #tpu.memory_space<vmem>>, vector<1x32xf32>
    %21 = vector.shape_cast %20 : vector<1x32xf32> to vector<1x32xf32>
    %22 = vector.broadcast %21 : vector<1x32xf32> to vector<128x32xf32>
    %c0_19 = arith.constant 0 : index
    %c0_20 = arith.constant 0 : index
    %23 = vector.load %arg5[%c0_19, %c0_20] : memref<1x512xf32, #tpu.memory_space<vmem>>, vector<1x512xf32>
    %24 = vector.shape_cast %23 : vector<1x512xf32> to vector<1x512xf32>
    %25 = vector.broadcast %24 : vector<1x512xf32> to vector<128x512xf32>
    %c0_21 = arith.constant 0 : index
    %c0_22 = arith.constant 0 : index
    %26 = vector.load %arg7[%c0_21, %c0_22] : memref<1x32xf32, #tpu.memory_space<vmem>>, vector<1x32xf32>
    %27 = vector.shape_cast %26 : vector<1x32xf32> to vector<1x32xf32>
    %28 = vector.broadcast %27 : vector<1x32xf32> to vector<128x32xf32>
    %29 = arith.truncf %0 : vector<128x32xf32> to vector<128x32xbf16>
    %30 = tpu.transpose %0, [1, 0] : vector<128x32xf32> -> vector<32x128xf32>
    %31 = arith.truncf %30 : vector<32x128xf32> to vector<32x128xbf16>
    %32 = arith.addf %0, %22 : vector<128x32xf32>
    %cst_23 = arith.constant dense<0.000000e+00> : vector<128x32xf32>
    %33 = tpu.matmul %29, %11, %cst_23 {dimension_numbers = #tpu.dot_dimension_numbers<[1], [0], [0], [1], [0, 0, 1, 1], [], []>} : vector<128x32xbf16>, vector<32x32xbf16>, vector<128x32xf32> -> vector<128x32xf32>
    %34 = arith.truncf %33 : vector<128x32xf32> to vector<128x32xbf16>
    %cst_24 = arith.constant dense<0.000000e+00> : vector<128x128xf32>
    %35 = tpu.matmul %34, %31, %cst_24 {dimension_numbers = #tpu.dot_dimension_numbers<[1], [0], [0], [1], [0, 0, 1, 1], [], []>} : vector<128x32xbf16>, vector<32x128xbf16>, vector<128x128xf32> -> vector<128x128xf32>
    %36 = arith.addf %35, %9 : vector<128x128xf32>
    %cst_25 = arith.constant dense<0xFF800000> : vector<128xf32>
    %37 = vector.multi_reduction <maximumf>, %36, %cst_25 [1] : vector<128x128xf32> to vector<128xf32>
    %38 = vector.shape_cast %37 : vector<128xf32> to vector<128x1xf32>
    %39 = vector.broadcast %38 : vector<128x1xf32> to vector<128x128xf32>
    %40 = arith.subf %36, %39 : vector<128x128xf32>
    %41 = math.exp %40 : vector<128x128xf32>
    %cst_26 = arith.constant dense<0.000000e+00> : vector<128xf32>
    %42 = vector.multi_reduction <add>, %41, %cst_26 [1] : vector<128x128xf32> to vector<128xf32>
    %43 = vector.shape_cast %42 : vector<128xf32> to vector<128x1xf32>
    %44 = vector.broadcast %43 : vector<128x1xf32> to vector<128x128xf32>
    %45 = arith.divf %41, %44 : vector<128x128xf32>
    %c0_27 = arith.constant 0 : index
    %c0_28 = arith.constant 0 : index
    %c0_29 = arith.constant 0 : index
    %c0_30 = arith.constant 0 : index
    %46 = vector.load %arg10[%c0_27, %c0_28, %c0_29, %c0_30] : memref<2x2x128x128xf32, #tpu.memory_space<vmem>>, vector<1x1x128x128xf32>
    %47 = vector.shape_cast %46 : vector<1x1x128x128xf32> to vector<128x128xf32>
    %48 = vector.shape_cast %45 : vector<128x128xf32> to vector<1x1x128x128xf32>
    tpu.vector_store %arg10[%c0_27, %c0_28, %c0_29, %c0_30], %48 {strides = array<i32>} : memref<2x2x128x128xf32, #tpu.memory_space<vmem>>, vector<1x1x128x128xf32>,
    %cst_31 = arith.constant dense<0.000000e+00> : vector<128x32xf32>
    %49 = tpu.matmul %29, %15, %cst_31 {dimension_numbers = #tpu.dot_dimension_numbers<[1], [0], [0], [1], [0, 0, 1, 1], [], []>} : vector<128x32xbf16>, vector<32x32xbf16>, vector<128x32xf32> -> vector<128x32xf32>
    %50 = arith.truncf %45 : vector<128x128xf32> to vector<128x128xbf16>
    %51 = arith.truncf %49 : vector<128x32xf32> to vector<128x32xbf16>
    %cst_32 = arith.constant dense<0.000000e+00> : vector<128x32xf32>
    %52 = tpu.matmul %50, %51, %cst_32 {dimension_numbers = #tpu.dot_dimension_numbers<[1], [0], [0], [1], [0, 0, 1, 1], [], []>} : vector<128x128xbf16>, vector<128x32xbf16>, vector<128x32xf32> -> vector<128x32xf32>
    %53 = arith.addf %32, %52 : vector<128x32xf32>
    %cst_33 = arith.constant dense<0.000000e+00> : vector<128x32xf32>
    %54 = tpu.matmul %29, %13, %cst_33 {dimension_numbers = #tpu.dot_dimension_numbers<[1], [0], [0], [1], [0, 0, 1, 1], [], []>} : vector<128x32xbf16>, vector<32x32xbf16>, vector<128x32xf32> -> vector<128x32xf32>
    %55 = arith.truncf %54 : vector<128x32xf32> to vector<128x32xbf16>
    %cst_34 = arith.constant dense<0.000000e+00> : vector<128x128xf32>
    %56 = tpu.matmul %55, %31, %cst_34 {dimension_numbers = #tpu.dot_dimension_numbers<[1], [0], [0], [1], [0, 0, 1, 1], [], []>} : vector<128x32xbf16>, vector<32x128xbf16>, vector<128x128xf32> -> vector<128x128xf32>
    %57 = arith.addf %56, %9 : vector<128x128xf32>
    %cst_35 = arith.constant dense<0xFF800000> : vector<128xf32>
    %58 = vector.multi_reduction <maximumf>, %57, %cst_35 [1] : vector<128x128xf32> to vector<128xf32>
    %59 = vector.shape_cast %58 : vector<128xf32> to vector<128x1xf32>
    %60 = vector.broadcast %59 : vector<128x1xf32> to vector<128x128xf32>
    %61 = arith.subf %57, %60 : vector<128x128xf32>
    %62 = math.exp %61 : vector<128x128xf32>
    %cst_36 = arith.constant dense<0.000000e+00> : vector<128xf32>
    %63 = vector.multi_reduction <add>, %62, %cst_36 [1] : vector<128x128xf32> to vector<128xf32>
    %64 = vector.shape_cast %63 : vector<128xf32> to vector<128x1xf32>
    %65 = vector.broadcast %64 : vector<128x1xf32> to vector<128x128xf32>
    %66 = arith.divf %62, %65 : vector<128x128xf32>
    %c0_37 = arith.constant 0 : index
    %c1_38 = arith.constant 1 : index
    %c0_39 = arith.constant 0 : index
    %c0_40 = arith.constant 0 : index
    %67 = vector.load %arg10[%c0_37, %c1_38, %c0_39, %c0_40] : memref<2x2x128x128xf32, #tpu.memory_space<vmem>>, vector<1x1x128x128xf32>
    %68 = vector.shape_cast %67 : vector<1x1x128x128xf32> to vector<128x128xf32>
    %69 = vector.shape_cast %66 : vector<128x128xf32> to vector<1x1x128x128xf32>
    tpu.vector_store %arg10[%c0_37, %c1_38, %c0_39, %c0_40], %69 {strides = array<i32>} : memref<2x2x128x128xf32, #tpu.memory_space<vmem>>, vector<1x1x128x128xf32>,
    %cst_41 = arith.constant dense<0.000000e+00> : vector<128x32xf32>
    %70 = tpu.matmul %29, %17, %cst_41 {dimension_numbers = #tpu.dot_dimension_numbers<[1], [0], [0], [1], [0, 0, 1, 1], [], []>} : vector<128x32xbf16>, vector<32x32xbf16>, vector<128x32xf32> -> vector<128x32xf32>
    %71 = arith.truncf %66 : vector<128x128xf32> to vector<128x128xbf16>
    %72 = arith.truncf %70 : vector<128x32xf32> to vector<128x32xbf16>
    %cst_42 = arith.constant dense<0.000000e+00> : vector<128x32xf32>
    %73 = tpu.matmul %71, %72, %cst_42 {dimension_numbers = #tpu.dot_dimension_numbers<[1], [0], [0], [1], [0, 0, 1, 1], [], []>} : vector<128x128xbf16>, vector<128x32xbf16>, vector<128x32xf32> -> vector<128x32xf32>
    %74 = arith.addf %53, %73 : vector<128x32xf32>
    %75 = arith.truncf %74 : vector<128x32xf32> to vector<128x32xbf16>
    %cst_43 = arith.constant dense<0.000000e+00> : vector<128x512xf32>
    %76 = tpu.matmul %75, %18, %cst_43 {dimension_numbers = #tpu.dot_dimension_numbers<[1], [0], [0], [1], [0, 0, 1, 1], [], []>} : vector<128x32xbf16>, vector<32x512xbf16>, vector<128x512xf32> -> vector<128x512xf32>
    %77 = arith.addf %76, %25 : vector<128x512xf32>
    %cst_44 = arith.constant 0.000000e+00 : f32
    %78 = vector.broadcast %cst_44 : f32 to vector<128x512xf32>
    %79 = arith.maximumf %77, %78 : vector<128x512xf32>
    %80 = arith.truncf %79 : vector<128x512xf32> to vector<128x512xbf16>
    %cst_45 = arith.constant dense<0.000000e+00> : vector<128x32xf32>
    %81 = tpu.matmul %80, %19, %cst_45 {dimension_numbers = #tpu.dot_dimension_numbers<[1], [0], [0], [1], [0, 0, 1, 1], [], []>} : vector<128x512xbf16>, vector<512x32xbf16>, vector<128x32xf32> -> vector<128x32xf32>
    %82 = arith.addf %74, %81 : vector<128x32xf32>
    %83 = arith.addf %82, %28 : vector<128x32xf32>
    %84 = arith.truncf %83 : vector<128x32xf32> to vector<128x32xbf16>
    %85 = tpu.transpose %83, [1, 0] : vector<128x32xf32> -> vector<32x128xf32>
    %86 = arith.truncf %85 : vector<32x128xf32> to vector<32x128xbf16>
    %87 = arith.addf %83, %22 : vector<128x32xf32>
    %cst_46 = arith.constant dense<0.000000e+00> : vector<128x32xf32>
    %88 = tpu.matmul %84, %11, %cst_46 {dimension_numbers = #tpu.dot_dimension_numbers<[1], [0], [0], [1], [0, 0, 1, 1], [], []>} : vector<128x32xbf16>, vector<32x32xbf16>, vector<128x32xf32> -> vector<128x32xf32>
    %89 = arith.truncf %88 : vector<128x32xf32> to vector<128x32xbf16>
    %cst_47 = arith.constant dense<0.000000e+00> : vector<128x128xf32>
    %90 = tpu.matmul %89, %86, %cst_47 {dimension_numbers = #tpu.dot_dimension_numbers<[1], [0], [0], [1], [0, 0, 1, 1], [], []>} : vector<128x32xbf16>, vector<32x128xbf16>, vector<128x128xf32> -> vector<128x128xf32>
    %91 = arith.addf %90, %9 : vector<128x128xf32>
    %cst_48 = arith.constant dense<0xFF800000> : vector<128xf32>
    %92 = vector.multi_reduction <maximumf>, %91, %cst_48 [1] : vector<128x128xf32> to vector<128xf32>
    %93 = vector.shape_cast %92 : vector<128xf32> to vector<128x1xf32>
    %94 = vector.broadcast %93 : vector<128x1xf32> to vector<128x128xf32>
    %95 = arith.subf %91, %94 : vector<128x128xf32>
    %96 = math.exp %95 : vector<128x128xf32>
    %cst_49 = arith.constant dense<0.000000e+00> : vector<128xf32>
    %97 = vector.multi_reduction <add>, %96, %cst_49 [1] : vector<128x128xf32> to vector<128xf32>
    %98 = vector.shape_cast %97 : vector<128xf32> to vector<128x1xf32>
    %99 = vector.broadcast %98 : vector<128x1xf32> to vector<128x128xf32>
    %100 = arith.divf %96, %99 : vector<128x128xf32>
    %c1_50 = arith.constant 1 : index
    %c0_51 = arith.constant 0 : index
    %c0_52 = arith.constant 0 : index
    %c0_53 = arith.constant 0 : index
    %101 = vector.load %arg10[%c1_50, %c0_51, %c0_52, %c0_53] : memref<2x2x128x128xf32, #tpu.memory_space<vmem>>, vector<1x1x128x128xf32>
    %102 = vector.shape_cast %101 : vector<1x1x128x128xf32> to vector<128x128xf32>
    %103 = vector.shape_cast %100 : vector<128x128xf32> to vector<1x1x128x128xf32>
    tpu.vector_store %arg10[%c1_50, %c0_51, %c0_52, %c0_53], %103 {strides = array<i32>} : memref<2x2x128x128xf32, #tpu.memory_space<vmem>>, vector<1x1x128x128xf32>,
    %cst_54 = arith.constant dense<0.000000e+00> : vector<128x32xf32>
    %104 = tpu.matmul %84, %15, %cst_54 {dimension_numbers = #tpu.dot_dimension_numbers<[1], [0], [0], [1], [0, 0, 1, 1], [], []>} : vector<128x32xbf16>, vector<32x32xbf16>, vector<128x32xf32> -> vector<128x32xf32>
    %105 = arith.truncf %100 : vector<128x128xf32> to vector<128x128xbf16>
    %106 = arith.truncf %104 : vector<128x32xf32> to vector<128x32xbf16>
    %cst_55 = arith.constant dense<0.000000e+00> : vector<128x32xf32>
    %107 = tpu.matmul %105, %106, %cst_55 {dimension_numbers = #tpu.dot_dimension_numbers<[1], [0], [0], [1], [0, 0, 1, 1], [], []>} : vector<128x128xbf16>, vector<128x32xbf16>, vector<128x32xf32> -> vector<128x32xf32>
    %108 = arith.addf %87, %107 : vector<128x32xf32>
    %cst_56 = arith.constant dense<0.000000e+00> : vector<128x32xf32>
    %109 = tpu.matmul %84, %13, %cst_56 {dimension_numbers = #tpu.dot_dimension_numbers<[1], [0], [0], [1], [0, 0, 1, 1], [], []>} : vector<128x32xbf16>, vector<32x32xbf16>, vector<128x32xf32> -> vector<128x32xf32>
    %110 = arith.truncf %109 : vector<128x32xf32> to vector<128x32xbf16>
    %cst_57 = arith.constant dense<0.000000e+00> : vector<128x128xf32>
    %111 = tpu.matmul %110, %86, %cst_57 {dimension_numbers = #tpu.dot_dimension_numbers<[1], [0], [0], [1], [0, 0, 1, 1], [], []>} : vector<128x32xbf16>, vector<32x128xbf16>, vector<128x128xf32> -> vector<128x128xf32>
    %112 = arith.addf %111, %9 : vector<128x128xf32>
    %cst_58 = arith.constant dense<0xFF800000> : vector<128xf32>
    %113 = vector.multi_reduction <maximumf>, %112, %cst_58 [1] : vector<128x128xf32> to vector<128xf32>
    %114 = vector.shape_cast %113 : vector<128xf32> to vector<128x1xf32>
    %115 = vector.broadcast %114 : vector<128x1xf32> to vector<128x128xf32>
    %116 = arith.subf %112, %115 : vector<128x128xf32>
    %117 = math.exp %116 : vector<128x128xf32>
    %cst_59 = arith.constant dense<0.000000e+00> : vector<128xf32>
    %118 = vector.multi_reduction <add>, %117, %cst_59 [1] : vector<128x128xf32> to vector<128xf32>
    %119 = vector.shape_cast %118 : vector<128xf32> to vector<128x1xf32>
    %120 = vector.broadcast %119 : vector<128x1xf32> to vector<128x128xf32>
    %121 = arith.divf %117, %120 : vector<128x128xf32>
    %c1_60 = arith.constant 1 : index
    %c1_61 = arith.constant 1 : index
    %c0_62 = arith.constant 0 : index
    %c0_63 = arith.constant 0 : index
    %122 = vector.load %arg10[%c1_60, %c1_61, %c0_62, %c0_63] : memref<2x2x128x128xf32, #tpu.memory_space<vmem>>, vector<1x1x128x128xf32>
    %123 = vector.shape_cast %122 : vector<1x1x128x128xf32> to vector<128x128xf32>
    %124 = vector.shape_cast %121 : vector<128x128xf32> to vector<1x1x128x128xf32>
    tpu.vector_store %arg10[%c1_60, %c1_61, %c0_62, %c0_63], %124 {strides = array<i32>} : memref<2x2x128x128xf32, #tpu.memory_space<vmem>>, vector<1x1x128x128xf32>,
    %cst_64 = arith.constant dense<0.000000e+00> : vector<128x32xf32>
    %125 = tpu.matmul %84, %17, %cst_64 {dimension_numbers = #tpu.dot_dimension_numbers<[1], [0], [0], [1], [0, 0, 1, 1], [], []>} : vector<128x32xbf16>, vector<32x32xbf16>, vector<128x32xf32> -> vector<128x32xf32>
    %126 = arith.truncf %121 : vector<128x128xf32> to vector<128x128xbf16>
    %127 = arith.truncf %125 : vector<128x32xf32> to vector<128x32xbf16>
    %cst_65 = arith.constant dense<0.000000e+00> : vector<128x32xf32>
    %128 = tpu.matmul %126, %127, %cst_65 {dimension_numbers = #tpu.dot_dimension_numbers<[1], [0], [0], [1], [0, 0, 1, 1], [], []>} : vector<128x128xbf16>, vector<128x32xbf16>, vector<128x32xf32> -> vector<128x32xf32>
    %129 = arith.addf %108, %128 : vector<128x32xf32>
    %130 = arith.truncf %129 : vector<128x32xf32> to vector<128x32xbf16>
    %cst_66 = arith.constant dense<0.000000e+00> : vector<128x512xf32>
    %131 = tpu.matmul %130, %18, %cst_66 {dimension_numbers = #tpu.dot_dimension_numbers<[1], [0], [0], [1], [0, 0, 1, 1], [], []>} : vector<128x32xbf16>, vector<32x512xbf16>, vector<128x512xf32> -> vector<128x512xf32>
    %132 = arith.addf %131, %25 : vector<128x512xf32>
    %cst_67 = arith.constant 0.000000e+00 : f32
    %133 = vector.broadcast %cst_67 : f32 to vector<128x512xf32>
    %134 = arith.maximumf %132, %133 : vector<128x512xf32>
    %135 = arith.truncf %134 : vector<128x512xf32> to vector<128x512xbf16>
    %cst_68 = arith.constant dense<0.000000e+00> : vector<128x32xf32>
    %136 = tpu.matmul %135, %19, %cst_68 {dimension_numbers = #tpu.dot_dimension_numbers<[1], [0], [0], [1], [0, 0, 1, 1], [], []>} : vector<128x512xbf16>, vector<512x32xbf16>, vector<128x32xf32> -> vector<128x32xf32>
    %137 = arith.addf %129, %136 : vector<128x32xf32>
    %138 = arith.addf %137, %28 : vector<128x32xf32>
    %139 = arith.truncf %138 : vector<128x32xf32> to vector<128x32xbf16>
    %c0_69 = arith.constant 0 : index
    %c0_70 = arith.constant 0 : index
    %140 = vector.load %arg8[%c0_69, %c0_70] : memref<32x128xbf16, #tpu.memory_space<vmem>>, vector<32x128xbf16>
    %cst_71 = arith.constant dense<0.000000e+00> : vector<128x128xf32>
    %141 = tpu.matmul %139, %140, %cst_71 {dimension_numbers = #tpu.dot_dimension_numbers<[1], [0], [0], [1], [0, 0, 1, 1], [], []>} : vector<128x32xbf16>, vector<32x128xbf16>, vector<128x128xf32> -> vector<128x128xf32>
    %c0_72 = arith.constant 0 : index
    %c0_73 = arith.constant 0 : index
    %142 = vector.load %arg9[%c0_72, %c0_73] : memref<1x128xf32, #tpu.memory_space<vmem>>, vector<1x128xf32>
    %143 = vector.broadcast %142 : vector<1x128xf32> to vector<128x128xf32>
    %144 = arith.addf %141, %143 : vector<128x128xf32>
    %cst_74 = arith.constant dense<0xFF800000> : vector<128xf32>
    %145 = vector.multi_reduction <maximumf>, %144, %cst_74 [1] : vector<128x128xf32> to vector<128xf32>
    %146 = vector.shape_cast %145 : vector<128xf32> to vector<128x1xf32>
    %147 = vector.broadcast %146 : vector<128x1xf32> to vector<128x128xf32>
    %148 = arith.subf %144, %147 : vector<128x128xf32>
    %149 = math.exp %148 : vector<128x128xf32>
    %cst_75 = arith.constant dense<0.000000e+00> : vector<128xf32>
    %150 = vector.multi_reduction <add>, %149, %cst_75 [1] : vector<128x128xf32> to vector<128xf32>
    %151 = vector.shape_cast %150 : vector<128xf32> to vector<128x1xf32>
    %152 = math.log %151 : vector<128x1xf32>
    %153 = arith.addf %152, %146 : vector<128x1xf32>
    %154 = vector.broadcast %153 : vector<128x1xf32> to vector<128x128xf32>
    %155 = arith.subf %144, %154 : vector<128x128xf32>
    %c0_76 = arith.constant 0 : index
    %c0_77 = arith.constant 0 : index
    %156 = vector.load %arg11[%c0_76, %c0_77] : memref<128x128xf32, #tpu.memory_space<vmem>>, vector<128x128xf32>
    tpu.vector_store %arg11[%c0_76, %c0_77], %155 {strides = array<i32>} : memref<128x128xf32, #tpu.memory_space<vmem>>, vector<128x128xf32>,
    return
  }
}

</mosaic_0001>

<bundles_post_ra>
// kernel: tpu_custom_call.1
= control target key start
LH: loop header
LB: loop body
LE: loop exit
PB: predicated region body
PF: predicated region fallthrough
CT: control target
= control target key end

     0   :  { %17 = vsyncpa [#allocation3], 0  ;;  %vm320_vm0 = vcmask 261120   ;;  %s8372_s0 = inlined_call_operand.vmem [shape: f32[128,32], index: 0, kind: input, shape index: {}]   ;;  %s8373_s1 = inlined_call_operand.vmem [shape: bf16[2,32,32], index: 1, kind: input, shape index: {}]   ;;  %s8374_s2 = inlined_call_operand.vmem [shape: bf16[2,32,32], index: 2, kind: input, shape index: {}]   ;;  %s8375_s3 = inlined_call_operand.vmem [shape: f32[1,32], index: 3, kind: input, shape index: {}]   ;;  %s8376_s4 = inlined_call_operand.vmem [shape: bf16[32,512], index: 4, kind: input, shape index: {}]   ;;  %s8377_s5 = inlined_call_operand.vmem [shape: f32[1,512], index: 5, kind: input, shape index: {}]   ;;  %s8378_s6 = inlined_call_operand.vmem [shape: bf16[512,32], index: 6, kind: input, shape index: {}]   ;;  %s8379_s7 = inlined_call_operand.vmem [shape: f32[1,32], index: 7, kind: input, shape index: {}]   ;;  %s8380_s8 = inlined_call_operand.vmem [shape: bf16[32,128], index: 8, kind: input, shape index: {}]   ;;  %s8381_s9 = inlined_call_operand.vmem [shape: f32[1,128], index: 9, kind: input, shape index: {}]   ;;  %s8382_s10 = inlined_call_operand.hbm [shape: f32[2,2,128,128], index: 10, kind: output, shape index: {0}]   ;;  %s8383_s11 = inlined_call_operand.hbm [shape: f32[128,128], index: 11, kind: output, shape index: {1}]  }
   0x1   :  { %v5727_v0 = vld [vmem:[%s8373_s1 + $0x8] sm:$0xff]   ;;  %v5728_v1 = vld [vmem:[%s8373_s1] sm:$0xff]   ;;  %v42_v5 = vld [vmem:[%s8372_s0 + $0x10] sm:$0xff] }
   0x2   :  { %5329 = vmatprep.subr.bf16.mxu0 %v5727_v0  ;;  %v40_v2 = vld [vmem:[%s8372_s0] sm:$0xff]  ;;  %v41_v3 = vld [vmem:[%s8372_s0 + $0x8] sm:$0xff]  ;;  %5717 = vmatprep.subr.bf16.mxu1 %v5727_v0  ;;  %v43_v6 = vld [vmem:[%s8372_s0 + $0x18] sm:$0xff] }
   0x3   :  { %5330 = vmatpush3.bf16.msra.mxu0 %v5727_v0  ;;  %v6289_v4 = vpack.c.bf16 %v41_v3, %v40_v2  ;;  %5719 = vmatpush3.bf16.msra.mxu1 %v5727_v0  ;;  %v44_v7 = vld [vmem:[%s8372_s0 + $0x20] sm:$0xff]  ;;  %v45_v8 = vld [vmem:[%s8372_s0 + $0x28] sm:$0xff]  ;;  %v6308_v10 = vpack.c.bf16 %v43_v6, %v42_v5  ;;  %v50_v14 = vld [vmem:[%s8372_s0 + $0x50] sm:$0xff] }
   0x4   :  { %5331 = vmatprep.subr.bf16.mxu0 %v5728_v1  ;;  %5718 = vmatprep.subr.bf16.mxu1 %v5728_v1  ;;  %v5729_v9 = vld [vmem:[%s8374_s2 + $0x8] sm:$0xff]   ;;  %v48_v11 = vld [vmem:[%s8372_s0 + $0x40] sm:$0xff]  ;;  %v6313_v12 = vpack.c.bf16 %v45_v8, %v44_v7  ;;  %v51_v15 = vld [vmem:[%s8372_s0 + $0x58] sm:$0xff] }
   0x5   :  { %5333 = vmatprep.mubr.msk.bf16.mxu0 %vm320_vm0, %v6289_v4  ;;  %258 = vxpose.xlu0.b32.start [1/16] (narrow) %v40_v2, 32  ;;  %v49_v13 = vld [vmem:[%s8372_s0 + $0x48] sm:$0xff]  ;;  %v5730_v16 = vld [vmem:[%s8374_s2] sm:$0xff]   ;;  %v6329_v18 = vpack.c.bf16 %v51_v15, %v50_v14  ;;  %v46_v21 = vld [vmem:[%s8372_s0 + $0x30] sm:$0xff] }
   0x6   :  { %v6327_v17 = vpack.c.bf16 %v49_v13, %v48_v11  ;;  %v52_v19 = vld [vmem:[%s8372_s0 + $0x60] sm:$0xff]  ;;  %v53_v20 = vld [vmem:[%s8372_s0 + $0x68] sm:$0xff]  ;;  %v47_v22 = vld [vmem:[%s8372_s0 + $0x38] sm:$0xff] }
   0x7   :  { %5332 = vmatpush3.bf16.msra.mxu0 %v5728_v1  ;;  %5720 = vmatpush3.bf16.msra.mxu1 %v5728_v1  ;;  %v6343_v23 = vpack.c.bf16 %v53_v20, %v52_v19  ;;  %v54_v24 = vld [vmem:[%s8372_s0 + $0x70] sm:$0xff]  ;;  %v55_v25 = vld [vmem:[%s8372_s0 + $0x78] sm:$0xff]  ;;  %v6361_v26 = vpack.c.bf16 %v47_v22, %v46_v21 }
   0x8   :  { %5369 = vmatprep.subr.bf16.mxu0 %v5729_v9  ;;  %5341 = vmatprep.mubr.msk.bf16.mxu1 %vm320_vm0, %v6327_v17  ;;  %v6363_v27 = vpack.c.bf16 %v55_v25, %v54_v24 }
   0x9   :  { %259 = vxpose.xlu0.b32.cont [2/16] (narrow) %v41_v3, 32 }
   0xa   :  { %5334 = vmatmul.mubr.msk.bf16.vlgmr.msra.gmra.mxu0 %vm320_vm0, %v6308_v10  ;;  %5342 = vmatmul.mubr.msk.bf16.vlgmr.msra.gmra.mxu1 %vm320_vm0, %v6329_v18 }
   0xb   :  { %5337 = vmatprep.mubr.msk.bf16.mxu0 %vm320_vm0, %v6313_v12  ;;  %5370 = vmatpush3.bf16.msra.mxu0 %v5729_v9 }
   0xc   :  { %5371 = vmatprep.subr.bf16.mxu0 %v5730_v16  ;;  %5345 = vmatprep.mubr.msk.bf16.mxu1 %vm320_vm0, %v6343_v23 }
   0xd   :  { %260 = vxpose.xlu0.b32.cont [3/16] (narrow) %v42_v5, 32 }
   0xf   :  { %5372 = vmatpush3.bf16.msra.mxu0 %v5730_v16 }
  0x11   :  { %261 = vxpose.xlu0.b32.cont [4/16] (narrow) %v43_v6, 32 }
  0x12   :  { %5338 = vmatmul.mubr.msk.bf16.gmra.mxu0 %vm320_vm0, %v6361_v26  ;;  %5346 = vmatmul.mubr.msk.bf16.gmra.mxu1 %vm320_vm0, %v6363_v27 }
  0x13   :  { %5373 = vmatprep.mubr.msk.bf16.mxu0 %vm320_vm0, %v6289_v4 }
  0x15   :  { %262 = vxpose.xlu0.b32.cont [5/16] (narrow) %v44_v7, 32 }
  0x19   :  { %263 = vxpose.xlu0.b32.cont [6/16] (narrow) %v45_v8, 32 }
  0x1a   :  { %5374 = vmatmul.mubr.msk.bf16.vlgmr.msra.gmra.mxu0 %vm320_vm0, %v6308_v10 }
  0x1b   :  { %5377 = vmatprep.mubr.msk.bf16.mxu0 %vm320_vm0, %v6313_v12 }
  0x1d   :  { %264 = vxpose.xlu0.b32.cont [7/16] (narrow) %v46_v21, 32 }
  0x21   :  { %265 = vxpose.xlu0.b32.cont [8/16] (narrow) %v47_v22, 32 }
  0x22   :  { %5378 = vmatmul.mubr.msk.bf16.gmra.mxu0 %vm320_vm0, %v6361_v26 }
  0x23   :  { %5381 = vmatprep.mubr.msk.bf16.mxu0 %vm320_vm0, %v6327_v17 }
  0x25   :  { %266 = vxpose.xlu0.b32.cont [9/16] (narrow) %v48_v11, 32 }
  0x26   :  { %18 = vsyncpa [#allocation5], 0 }
  0x29   :  { %267 = vxpose.xlu0.b32.cont [10/16] (narrow) %v49_v13, 32 }
  0x2a   :  { %5382 = vmatmul.mubr.msk.bf16.gmra.mxu0 %vm320_vm0, %v6329_v18 }
  0x2b   :  { %5385 = vmatprep.mubr.msk.bf16.mxu0 %vm320_vm0, %v6343_v23 }
  0x2d   :  { %268 = vxpose.xlu0.b32.cont [11/16] (narrow) %v50_v14, 32 }
  0x31   :  { %269 = vxpose.xlu0.b32.cont [12/16] (narrow) %v51_v15, 32 }
  0x32   :  { %5386 = vmatmul.mubr.msk.bf16.gmra.mxu0 %vm320_vm0, %v6363_v27 }
  0x33   :  { %5425 = vmatprep.mubr.msk.bf16.mxu0 %vm320_vm0, %v6289_v4 }
  0x35   :  { %270 = vxpose.xlu0.b32.cont [13/16] (narrow) %v52_v19, 32 }
  0x39   :  { %271 = vxpose.xlu0.b32.cont [14/16] (narrow) %v53_v20, 32 }
  0x3d   :  { %272 = vxpose.xlu0.b32.cont [15/16] (narrow) %v54_v24, 32  ;;  %v56_v24 = vlaneseq }
  0x41   :  { %273 = vxpose.xlu0.b32.end [16/16] (narrow) %v55_v25, 32  ;;  %v6404_v25 = vshrl.u32 %v56_v24, 7 }
  0x81   :  { %v274_v28 = vpop.trf.xlu0 }
  0x85   :  { %v275_v29 = vpop.trf.xlu0 }
  0x86   :  { %v6387_v32 = vpack.c.bf16 %v275_v29, %v274_v28  ;;  %v59_v28 = vadd.s32 16, %v6404_v25  ;;  %v6407_v29 = vand.u32 127, %v56_v24 }
  0x88   :  { %vm77_vm1 = vcmp.gt.s32.totalorder %v6407_v29, %v59_v28  ;;  %vm91_vm2 = vcmp.ge.s32.totalorder %v6407_v29, 20  ;;  %vm75_vm4 = vcmp.gt.s32.totalorder %v6407_v29, %v6404_v25  ;;  %v70_v28 = vadd.s32 104, %v6404_v25 }
  0x89   :  { %v276_v30 = vpop.trf.xlu0  ;;  %vm94_vm3 = vmor %vm77_vm1, %vm91_vm2 }
  0x8a   :  { %vm92_vm5 = vmor %vm75_vm4, %vm91_vm2 }
  0x8d   :  { %v277_v31 = vpop.trf.xlu0 }
  0x8e   :  { %v6389_v33 = vpack.c.bf16 %v277_v31, %v276_v30  ;;  %v60_v30 = vadd.s32 24, %v6404_v25  ;;  %v6211_v31 = vmov 0.0  }
  0x90   :  { %5349 = vmatprep.subr.bf16.mxu1 %v6389_v33  ;;  %vm78_vm6 = vcmp.gt.s32.totalorder %v6407_v29, %v60_v30 }
  0x91   :  { %5350 = vmatpush3.bf16.msra.mxu1 %v6389_v33  ;;  %vm95_vm7 = vmor %vm78_vm6, %vm91_vm2 }
  0x92   :  { %5351 = vmatprep.subr.bf16.mxu1 %v6387_v32 }
  0x95   :  { %5352 = vmatpush3.bf16.msra.mxu1 %v6387_v32 }
  0xca   :  { %v5335_v34 = vpop.f32.mrf.mxu0  ;;  %v5343_v36 = vpop.f32.mrf.mxu1 }
  0xcc   :  { %v379_v35 = vpop.f32.mrf.mxu0  ;;  %v411_v38 = vpop.f32.mrf.mxu1 }
  0xce   :  { %v5336_v37 = vpop.f32.mrf.mxu0  ;;  %v5344_v40 = vpop.f32.mrf.mxu1 }
  0xcf   :  { %v443_v42 = vpack.c.bf16 %v5336_v37, %v5335_v34  ;;  %v447_v59 = vpack.c.bf16 %v5344_v40, %v5343_v36  ;;  %v6417_v34 = vsel %vm94_vm3, -inf, %v6211_v31  ;;  %v58_v36 = vadd.s32 8, %v6404_v25 }
  0xd0   :  { %v382_v39 = vpop.f32.mrf.mxu0  ;;  %v414_v44 = vpop.f32.mrf.mxu1  ;;  %8427 = vst [vmem:[#allocation8_spill] sm:$0xff] %v6417_v34  ;;  %v63_v40 = vadd.s32 48, %v6404_v25 }
  0xd1   :  { %v442_v41 = vpack.c.bf16 %v382_v39, %v379_v35  ;;  %v446_v52 = vpack.c.bf16 %v414_v44, %v411_v38  ;;  %v6427_v38 = vsel %vm92_vm5, -inf, %v6211_v31  ;;  %vm76_vm8 = vcmp.gt.s32.totalorder %v6407_v29, %v58_v36 }
  0xd2   :  { %v5339_v43 = vpop.f32.mrf.mxu0  ;;  %v5347_v46 = vpop.f32.mrf.mxu1  ;;  %8428 = vst [vmem:[#allocation9_spill] sm:$0xff] %v6427_v38  ;;  %vm93_vm9 = vmor %vm76_vm8, %vm91_vm2  ;;  %vm81_vm10 = vcmp.gt.s32.totalorder %v6407_v29, %v63_v40  ;;  %v61_v44 = vadd.s32 32, %v6404_v25 }
  0xd3   :  { %5353 = vmatprep.mubr.msk.bf16.mxu1 %vm320_vm0, %v442_v41  ;;  %vm98_vm11 = vmor %vm81_vm10, %vm91_vm2 }
  0xd4   :  { %v395_v45 = vpop.f32.mrf.mxu0  ;;  %5354 = vmatmul.mubr.msk.bf16.vlgmr.msra.gmra.mxu1 %vm320_vm0, %v443_v42  ;;  %v427_v48 = vpop.f32.mrf.mxu1  ;;  %v6438_v42 = vsel %vm95_vm7, -inf, %v6211_v31  ;;  %vm79_vm12 = vcmp.gt.s32.totalorder %v6407_v29, %v61_v44 }
  0xd5   :  { %8429 = vst [vmem:[#allocation10_spill] sm:$0xff] %v6438_v42  ;;  %vm96_vm13 = vmor %vm79_vm12, %vm91_vm2 }
  0xd6   :  { %v5340_v47 = vpop.f32.mrf.mxu0  ;;  %v5348_v54 = vpop.f32.mrf.mxu1 }
  0xd7   :  { %v445_v49 = vpack.c.bf16 %v5340_v47, %v5339_v43  ;;  %v449_v1 = vpack.c.bf16 %v5348_v54, %v5347_v46  ;;  %v6449_v47 = vsel %vm93_vm9, -inf, %v6211_v31  ;;  %v6471_v54 = vsel %vm96_vm13, -inf, %v6211_v31 }
  0xd8   :  { %v398_v50 = vpop.f32.mrf.mxu0  ;;  %v430_v57 = vpop.f32.mrf.mxu1  ;;  %8430 = vst [vmem:[#allocation11_spill] sm:$0xff] %v6449_v47  ;;  %8432 = vst [vmem:[#allocation13_spill] sm:$0xff] %v6471_v54 }
  0xd9   :  { %v444_v51 = vpack.c.bf16 %v398_v50, %v395_v45  ;;  %v448_v60 = vpack.c.bf16 %v430_v57, %v427_v48  ;;  %v64_v48 = vadd.s32 56, %v6404_v25  ;;  %v6460_v50 = vsel %vm98_vm11, -inf, %v6211_v31 }
  0xda   :  { %v5375_v53 = vpop.f32.mrf.mxu0  ;;  %8431 = vst [vmem:[#allocation12_spill] sm:$0xff] %v6460_v50 }
  0xdb   :  { %5357 = vmatprep.mubr.msk.bf16.mxu1 %vm320_vm0, %v444_v51  ;;  %vm82_vm14 = vcmp.gt.s32.totalorder %v6407_v29, %v64_v48 }
  0xdc   :  { %5358 = vmatmul.mubr.msk.bf16.gmra.mxu1 %vm320_vm0, %v445_v49  ;;  %v777_v55 = vpop.f32.mrf.mxu0  ;;  %vm99_vm15 = vmor %vm82_vm14, %vm91_vm2 }
  0xdd   :  { %5361 = vmatprep.mubr.msk.bf16.mxu1 %vm320_vm0, %v446_v52  ;;  %v62_v52 = vadd.s32 40, %v6404_v25 }
  0xde   :  { %v5376_v56 = vpop.f32.mrf.mxu0 }
  0xdf   :  { %v849_v21 = vpack.c.bf16 %v5376_v56, %v5375_v53  ;;  %v67_v56 = vadd.s32 80, %v6404_v25  ;;  %vm80_vm1 = vcmp.gt.s32.totalorder %v6407_v29, %v62_v52 }
  0xe0   :  { %v780_v58 = vpop.f32.mrf.mxu0  ;;  %vm97_vm3 = vmor %vm80_vm1, %vm91_vm2  ;;  %vm88_vm1 = vcmp.gt.s32.totalorder %v6407_v29, %v70_v28 }
  0xe1   :  { %v848_v22 = vpack.c.bf16 %v780_v58, %v777_v55  ;;  %v5731_v58 = vld [vmem:[%s8373_s1 + $0x18] sm:$0xff]   ;;  %vm85_vm4 = vcmp.gt.s32.totalorder %v6407_v29, %v67_v56 }
  0xe2   :  { %v5379_v61 = vpop.f32.mrf.mxu0  ;;  %5421 = vmatprep.subr.bf16.mxu0 %v5731_v58  ;;  %vm102_vm5 = vmor %vm85_vm4, %vm91_vm2 }
  0xe3   :  { %5422 = vmatpush3.bf16.msra.mxu0 %v5731_v58 }
  0xe4   :  { %v793_v62 = vpop.f32.mrf.mxu0  ;;  %5362 = vmatmul.mubr.msk.bf16.gmra.mxu1 %vm320_vm0, %v447_v59  ;;  %v6485_v59 = vsel %vm99_vm15, -inf, %v6211_v31 }
  0xe5   :  { %5365 = vmatprep.mubr.msk.bf16.mxu1 %vm320_vm0, %v448_v60  ;;  %8433 = vst [vmem:[#allocation14_spill] sm:$0xff] %v6485_v59 }
  0xe6   :  { %v5380_v63 = vpop.f32.mrf.mxu0 }
  0xe7   :  { %v851_v19 = vpack.c.bf16 %v5380_v63, %v5379_v61  ;;  %v65_v61 = vadd.s32 64, %v6404_v25 }
  0xe8   :  { %v796_v0 = vpop.f32.mrf.mxu0 }
  0xe9   :  { %v850_v20 = vpack.c.bf16 %v796_v0, %v793_v62  ;;  %v6496_v0 = vsel %vm97_vm3, -inf, %v6211_v31  ;;  %vm83_vm6 = vcmp.gt.s32.totalorder %v6407_v29, %v65_v61  ;;  %vm105_vm3 = vmor %vm88_vm1, %vm91_vm2 }
  0xea   :  { %v5383_v2 = vpop.f32.mrf.mxu0  ;;  %8434 = vst [vmem:[#allocation15_spill] sm:$0xff] %v6496_v0  ;;  %vm100_vm7 = vmor %vm83_vm6, %vm91_vm2 }
  0xec   :  { %v809_v3 = vpop.f32.mrf.mxu0  ;;  %5366 = vmatmul.mubr.msk.bf16.gmra.mxu1 %vm320_vm0, %v449_v1 }
  0xee   :  { %v5384_v5 = vpop.f32.mrf.mxu0 }
  0xef   :  { %v853_v15 = vpack.c.bf16 %v5384_v5, %v5383_v2  ;;  %v68_v2 = vadd.s32 88, %v6404_v25  ;;  %v6507_v5 = vsel %vm102_vm5, -inf, %v6211_v31 }
  0xf0   :  { %v812_v6 = vpop.f32.mrf.mxu0  ;;  %8435 = vst [vmem:[#allocation16_spill] sm:$0xff] %v6507_v5 }
  0xf1   :  { %v852_v16 = vpack.c.bf16 %v812_v6, %v809_v3  ;;  %vm86_vm8 = vcmp.gt.s32.totalorder %v6407_v29, %v68_v2 }
  0xf2   :  { %v5387_v7 = vpop.f32.mrf.mxu0  ;;  %vm103_vm9 = vmor %vm86_vm8, %vm91_vm2 }
  0xf4   :  { %v825_v8 = vpop.f32.mrf.mxu0 }
  0xf6   :  { %v5388_v9 = vpop.f32.mrf.mxu0 }
  0xf7   :  { %v855_v11 = vpack.c.bf16 %v5388_v9, %v5387_v7  ;;  %v66_v7 = vadd.s32 72, %v6404_v25  ;;  %v6518_v9 = vsel %vm100_vm7, -inf, %v6211_v31 }
  0xf8   :  { %v828_v13 = vpop.f32.mrf.mxu0  ;;  %8436 = vst [vmem:[#allocation17_spill] sm:$0xff] %v6518_v9 }
  0xf9   :  { %5389 = vmatprep.subr.bf16.mxu1 %v855_v11  ;;  %v854_v14 = vpack.c.bf16 %v828_v13, %v825_v8  ;;  %v71_v13 = vadd.s32 112, %v6404_v25  ;;  %vm84_vm10 = vcmp.gt.s32.totalorder %v6407_v29, %v66_v7 }
  0xfa   :  { %5390 = vmatpush3.bf16.msra.mxu1 %v855_v11  ;;  %vm101_vm11 = vmor %vm84_vm10, %vm91_vm2 }
  0xfb   :  { %5391 = vmatprep.subr.bf16.mxu1 %v854_v14  ;;  %vm89_vm12 = vcmp.gt.s32.totalorder %v6407_v29, %v71_v13  ;;  %v6543_v24 = vsel %vm101_vm11, -inf, %v6211_v31 }
  0xfc   :  { %8438 = vst [vmem:[#allocation19_spill] sm:$0xff] %v6543_v24  ;;  %vm106_vm13 = vmor %vm89_vm12, %vm91_vm2 }
  0xfe   :  { %5392 = vmatpush3.bf16.msra.mxu1 %v854_v14 }
  0xff   :  { %5393 = vmatprep.subr.bf16.mxu1 %v853_v15 }
 0x102   :  { %5394 = vmatpush3.bf16.msra.mxu1 %v853_v15  ;;  %v5732_v15 = vld [vmem:[%s8373_s1 + $0x10] sm:$0xff]  }
 0x103   :  { %5395 = vmatprep.subr.bf16.mxu1 %v852_v16  ;;  %5423 = vmatprep.subr.bf16.mxu0 %v5732_v15 }
 0x104   :  { %5424 = vmatpush3.bf16.msra.mxu0 %v5732_v15 }
 0x106   :  { %5396 = vmatpush3.bf16.msra.mxu1 %v852_v16  ;;  %v6532_v16 = vsel %vm103_vm9, -inf, %v6211_v31 }
 0x107   :  { %5397 = vmatprep.subr.bf16.mxu1 %v851_v19  ;;  %8437 = vst [vmem:[#allocation18_spill] sm:$0xff] %v6532_v16  ;;  %5426 = vmatmul.mubr.msk.bf16.vlgmr.msra.gmra.mxu0 %vm320_vm0, %v6308_v10 }
 0x108   :  { %5429 = vmatprep.mubr.msk.bf16.mxu0 %vm320_vm0, %v6313_v12 }
 0x10a   :  { %5398 = vmatpush3.bf16.msra.mxu1 %v851_v19 }
 0x10b   :  { %5399 = vmatprep.subr.bf16.mxu1 %v850_v20 }
 0x10e   :  { %5400 = vmatpush3.bf16.msra.mxu1 %v850_v20  ;;  %v69_v20 = vadd.s32 96, %v6404_v25 }
 0x10f   :  { %5401 = vmatprep.subr.bf16.mxu1 %v849_v21  ;;  %5430 = vmatmul.mubr.msk.bf16.gmra.mxu0 %vm320_vm0, %v6361_v26 }
 0x110   :  { %vm87_vm14 = vcmp.gt.s32.totalorder %v6407_v29, %v69_v20  ;;  %5433 = vmatprep.mubr.msk.bf16.mxu0 %vm320_vm0, %v6327_v17 }
 0x111   :  { %vm104_vm15 = vmor %vm87_vm14, %vm91_vm2 }
 0x112   :  { %5402 = vmatpush3.bf16.msra.mxu1 %v849_v21 }
 0x113   :  { %5403 = vmatprep.subr.bf16.mxu1 %v848_v22 }
 0x116   :  { %5404 = vmatpush3.bf16.msra.mxu1 %v848_v22 }
 0x117   :  { %5441 = vmatprep.subr.bf16.mxu1 %v6389_v33  ;;  %5434 = vmatmul.mubr.msk.bf16.gmra.mxu0 %vm320_vm0, %v6329_v18 }
 0x118   :  { %5437 = vmatprep.mubr.msk.bf16.mxu0 %vm320_vm0, %v6343_v23 }
 0x11f   :  { %5438 = vmatmul.mubr.msk.bf16.gmra.mxu0 %vm320_vm0, %v6363_v27 }
 0x120   :  { %5465 = vmatprep.mubr.msk.bf16.mxu0 %vm320_vm0, %v6289_v4 }
 0x194   :  { %v5355_v35 = vpop.f32.mrf.mxu1 }
 0x195   :  { %v6424_v37 = vadd.f32 %v5355_v35, %v6417_v34  ;;  %v6558_v35 = vsel %vm106_vm13, -inf, %v6211_v31 }
 0x196   :  { %v508_v39 = vpop.f32.mrf.mxu1  ;;  %8439 = vst [vmem:[#allocation20_spill] sm:$0xff] %v6558_v35 }
 0x197   :  { %575 = vmax.xlane.f32.xlu1 %v6424_v37  ;;  %v6435_v41 = vadd.f32 %v508_v39, %v6427_v38  ;;  %v72_v39 = vadd.s32 120, %v6404_v25 }
 0x198   :  { %v5356_v43 = vpop.f32.mrf.mxu1 }
 0x199   :  { %v6446_v45 = vadd.f32 %v5356_v43, %v6438_v42  ;;  %v6569_v43 = vsel %vm104_vm15, -inf, %v6211_v31  ;;  %vm90_vm4 = vcmp.gt.s32.totalorder %v6407_v29, %v72_v39 }
 0x19a   :  { %v511_v46 = vpop.f32.mrf.mxu1  ;;  %8440 = vst [vmem:[#allocation21_spill] sm:$0xff] %v6569_v43  ;;  %vm107_vm5 = vmor %vm90_vm4, %vm91_vm2 }
 0x19b   :  { %571 = vmax.xlane.f32.xlu1 %v6435_v41  ;;  %v6457_v49 = vadd.f32 %v511_v46, %v6449_v47 }
 0x19c   :  { %v5359_v51 = vpop.f32.mrf.mxu1 }
 0x19d   :  { %v6468_v53 = vadd.f32 %v5359_v51, %v6460_v50  ;;  %v6583_v51 = vsel %vm105_vm3, -inf, %v6211_v31 }
 0x19e   :  { %v524_v55 = vpop.f32.mrf.mxu1  ;;  %8441 = vst [vmem:[#allocation22_spill] sm:$0xff] %v6583_v51 }
 0x19f   :  { %577 = vmax.xlane.f32.xlu1 %v6446_v45  ;;  %v6479_v57 = vadd.f32 %v524_v55, %v6471_v54  ;;  %v6592_v55 = vsel %vm107_vm5, -inf, %v6211_v31 }
 0x1a0   :  { %v5360_v60 = vpop.f32.mrf.mxu1  ;;  %8442 = vst [vmem:[#allocation23_spill] sm:$0xff] %v6592_v55 }
 0x1a1   :  { %v6493_v62 = vadd.f32 %v5360_v60, %v6485_v59 }
 0x1a2   :  { %v527_v63 = vpop.f32.mrf.mxu1 }
 0x1a3   :  { %573 = vmax.xlane.f32.xlu1 %v6457_v49  ;;  %v6504_v3 = vadd.f32 %v527_v63, %v6496_v0 }
 0x1a4   :  { %v5363_v1 = vpop.f32.mrf.mxu1 }
 0x1a5   :  { %v6515_v8 = vadd.f32 %v5363_v1, %v6507_v5 }
 0x1a6   :  { %v540_v6 = vpop.f32.mrf.mxu1 }
 0x1a7   :  { %583 = vmax.xlane.f32.xlu1 %v6468_v53  ;;  %v6526_v14 = vadd.f32 %v540_v6, %v6518_v9 }
 0x1a8   :  { %v5364_v11 = vpop.f32.mrf.mxu1 }
 0x1a9   :  { %v6540_v21 = vadd.f32 %v5364_v11, %v6532_v16 }
 0x1aa   :  { %v543_v19 = vpop.f32.mrf.mxu1 }
 0x1ab   :  { %579 = vmax.xlane.f32.xlu1 %v6479_v57  ;;  %v6555_v30 = vadd.f32 %v543_v19, %v6543_v24 }
 0x1ac   :  { %v5367_v22 = vpop.f32.mrf.mxu1 }
 0x1ad   :  { %v6566_v40 = vadd.f32 %v5367_v22, %v6558_v35 }
 0x1ae   :  { %v556_v36 = vpop.f32.mrf.mxu1 }
 0x1af   :  { %585 = vmax.xlane.f32.xlu1 %v6493_v62  ;;  %v6580_v46 = vadd.f32 %v556_v36, %v6569_v43 }
 0x1b0   :  { %v5368_v44 = vpop.f32.mrf.mxu1 }
 0x1b1   :  { %v6600_v56 = vadd.f32 %v5368_v44, %v6592_v55 }
 0x1b2   :  { %v559_v48 = vpop.f32.mrf.mxu1 }
 0x1b3   :  { %581 = vmax.xlane.f32.xlu1 %v6504_v3  ;;  %v6589_v52 = vadd.f32 %v559_v48, %v6583_v51 }
 0x1b7   :  { %591 = vmax.xlane.f32.xlu1 %v6515_v8 }
 0x1bb   :  { %587 = vmax.xlane.f32.xlu1 %v6526_v14 }
 0x1bf   :  { %593 = vmax.xlane.f32.xlu1 %v6540_v21 }
 0x1c3   :  { %589 = vmax.xlane.f32.xlu1 %v6555_v30 }
 0x1c7   :  { %599 = vmax.xlane.f32.xlu1 %v6566_v40 }
 0x1cb   :  { %595 = vmax.xlane.f32.xlu1 %v6580_v46 }
 0x1cf   :  { %597 = vmax.xlane.f32.xlu1 %v6589_v52 }
 0x1d3   :  { %601 = vmax.xlane.f32.xlu1 %v6600_v56 }
 0x220   :  { %v576_v29 = vpop.xlane.xlu1 %575 }
 0x221   :  { %v605_v31 = vsub.f32 %v6424_v37, %v576_v29 }
 0x223   :  { %v623_v58 = vmul.f32 1.442695, %v605_v31 }
 0x224   :  { %v572_v60 = vpop.xlane.xlu1 %571 }
 0x225   :  { %5781 = vpow2.f32 %v623_v58  ;;  %v603_v61 = vsub.f32 %v6435_v41, %v572_v60 }
 0x227   :  { %v619_v63 = vmul.f32 1.442695, %v603_v61 }
 0x228   :  { %v578_v1 = vpop.xlane.xlu1 %577 }
 0x229   :  { %5783 = vpow2.f32 %v619_v63  ;;  %v606_v2 = vsub.f32 %v6446_v45, %v578_v1 }
 0x22b   :  { %v625_v6 = vmul.f32 1.442695, %v606_v2 }
 0x22c   :  { %v574_v7 = vpop.xlane.xlu1 %573 }
 0x22d   :  { %5785 = vpow2.f32 %v625_v6  ;;  %v604_v11 = vsub.f32 %v6457_v49, %v574_v7 }
 0x22f   :  { %v621_v13 = vmul.f32 1.442695, %v604_v11 }
 0x230   :  { %v584_v4 = vpop.xlane.xlu1 %583 }
 0x231   :  { %5787 = vpow2.f32 %v621_v13  ;;  %v609_v37 = vsub.f32 %v6468_v53, %v584_v4 }
 0x232   :  { %v6612_v15 = vpop.eup %5781 }
 0x233   :  { %v631_v19 = vmul.f32 1.442695, %v609_v37  ;;  %655 = vadd.xlane.f32.xlu1 %v6612_v15 }
 0x234   :  { %v580_v41 = vpop.xlane.xlu1 %579 }
 0x235   :  { %5789 = vpow2.f32 %v631_v19  ;;  %v607_v20 = vsub.f32 %v6479_v57, %v580_v41 }
 0x236   :  { %v6616_v45 = vpop.eup %5783 }
 0x237   :  { %v627_v22 = vmul.f32 1.442695, %v607_v20  ;;  %651 = vadd.xlane.f32.xlu0 %v6616_v45 }
 0x238   :  { %v586_v49 = vpop.xlane.xlu1 %585 }
 0x239   :  { %5791 = vpow2.f32 %v627_v22  ;;  %v610_v28 = vsub.f32 %v6493_v62, %v586_v49 }
 0x23a   :  { %v6620_v36 = vpop.eup %5785 }
 0x23b   :  { %v633_v53 = vmul.f32 1.442695, %v610_v28  ;;  %657 = vadd.xlane.f32.xlu1 %v6620_v36 }
 0x23c   :  { %v582_v39 = vpop.xlane.xlu1 %581 }
 0x23d   :  { %5793 = vpow2.f32 %v633_v53  ;;  %v608_v44 = vsub.f32 %v6504_v3, %v582_v39 }
 0x23e   :  { %v6624_v48 = vpop.eup %5787 }
 0x23f   :  { %v629_v57 = vmul.f32 1.442695, %v608_v44  ;;  %653 = vadd.xlane.f32.xlu1 %v6624_v48 }
 0x240   :  { %v592_v29 = vpop.xlane.xlu1 %591 }
 0x241   :  { %5795 = vpow2.f32 %v629_v57  ;;  %v613_v31 = vsub.f32 %v6515_v8, %v592_v29 }
 0x242   :  { %v6628_v58 = vpop.eup %5789 }
 0x243   :  { %v639_v62 = vmul.f32 1.442695, %v613_v31  ;;  %663 = vadd.xlane.f32.xlu1 %v6628_v58 }
 0x244   :  { %v588_v60 = vpop.xlane.xlu1 %587 }
 0x245   :  { %5797 = vpow2.f32 %v639_v62  ;;  %v611_v61 = vsub.f32 %v6526_v14, %v588_v60 }
 0x246   :  { %v6632_v63 = vpop.eup %5791 }
 0x247   :  { %v635_v3 = vmul.f32 1.442695, %v611_v61  ;;  %659 = vadd.xlane.f32.xlu1 %v6632_v63 }
 0x248   :  { %v594_v1 = vpop.xlane.xlu1 %593 }
 0x249   :  { %5799 = vpow2.f32 %v635_v3  ;;  %v614_v6 = vsub.f32 %v6540_v21, %v594_v1 }
 0x24a   :  { %v6635_v2 = vpop.eup %5793 }
 0x24b   :  { %665 = vadd.xlane.f32.xlu1 %v6635_v2  ;;  %v641_v4 = vmul.f32 1.442695, %v614_v6 }
 0x24c   :  { %v590_v8 = vpop.xlane.xlu1 %589 }
 0x24d   :  { %v612_v7 = vsub.f32 %v6555_v30, %v590_v8 }
 0x24e   :  { %v6640_v11 = vpop.eup %5795 }
 0x24f   :  { %v637_v13 = vmul.f32 1.442695, %v612_v7  ;;  %661 = vadd.xlane.f32.xlu1 %v6640_v11 }
 0x250   :  { %v600_v14 = vpop.xlane.xlu1 %599 }
 0x251   :  { %5801 = vpow2.f32 %v637_v13  ;;  %v617_v19 = vsub.f32 %v6566_v40, %v600_v14 }
 0x252   :  { %v6643_v37 = vpop.eup %5797  ;;  %5803 = vpow2.f32 %v641_v4 }
 0x253   :  { %671 = vadd.xlane.f32.xlu1 %v6643_v37  ;;  %v647_v22 = vmul.f32 1.442695, %v617_v19 }
 0x254   :  { %v596_v41 = vpop.xlane.xlu1 %595 }
 0x255   :  { %v615_v21 = vsub.f32 %v6580_v46, %v596_v41 }
 0x256   :  { %v6648_v20 = vpop.eup %5799 }
 0x257   :  { %v643_v30 = vmul.f32 1.442695, %v615_v21  ;;  %667 = vadd.xlane.f32.xlu1 %v6648_v20 }
 0x258   :  { %v598_v49 = vpop.xlane.xlu1 %597 }
 0x259   :  { %5805 = vpow2.f32 %v643_v30  ;;  %v616_v28 = vsub.f32 %v6589_v52, %v598_v49 }
 0x25a   :  { %5807 = vpow2.f32 %v647_v22 }
 0x25b   :  { %v645_v53 = vmul.f32 1.442695, %v616_v28 }
 0x25c   :  { %v602_v39 = vpop.xlane.xlu1 %601 }
 0x25d   :  { %5809 = vpow2.f32 %v645_v53  ;;  %v618_v40 = vsub.f32 %v6600_v56, %v602_v39 }
 0x25e   :  { %v6653_v44 = vpop.eup %5801 }
 0x25f   :  { %v649_v57 = vmul.f32 1.442695, %v618_v40  ;;  %669 = vadd.xlane.f32.xlu1 %v6653_v44  ;;  %v6656_v46 = vpop.eup %5803 }
 0x261   :  { %5811 = vpow2.f32 %v649_v57 }
 0x263   :  { %673 = vadd.xlane.f32.xlu1 %v6656_v46 }
 0x266   :  { %v6659_v29 = vpop.eup %5805 }
 0x267   :  { %675 = vadd.xlane.f32.xlu1 %v6659_v29  ;;  %v6662_v52 = vpop.eup %5807 }
 0x26a   :  { %v6664_v31 = vpop.eup %5809 }
 0x26b   :  { %679 = vadd.xlane.f32.xlu1 %v6662_v52  ;;  %677 = vadd.xlane.f32.xlu0 %v6664_v31 }
 0x26e   :  { %v6668_v56 = vpop.eup %5811 }
 0x26f   :  { %681 = vadd.xlane.f32.xlu0 %v6668_v56 }
 0x2bc   :  { %v656_v62 = vpop.xlane.xlu1 %655 }
 0x2bd   :  { %5813 = vrcp.f32 %v656_v62 }
 0x2c0   :  { %v652_v60 = vpop.xlane.xlu0 %651 }
 0x2c1   :  { %5815 = vrcp.f32 %v652_v60 }
 0x2c4   :  { %v658_v61 = vpop.xlane.xlu1 %657 }
 0x2c5   :  { %5817 = vrcp.f32 %v658_v61 }
 0x2c8   :  { %v654_v3 = vpop.xlane.xlu1 %653 }
 0x2c9   :  { %5819 = vrcp.f32 %v654_v3 }
 0x2ca   :  { %v5814_v1 = vpop.eup %5813 }
 0x2cb   :  { %v688_v8 = vmul.f32 %v5814_v1, %v6612_v15 }
 0x2cc   :  { %v664_v6 = vpop.xlane.xlu1 %663 }
 0x2cd   :  { %5821 = vrcp.f32 %v664_v6  ;;  %717 = vst [vmem:[#allocation2 + $0x10] sm:$0xff] %v688_v8 }
 0x2ce   :  { %v5816_v7 = vpop.eup %5815 }
 0x2cf   :  { %v684_v13 = vmul.f32 %v5816_v7, %v6616_v45 }
 0x2d0   :  { %v660_v14 = vpop.xlane.xlu1 %659 }
 0x2d1   :  { %5823 = vrcp.f32 %v660_v14  ;;  %715 = vst [vmem:[#allocation2] sm:$0xff] %v684_v13 }
 0x2d2   :  { %v5818_v4 = vpop.eup %5817 }
 0x2d3   :  { %v690_v19 = vmul.f32 %v5818_v4, %v6620_v36 }
 0x2d4   :  { %v666_v41 = vpop.xlane.xlu1 %665 }
 0x2d5   :  { %5825 = vrcp.f32 %v666_v41  ;;  %718 = vst [vmem:[#allocation2 + $0x18] sm:$0xff] %v690_v19  ;;  %v841_v28 = vpack.c.bf16 %v690_v19, %v688_v8 }
 0x2d6   :  { %v5820_v21 = vpop.eup %5819 }
 0x2d7   :  { %v686_v30 = vmul.f32 %v5820_v21, %v6624_v48 }
 0x2d8   :  { %v662_v22 = vpop.xlane.xlu1 %661 }
 0x2d9   :  { %5827 = vrcp.f32 %v662_v22  ;;  %716 = vst [vmem:[#allocation2 + $0x8] sm:$0xff] %v686_v30  ;;  %v840_v15 = vpack.c.bf16 %v686_v30, %v684_v13 }
 0x2da   :  { %v5822_v49 = vpop.eup %5821 }
 0x2db   :  { %5405 = vmatprep.mubr.bf16.mxu1 %v840_v15  ;;  %v696_v45 = vmul.f32 %v5822_v49, %v6628_v58  ;;  %v6681_v58 = vpop.f32.mrf.mxu0 }
 0x2dc   :  { %5406 = vmatmul.mubr.bf16.vlgmr.msra.gmra.mxu1 %v841_v28  ;;  %v672_v53 = vpop.xlane.xlu1 %671 }
 0x2dd   :  { %5442 = vmatpush3.bf16.msra.mxu1 %v6389_v33  ;;  %5829 = vrcp.f32 %v672_v53  ;;  %721 = vst [vmem:[#allocation2 + $0x30] sm:$0xff] %v696_v45  ;;  %v1015_v60 = vpop.f32.mrf.mxu0 }
 0x2de   :  { %v5824_v36 = vpop.eup %5823  ;;  %5443 = vmatprep.subr.bf16.mxu1 %v6387_v32 }
 0x2df   :  { %v692_v48 = vmul.f32 %v5824_v36, %v6632_v63  ;;  %v5428_v8 = vpop.f32.mrf.mxu0 }
 0x2e0   :  { %v668_v39 = vpop.xlane.xlu1 %667 }
 0x2e1   :  { %5444 = vmatpush3.bf16.msra.mxu1 %v6387_v32  ;;  %5831 = vrcp.f32 %v668_v39  ;;  %719 = vst [vmem:[#allocation2 + $0x20] sm:$0xff] %v692_v48  ;;  %v1018_v13 = vpop.f32.mrf.mxu0 }
 0x2e2   :  { %v5826_v40 = vpop.eup %5825 }
 0x2e3   :  { %v698_v57 = vmul.f32 %v5826_v40, %v6635_v2  ;;  %v5431_v14 = vpop.f32.mrf.mxu0 }
 0x2e5   :  { %722 = vst [vmem:[#allocation2 + $0x38] sm:$0xff] %v698_v57  ;;  %v843_v1 = vpack.c.bf16 %v698_v57, %v696_v45  ;;  %v1031_v41 = vpop.f32.mrf.mxu0 }
 0x2e6   :  { %v5828_v62 = vpop.eup %5827 }
 0x2e7   :  { %v694_v33 = vmul.f32 %v5828_v62, %v6640_v11  ;;  %v5432_v15 = vpop.f32.mrf.mxu0 }
 0x2e8   :  { %v670_v61 = vpop.xlane.xlu1 %669 }
 0x2e9   :  { %5833 = vrcp.f32 %v670_v61  ;;  %720 = vst [vmem:[#allocation2 + $0x28] sm:$0xff] %v694_v33  ;;  %v842_v3 = vpack.c.bf16 %v694_v33, %v692_v48  ;;  %v1034_v45 = vpop.f32.mrf.mxu0 }
 0x2ea   :  { %v5830_v63 = vpop.eup %5829 }
 0x2eb   :  { %5409 = vmatprep.mubr.bf16.mxu1 %v842_v3  ;;  %v704_v32 = vmul.f32 %v5830_v63, %v6643_v37  ;;  %v5435_v48 = vpop.f32.mrf.mxu0  ;;  %v1078_v3 = vpack.c.bf16 %v1018_v13, %v1015_v60 }
 0x2ec   :  { %5410 = vmatmul.mubr.bf16.gmra.mxu1 %v843_v1  ;;  %v674_v6 = vpop.xlane.xlu1 %673 }
 0x2ed   :  { %5835 = vrcp.f32 %v674_v6  ;;  %725 = vst [vmem:[#allocation2 + $0x50] sm:$0xff] %v704_v32  ;;  %v1047_v33 = vpop.f32.mrf.mxu0 }
 0x2ee   :  { %v5832_v2 = vpop.eup %5831 }
 0x2ef   :  { %v700_v7 = vmul.f32 %v5832_v2, %v6648_v20  ;;  %v1081_v2 = vpack.c.bf16 %v5432_v15, %v5431_v14  ;;  %v5734_v14 = vld [vmem:[%s8374_s2 + $0x10] sm:$0xff]  }
 0x2f0   :  { %v676_v11 = vpop.xlane.xlu1 %675 }
 0x2f1   :  { %5837 = vrcp.f32 %v676_v11  ;;  %723 = vst [vmem:[#allocation2 + $0x40] sm:$0xff] %v700_v7 }
 0x2f4   :  { %v678_v4 = vpop.xlane.xlu0 %677  ;;  %v680_v19 = vpop.xlane.xlu1 %679 }
 0x2f5   :  { %5839 = vrcp.f32 %v678_v4 }
 0x2f6   :  { %v5834_v21 = vpop.eup %5833  ;;  %5841 = vrcp.f32 %v680_v19 }
 0x2f7   :  { %v702_v37 = vmul.f32 %v5834_v21, %v6653_v44 }
 0x2f8   :  { %v682_v30 = vpop.xlane.xlu0 %681 }
 0x2f9   :  { %5843 = vrcp.f32 %v682_v30  ;;  %724 = vst [vmem:[#allocation2 + $0x48] sm:$0xff] %v702_v37  ;;  %v844_v22 = vpack.c.bf16 %v702_v37, %v700_v7 }
 0x2fa   :  { %v5836_v49 = vpop.eup %5835 }
 0x2fb   :  { %5413 = vmatprep.mubr.bf16.mxu1 %v844_v22  ;;  %v706_v20 = vmul.f32 %v5836_v49, %v6656_v46 }
 0x2fd   :  { %726 = vst [vmem:[#allocation2 + $0x58] sm:$0xff] %v706_v20  ;;  %v845_v28 = vpack.c.bf16 %v706_v20, %v704_v32  ;;  %v1080_v32 = vpack.c.bf16 %v1034_v45, %v1031_v41 }
 0x2fe   :  { %v5838_v53 = vpop.eup %5837 }
 0x2ff   :  { %5414 = vmatmul.mubr.bf16.gmra.mxu1 %v845_v28  ;;  %v708_v36 = vmul.f32 %v5838_v53, %v6659_v29  ;;  %v5436_v29 = vpop.f32.mrf.mxu0 }
 0x300   :  { %v1083_v13 = vpack.c.bf16 %v5436_v29, %v5435_v48 }
 0x301   :  { %727 = vst [vmem:[#allocation2 + $0x60] sm:$0xff] %v708_v36  ;;  %v1050_v1 = vpop.f32.mrf.mxu0 }
 0x302   :  { %v5840_v39 = vpop.eup %5839  ;;  %v1082_v7 = vpack.c.bf16 %v1050_v1, %v1047_v33 }
 0x303   :  { %v5842_v44 = vpop.eup %5841  ;;  %v710_v40 = vmul.f32 %v5840_v39, %v6664_v31  ;;  %v1079_v31 = vpack.c.bf16 %v5428_v8, %v6681_v58  ;;  %v5733_v8 = vld [vmem:[%s8374_s2 + $0x18] sm:$0xff]  }
 0x304   :  { %v712_v57 = vmul.f32 %v5842_v44, %v6662_v52  ;;  %v5439_v52 = vpop.f32.mrf.mxu0  ;;  %5461 = vmatprep.subr.bf16.mxu0 %v5733_v8 }
 0x305   :  { %728 = vst [vmem:[#allocation2 + $0x68] sm:$0xff] %v710_v40  ;;  %v846_v62 = vpack.c.bf16 %v710_v40, %v708_v36  ;;  %5462 = vmatpush3.bf16.msra.mxu0 %v5733_v8 }
 0x306   :  { %v5844_v61 = vpop.eup %5843  ;;  %729 = vst [vmem:[#allocation2 + $0x70] sm:$0xff] %v712_v57  ;;  %v1063_v6 = vpop.f32.mrf.mxu0  ;;  %5463 = vmatprep.subr.bf16.mxu0 %v5734_v14 }
 0x307   :  { %5417 = vmatprep.mubr.bf16.mxu1 %v846_v62  ;;  %v714_v46 = vmul.f32 %v5844_v61, %v6668_v56 }
 0x308   :  { %v5440_v56 = vpop.f32.mrf.mxu0 }
 0x309   :  { %730 = vst [vmem:[#allocation2 + $0x78] sm:$0xff] %v714_v46  ;;  %v847_v63 = vpack.c.bf16 %v714_v46, %v712_v57  ;;  %v1085_v58 = vpack.c.bf16 %v5440_v56, %v5439_v52  ;;  %5464 = vmatpush3.bf16.msra.mxu0 %v5734_v14 }
 0x30a   :  { %v1066_v60 = vpop.f32.mrf.mxu0 }
 0x30b   :  { %5418 = vmatmul.mubr.bf16.gmra.mxu1 %v847_v63  ;;  %v1084_v11 = vpack.c.bf16 %v1066_v60, %v1063_v6 }
 0x30c   :  { %5445 = vmatprep.mubr.msk.bf16.mxu1 %vm320_vm0, %v1078_v3  ;;  %5466 = vmatmul.mubr.msk.bf16.vlgmr.msra.gmra.mxu0 %vm320_vm0, %v6308_v10 }
 0x30d   :  { %5469 = vmatprep.mubr.msk.bf16.mxu0 %vm320_vm0, %v6313_v12 }
 0x313   :  { %5446 = vmatmul.mubr.msk.bf16.vlgmr.msra.gmra.mxu1 %vm320_vm0, %v1079_v31 }
 0x314   :  { %5449 = vmatprep.mubr.msk.bf16.mxu1 %vm320_vm0, %v1080_v32  ;;  %5470 = vmatmul.mubr.msk.bf16.gmra.mxu0 %vm320_vm0, %v6361_v26 }
 0x315   :  { %5473 = vmatprep.mubr.msk.bf16.mxu0 %vm320_vm0, %v6327_v17 }
 0x31b   :  { %5450 = vmatmul.mubr.msk.bf16.gmra.mxu1 %vm320_vm0, %v1081_v2 }
 0x31c   :  { %5453 = vmatprep.mubr.msk.bf16.mxu1 %vm320_vm0, %v1082_v7  ;;  %5474 = vmatmul.mubr.msk.bf16.gmra.mxu0 %vm320_vm0, %v6329_v18 }
 0x31d   :  { %5477 = vmatprep.mubr.msk.bf16.mxu0 %vm320_vm0, %v6343_v23 }
 0x323   :  { %5454 = vmatmul.mubr.msk.bf16.gmra.mxu1 %vm320_vm0, %v1083_v13 }
 0x324   :  { %5457 = vmatprep.mubr.msk.bf16.mxu1 %vm320_vm0, %v1084_v11  ;;  %5478 = vmatmul.mubr.msk.bf16.gmra.mxu0 %vm320_vm0, %v6363_v27 }
 0x32b   :  { %5458 = vmatmul.mubr.msk.bf16.gmra.mxu1 %vm320_vm0, %v1085_v58 }
 0x39c   :  { %v6721_v4 = vpop.f32.mrf.mxu1 }
 0x39e   :  { %v6723_v10 = vpop.f32.mrf.mxu1 }
 0x3a0   :  { %v6725_v12 = vpop.f32.mrf.mxu1 }
 0x3a2   :  { %v6727_v19 = vpop.f32.mrf.mxu1 }
 0x3ac   :  { %v6729_v26 = vpop.f32.mrf.mxu1 }
 0x3ae   :  { %v6731_v17 = vpop.f32.mrf.mxu1 }
 0x3b0   :  { %v6733_v41 = vpop.f32.mrf.mxu1 }
 0x3b2   :  { %v6735_v18 = vpop.f32.mrf.mxu1 }
 0x3bf   :  { %v6737_v23 = vpop.f32.mrf.mxu1 }
 0x3c1   :  { %v6739_v21 = vpop.f32.mrf.mxu1 }
 0x3c3   :  { %v6741_v27 = vpop.f32.mrf.mxu1 }
 0x3c5   :  { %v6743_v37 = vpop.f32.mrf.mxu1 }
 0x3cb   :  { %v6745_v30 = vpop.f32.mrf.mxu1 }
 0x3cd   :  { %v6747_v22 = vpop.f32.mrf.mxu1 }
 0x3cf   :  { %v6749_v15 = vpop.f32.mrf.mxu1 }
 0x3d1   :  { %v6751_v49 = vpop.f32.mrf.mxu1 }
 0x3d3   :  { %v5447_v20 = vpop.f32.mrf.mxu1 }
 0x3d4   :  { %v6758_v48 = vadd.f32 %v5447_v20, %v6417_v34 }
 0x3d5   :  { %v1144_v28 = vpop.f32.mrf.mxu1 }
 0x3d6   :  { %v6754_v45 = vadd.f32 %v1144_v28, %v6427_v38  ;;  %v5467_v28 = vpop.f32.mrf.mxu0 }
 0x3d7   :  { %v5448_v53 = vpop.f32.mrf.mxu1 }
 0x3d8   :  { %1207 = vmax.xlane.f32.xlu1 %v6754_v45  ;;  %v6766_v57 = vadd.f32 %v5448_v53, %v6438_v42  ;;  %v1414_v53 = vpop.f32.mrf.mxu0 }
 0x3d9   :  { %v1147_v36 = vpop.f32.mrf.mxu1 }
 0x3da   :  { %v6761_v39 = vadd.f32 %v1147_v36, %v6449_v47  ;;  %v5468_v36 = vpop.f32.mrf.mxu0 }
 0x3db   :  { %v5451_v44 = vpop.f32.mrf.mxu1 }
 0x3dc   :  { %1209 = vmax.xlane.f32.xlu0 %v6761_v39  ;;  %1211 = vmax.xlane.f32.xlu1 %v6758_v48  ;;  %v6774_v46 = vadd.f32 %v5451_v44, %v6460_v50  ;;  %v1417_v44 = vpop.f32.mrf.mxu0 }
 0x3dd   :  { %v1160_v40 = vpop.f32.mrf.mxu1 }
 0x3de   :  { %v6769_v62 = vadd.f32 %v1160_v40, %v6471_v54  ;;  %v5471_v40 = vpop.f32.mrf.mxu0 }
 0x3df   :  { %v5452_v33 = vpop.f32.mrf.mxu1 }
 0x3e0   :  { %1213 = vmax.xlane.f32.xlu0 %v6766_v57  ;;  %1215 = vmax.xlane.f32.xlu1 %v6769_v62  ;;  %v6782_v1 = vadd.f32 %v5452_v33, %v6485_v59  ;;  %v1430_v33 = vpop.f32.mrf.mxu0 }
 0x3e1   :  { %v1163_v61 = vpop.f32.mrf.mxu1 }
 0x3e2   :  { %v6777_v3 = vadd.f32 %v1163_v61, %v6496_v0  ;;  %v5472_v61 = vpop.f32.mrf.mxu0 }
 0x3e3   :  { %v5455_v63 = vpop.f32.mrf.mxu1 }
 0x3e4   :  { %1217 = vmax.xlane.f32.xlu0 %v6777_v3  ;;  %1219 = vmax.xlane.f32.xlu1 %v6774_v46  ;;  %v6788_v52 = vadd.f32 %v5455_v63, %v6507_v5  ;;  %v1433_v63 = vpop.f32.mrf.mxu0  ;;  %v1486_v5 = vpack.c.bf16 %v5468_v36, %v5467_v28 }
 0x3e5   :  { %v1176_v29 = vpop.f32.mrf.mxu1 }
 0x3e6   :  { %v6785_v32 = vadd.f32 %v1176_v29, %v6518_v9  ;;  %v5475_v29 = vpop.f32.mrf.mxu0  ;;  %v1487_v9 = vpack.c.bf16 %v1433_v63, %v1430_v33 }
 0x3e7   :  { %v5456_v31 = vpop.f32.mrf.mxu1 }
 0x3e8   :  { %1221 = vmax.xlane.f32.xlu0 %v6782_v1  ;;  %1223 = vmax.xlane.f32.xlu1 %v6785_v32  ;;  %v6796_v56 = vadd.f32 %v5456_v31, %v6532_v16  ;;  %v1446_v31 = vpop.f32.mrf.mxu0  ;;  %v1488_v16 = vpack.c.bf16 %v5472_v61, %v5471_v40 }
 0x3e9   :  { %v1179_v6 = vpop.f32.mrf.mxu1 }
 0x3ea   :  { %v6793_v2 = vadd.f32 %v1179_v6, %v6543_v24  ;;  %v5476_v6 = vpop.f32.mrf.mxu0 }
 0x3eb   :  { %v5459_v7 = vpop.f32.mrf.mxu1 }
 0x3ec   :  { %1225 = vmax.xlane.f32.xlu0 %v6793_v2  ;;  %1227 = vmax.xlane.f32.xlu1 %v6788_v52  ;;  %v6804_v58 = vadd.f32 %v5459_v7, %v6558_v35  ;;  %v1449_v7 = vpop.f32.mrf.mxu0  ;;  %v1490_v35 = vpack.c.bf16 %v5476_v6, %v5475_v29 }
 0x3ed   :  { %v1192_v60 = vpop.f32.mrf.mxu1  ;;  %v1489_v24 = vpack.c.bf16 %v1449_v7, %v1446_v31 }
 0x3ee   :  { %v6801_v13 = vadd.f32 %v1192_v60, %v6569_v43  ;;  %v5479_v60 = vpop.f32.mrf.mxu0 }
 0x3ef   :  { %v5460_v11 = vpop.f32.mrf.mxu1 }
 0x3f0   :  { %1229 = vmax.xlane.f32.xlu0 %v6796_v56  ;;  %1231 = vmax.xlane.f32.xlu1 %v6801_v13  ;;  %v6812_v20 = vadd.f32 %v5460_v11, %v6592_v55  ;;  %v1462_v11 = vpop.f32.mrf.mxu0 }
 0x3f1   :  { %v1195_v8 = vpop.f32.mrf.mxu1 }
 0x3f2   :  { %v6809_v14 = vadd.f32 %v1195_v8, %v6583_v51  ;;  %v5480_v8 = vpop.f32.mrf.mxu0 }
 0x3f3   :  { %v1492_v55 = vpack.c.bf16 %v5480_v8, %v5479_v60  ;;  %v1485_v60 = vpack.c.bf16 %v1417_v44, %v1414_v53 }
 0x3f4   :  { %1233 = vmax.xlane.f32.xlu0 %v6809_v14  ;;  %1235 = vmax.xlane.f32.xlu1 %v6804_v58  ;;  %v1465_v51 = vpop.f32.mrf.mxu0 }
 0x3f5   :  { %5481 = vmatprep.subr.bf16.mxu1 %v1492_v55  ;;  %v1491_v43 = vpack.c.bf16 %v1465_v51, %v1462_v11 }
 0x3f6   :  { %5482 = vmatpush3.bf16.msra.mxu1 %v1492_v55 }
 0x3f7   :  { %5483 = vmatprep.subr.bf16.mxu1 %v1491_v43 }
 0x3f8   :  { %1237 = vmax.xlane.f32.xlu0 %v6812_v20 }
 0x3fa   :  { %5484 = vmatpush3.bf16.msra.mxu1 %v1491_v43 }
 0x3fb   :  { %5485 = vmatprep.subr.bf16.mxu1 %v1490_v35 }
 0x3fe   :  { %5486 = vmatpush3.bf16.msra.mxu1 %v1490_v35 }
 0x3ff   :  { %5487 = vmatprep.subr.bf16.mxu1 %v1489_v24 }
 0x402   :  { %5488 = vmatpush3.bf16.msra.mxu1 %v1489_v24 }
 0x403   :  { %5489 = vmatprep.subr.bf16.mxu1 %v1488_v16 }
 0x406   :  { %5490 = vmatpush3.bf16.msra.mxu1 %v1488_v16 }
 0x407   :  { %5491 = vmatprep.subr.bf16.mxu1 %v1487_v9 }
 0x40a   :  { %5492 = vmatpush3.bf16.msra.mxu1 %v1487_v9 }
 0x40b   :  { %5493 = vmatprep.subr.bf16.mxu1 %v1486_v5 }
 0x40e   :  { %5494 = vmatpush3.bf16.msra.mxu1 %v1486_v5 }
 0x40f   :  { %5495 = vmatprep.subr.bf16.mxu1 %v1485_v60 }
 0x412   :  { %5496 = vmatpush3.bf16.msra.mxu1 %v1485_v60 }
 0x461   :  { %v1208_v51 = vpop.xlane.xlu1 %1207 }
 0x462   :  { %v1239_v43 = vsub.f32 %v6754_v45, %v1208_v51 }
 0x464   :  { %v1255_v55 = vmul.f32 1.442695, %v1239_v43 }
 0x465   :  { %v1210_v29 = vpop.xlane.xlu0 %1209  ;;  %v1212_v35 = vpop.xlane.xlu1 %1211 }
 0x466   :  { %5845 = vpow2.f32 %v1255_v55  ;;  %v1240_v24 = vsub.f32 %v6761_v39, %v1210_v29  ;;  %v1241_v40 = vsub.f32 %v6758_v48, %v1212_v35 }
 0x468   :  { %v1257_v16 = vmul.f32 1.442695, %v1240_v24  ;;  %v1259_v28 = vmul.f32 1.442695, %v1241_v40 }
 0x469   :  { %v1214_v36 = vpop.xlane.xlu0 %1213  ;;  %v1216_v9 = vpop.xlane.xlu1 %1215 }
 0x46a   :  { %5847 = vpow2.f32 %v1257_v16  ;;  %v1242_v5 = vsub.f32 %v6766_v57, %v1214_v36  ;;  %v1243_v53 = vsub.f32 %v6769_v62, %v1216_v9 }
 0x46b   :  { %5849 = vpow2.f32 %v1259_v28 }
 0x46c   :  { %v1261_v44 = vmul.f32 1.442695, %v1242_v5  ;;  %v1263_v45 = vmul.f32 1.442695, %v1243_v53 }
 0x46d   :  { %v1218_v33 = vpop.xlane.xlu0 %1217  ;;  %v1220_v61 = vpop.xlane.xlu1 %1219 }
 0x46e   :  { %5851 = vpow2.f32 %v1261_v44  ;;  %v1244_v63 = vsub.f32 %v6777_v3, %v1218_v33  ;;  %v1245_v39 = vsub.f32 %v6774_v46, %v1220_v61 }
 0x46f   :  { %5853 = vpow2.f32 %v1263_v45 }
 0x470   :  { %v1265_v48 = vmul.f32 1.442695, %v1244_v63  ;;  %v1267_v31 = vmul.f32 1.442695, %v1245_v39 }
 0x471   :  { %v1222_v6 = vpop.xlane.xlu0 %1221  ;;  %v1224_v7 = vpop.xlane.xlu1 %1223 }
 0x472   :  { %5855 = vpow2.f32 %v1265_v48  ;;  %v1246_v57 = vsub.f32 %v6782_v1, %v1222_v6  ;;  %v1247_v62 = vsub.f32 %v6785_v32, %v1224_v7 }
 0x473   :  { %v6826_v11 = vpop.eup %5845  ;;  %5857 = vpow2.f32 %v1267_v31 }
 0x474   :  { %v1269_v8 = vmul.f32 1.442695, %v1246_v57  ;;  %v1271_v60 = vmul.f32 1.442695, %v1247_v62  ;;  %1287 = vadd.xlane.f32.xlu1 %v6826_v11 }
 0x475   :  { %v1226_v3 = vpop.xlane.xlu0 %1225  ;;  %v1228_v51 = vpop.xlane.xlu1 %1227 }
 0x476   :  { %5859 = vpow2.f32 %v1269_v8  ;;  %v1248_v46 = vsub.f32 %v6793_v2, %v1226_v3  ;;  %v1249_v43 = vsub.f32 %v6788_v52, %v1228_v51  ;;  %v5735_v8 = vld [vmem:[%s8376_s4 + $0x20] ss:$16 sps:$4 sm:$0xff]   ;;  %v5740_v3 = vld [vmem:[%s8376_s4 + $0x2c] ss:$16 sps:$4 sm:$0xff]   ;;  %v5743_v51 = vld [vmem:[%s8376_s4 + $0x4] ss:$16 sps:$4 sm:$0xff]  }
 0x477   :  { %v6831_v55 = vpop.eup %5847  ;;  %5861 = vpow2.f32 %v1271_v60  ;;  %v5737_v60 = vld [vmem:[%s8376_s4 + $0x24] ss:$16 sps:$4 sm:$0xff]   ;;  %1803 = vmatprep.subr.bf16.mxu1 %v5740_v3 }
 0x478   :  { %v6833_v1 = vpop.eup %5849  ;;  %v1273_v32 = vmul.f32 1.442695, %v1248_v46  ;;  %v1275_v29 = vmul.f32 1.442695, %v1249_v43  ;;  %1289 = vadd.xlane.f32.xlu0 %v6831_v55  ;;  %1690 = vmatprep.subr.bf16.mxu0 %v5737_v60  ;;  %v5741_v46 = vld [vmem:[%s8376_s4] ss:$16 sps:$4 sm:$0xff]  }
 0x479   :  { %1291 = vadd.xlane.f32.xlu1 %v6833_v1  ;;  %v1230_v35 = vpop.xlane.xlu0 %1229  ;;  %v1232_v24 = vpop.xlane.xlu1 %1231  ;;  %1691 = vmatpush1.bf16.msra.mxu0 %v5735_v8 }
 0x47a   :  { %5863 = vpow2.f32 %v1273_v32  ;;  %v1250_v40 = vsub.f32 %v6796_v56, %v1230_v35  ;;  %v1251_v2 = vsub.f32 %v6801_v13, %v1232_v24  ;;  %1692 = vmatprep.subr.bf16.mxu0 %v5743_v51 }
 0x47b   :  { %v6839_v16 = vpop.eup %5851  ;;  %5865 = vpow2.f32 %v1275_v29 }
 0x47c   :  { %v6841_v52 = vpop.eup %5853  ;;  %v1277_v28 = vmul.f32 1.442695, %v1250_v40  ;;  %v1279_v36 = vmul.f32 1.442695, %v1251_v2  ;;  %1293 = vadd.xlane.f32.xlu0 %v6839_v16 }
 0x47d   :  { %1295 = vadd.xlane.f32.xlu1 %v6841_v52  ;;  %v1234_v9 = vpop.xlane.xlu0 %1233  ;;  %v1236_v5 = vpop.xlane.xlu1 %1235  ;;  %1693 = vmatpush1.bf16.msra.mxu0 %v5741_v46 }
 0x47e   :  { %5867 = vpow2.f32 %v1277_v28  ;;  %v1252_v53 = vsub.f32 %v6809_v14, %v1234_v9  ;;  %v1253_v56 = vsub.f32 %v6804_v58, %v1236_v5 }
 0x47f   :  { %v6847_v44 = vpop.eup %5855  ;;  %5869 = vpow2.f32 %v1279_v36 }
 0x480   :  { %v6849_v13 = vpop.eup %5857  ;;  %v1281_v45 = vmul.f32 1.442695, %v1252_v53  ;;  %v1283_v33 = vmul.f32 1.442695, %v1253_v56  ;;  %1297 = vadd.xlane.f32.xlu0 %v6847_v44 }
 0x481   :  { %1299 = vadd.xlane.f32.xlu1 %v6849_v13  ;;  %v1238_v61 = vpop.xlane.xlu0 %1237 }
 0x482   :  { %5871 = vpow2.f32 %v1281_v45  ;;  %v1254_v63 = vsub.f32 %v6812_v20, %v1238_v61 }
 0x483   :  { %v6854_v39 = vpop.eup %5859  ;;  %5873 = vpow2.f32 %v1283_v33 }
 0x484   :  { %v6856_v14 = vpop.eup %5861  ;;  %v1285_v58 = vmul.f32 1.442695, %v1254_v63  ;;  %1301 = vadd.xlane.f32.xlu0 %v6854_v39 }
 0x485   :  { %1303 = vadd.xlane.f32.xlu1 %v6856_v14 }
 0x486   :  { %5875 = vpow2.f32 %v1285_v58 }
 0x487   :  { %v6860_v48 = vpop.eup %5863 }
 0x488   :  { %v6862_v31 = vpop.eup %5865  ;;  %1305 = vadd.xlane.f32.xlu0 %v6860_v48 }
 0x489   :  { %1307 = vadd.xlane.f32.xlu1 %v6862_v31 }
 0x48b   :  { %v6866_v20 = vpop.eup %5867 }
 0x48c   :  { %v6868_v6 = vpop.eup %5869  ;;  %1309 = vadd.xlane.f32.xlu0 %v6866_v20 }
 0x48d   :  { %1311 = vadd.xlane.f32.xlu1 %v6868_v6 }
 0x48f   :  { %v6872_v7 = vpop.eup %5871 }
 0x490   :  { %v6874_v57 = vpop.eup %5873  ;;  %1313 = vadd.xlane.f32.xlu0 %v6872_v7 }
 0x491   :  { %1315 = vadd.xlane.f32.xlu1 %v6874_v57 }
 0x493   :  { %v6878_v62 = vpop.eup %5875 }
 0x494   :  { %1317 = vadd.xlane.f32.xlu0 %v6878_v62 }
 0x4fd   :  { %v1288_v43 = vpop.xlane.xlu1 %1287 }
 0x4fe   :  { %5877 = vrcp.f32 %v1288_v43  ;;  %v5746_v43 = vld [vmem:[%s8376_s4 + $0xc] ss:$16 sps:$4 sm:$0xff]  }
 0x501   :  { %v1290_v32 = vpop.xlane.xlu0 %1289 }
 0x502   :  { %5879 = vrcp.f32 %v1290_v32  ;;  %v1292_v29 = vpop.xlane.xlu1 %1291 }
 0x503   :  { %5881 = vrcp.f32 %v1292_v29 }
 0x505   :  { %v1294_v35 = vpop.xlane.xlu0 %1293 }
 0x506   :  { %5883 = vrcp.f32 %v1294_v35  ;;  %v1296_v24 = vpop.xlane.xlu1 %1295 }
 0x507   :  { %5885 = vrcp.f32 %v1296_v24  ;;  %v5744_v24 = vld [vmem:[%s8376_s4 + $0x8] ss:$16 sps:$4 sm:$0xff]  }
 0x509   :  { %v1298_v40 = vpop.xlane.xlu0 %1297 }
 0x50a   :  { %5887 = vrcp.f32 %v1298_v40  ;;  %v1300_v2 = vpop.xlane.xlu1 %1299 }
 0x50b   :  { %v5878_v28 = vpop.eup %5877  ;;  %5889 = vrcp.f32 %v1300_v2 }
 0x50c   :  { %v1320_v36 = vmul.f32 %v5878_v28, %v6826_v11 }
 0x50d   :  { %v1302_v9 = vpop.xlane.xlu0 %1301 }
 0x50e   :  { %5891 = vrcp.f32 %v1302_v9  ;;  %v1304_v5 = vpop.xlane.xlu1 %1303  ;;  %1352 = vst [vmem:[#allocation2 + $0x80] sm:$0xff] %v1320_v36 }
 0x50f   :  { %v5880_v53 = vpop.eup %5879  ;;  %5893 = vrcp.f32 %v1304_v5 }
 0x510   :  { %v5882_v56 = vpop.eup %5881  ;;  %v1322_v45 = vmul.f32 %v5880_v53, %v6831_v55  ;;  %v5738_v55 = vld [vmem:[%s8376_s4 + $0x28] ss:$16 sps:$4 sm:$0xff]  }
 0x511   :  { %v1306_v33 = vpop.xlane.xlu0 %1305  ;;  %v1324_v61 = vmul.f32 %v5882_v56, %v6833_v1 }
 0x512   :  { %5895 = vrcp.f32 %v1306_v33  ;;  %v1308_v63 = vpop.xlane.xlu1 %1307  ;;  %1353 = vst [vmem:[#allocation2 + $0x88] sm:$0xff] %v1322_v45  ;;  %v1477_v58 = vpack.c.bf16 %v1322_v45, %v1320_v36 }
 0x513   :  { %v5884_v8 = vpop.eup %5883  ;;  %5897 = vrcp.f32 %v1308_v63  ;;  %1354 = vst [vmem:[#allocation2 + $0x90] sm:$0xff] %v1324_v61 }
 0x514   :  { %v5886_v11 = vpop.eup %5885  ;;  %5497 = vmatprep.mubr.bf16.mxu1 %v1477_v58  ;;  %v1326_v60 = vmul.f32 %v5884_v8, %v6839_v16 }
 0x515   :  { %v1310_v3 = vpop.xlane.xlu0 %1309  ;;  %v1328_v51 = vmul.f32 %v5886_v11, %v6841_v52 }
 0x516   :  { %5899 = vrcp.f32 %v1310_v3  ;;  %v1312_v1 = vpop.xlane.xlu1 %1311  ;;  %1355 = vst [vmem:[#allocation2 + $0x98] sm:$0xff] %v1326_v60  ;;  %v1478_v46 = vpack.c.bf16 %v1326_v60, %v1324_v61 }
 0x517   :  { %v5888_v32 = vpop.eup %5887  ;;  %5901 = vrcp.f32 %v1312_v1  ;;  %1356 = vst [vmem:[#allocation2 + $0xa0] sm:$0xff] %v1328_v51 }
 0x518   :  { %v5890_v29 = vpop.eup %5889  ;;  %5498 = vmatmul.mubr.bf16.vlgmr.msra.gmra.mxu1 %v1478_v46  ;;  %v1330_v16 = vmul.f32 %v5888_v32, %v6847_v44  ;;  %v6101_v46 = vld [vmem:[%s8372_s0] sm:$0xff]  ;;  %v6102_v32 = vld [vmem:[%s8372_s0 + $0x8] sm:$0xff] }
 0x519   :  { %v1314_v52 = vpop.xlane.xlu0 %1313  ;;  %v1332_v35 = vmul.f32 %v5890_v29, %v6849_v13  ;;  %1804 = vmatpush1.bf16.msra.mxu1 %v5738_v55 }
 0x51a   :  { %5903 = vrcp.f32 %v1314_v52  ;;  %v1316_v40 = vpop.xlane.xlu1 %1315  ;;  %1357 = vst [vmem:[#allocation2 + $0xa8] sm:$0xff] %v1330_v16  ;;  %v1479_v2 = vpack.c.bf16 %v1330_v16, %v1328_v51  ;;  %1805 = vmatprep.subr.bf16.mxu1 %v5746_v43 }
 0x51b   :  { %v5892_v28 = vpop.eup %5891  ;;  %5905 = vrcp.f32 %v1316_v40  ;;  %1358 = vst [vmem:[#allocation2 + $0xb0] sm:$0xff] %v1332_v35 }
 0x51c   :  { %v5894_v36 = vpop.eup %5893  ;;  %5501 = vmatprep.mubr.bf16.mxu1 %v1479_v2  ;;  %v1334_v44 = vmul.f32 %v5892_v28, %v6854_v39  ;;  %v6103_v2 = vld [vmem:[%s8372_s0 + $0x18] sm:$0xff] }
 0x51d   :  { %v1318_v9 = vpop.xlane.xlu0 %1317  ;;  %v1336_v13 = vmul.f32 %v5894_v36, %v6856_v14  ;;  %1806 = vmatpush1.bf16.msra.mxu1 %v5744_v24 }
 0x51e   :  { %5907 = vrcp.f32 %v1318_v9  ;;  %1359 = vst [vmem:[#allocation2 + $0xb8] sm:$0xff] %v1334_v44  ;;  %v1480_v5 = vpack.c.bf16 %v1334_v44, %v1332_v35 }
 0x51f   :  { %v5896_v53 = vpop.eup %5895  ;;  %1360 = vst [vmem:[#allocation2 + $0xc0] sm:$0xff] %v1336_v13 }
 0x520   :  { %v5898_v56 = vpop.eup %5897  ;;  %5502 = vmatmul.mubr.bf16.gmra.mxu1 %v1480_v5  ;;  %v1338_v45 = vmul.f32 %v5896_v53, %v6860_v48  ;;  %v5749_v5 = vld [vmem:[%s8378_s6 + $0x38] sm:$0xff]  }
 0x521   :  { %v1340_v33 = vmul.f32 %v5898_v56, %v6862_v31  ;;  %v5750_v53 = vld [vmem:[%s8378_s6 + $0xb8] sm:$0xff]  }
 0x522   :  { %1361 = vst [vmem:[#allocation2 + $0xc8] sm:$0xff] %v1338_v45  ;;  %v1481_v61 = vpack.c.bf16 %v1338_v45, %v1336_v13  ;;  %v6104_v13 = vld [vmem:[%s8372_s0 + $0x10] sm:$0xff] }
 0x523   :  { %v5900_v63 = vpop.eup %5899  ;;  %1362 = vst [vmem:[#allocation2 + $0xd0] sm:$0xff] %v1340_v33  ;;  %v5751_v45 = vld [vmem:[%s8378_s6 + $0x70] sm:$0xff]  }
 0x524   :  { %v5902_v39 = vpop.eup %5901  ;;  %5505 = vmatprep.mubr.bf16.mxu1 %v1481_v61  ;;  %v1342_v14 = vmul.f32 %v5900_v63, %v6866_v20 }
 0x525   :  { %v1344_v58 = vmul.f32 %v5902_v39, %v6868_v6  ;;  %v8400_v6 = vmov 0  }
 0x526   :  { %1363 = vst [vmem:[#allocation2 + $0xd8] sm:$0xff] %v1342_v14  ;;  %v1482_v8 = vpack.c.bf16 %v1342_v14, %v1340_v33  ;;  %1710 = vmatprep.mubr.bf16.mxu0 %v8400_v6  ;;  %v5752_v33 = vld [vmem:[%s8378_s6 + $0xf0] sm:$0xff]  }
 0x527   :  { %v5904_v11 = vpop.eup %5903  ;;  %1364 = vst [vmem:[#allocation2 + $0xe0] sm:$0xff] %v1344_v58  ;;  %v5753_v14 = vld [vmem:[%s8378_s6 + $0x30] sm:$0xff]  }
 0x528   :  { %v5906_v60 = vpop.eup %5905  ;;  %5506 = vmatmul.mubr.bf16.gmra.mxu1 %v1482_v8  ;;  %v1346_v48 = vmul.f32 %v5904_v11, %v6872_v7  ;;  %v5747_v7 = vld [vmem:[%s8378_s6 + $0x78] sm:$0xff]   ;;  %v5755_v8 = vld [vmem:[%s8378_s6 + $0x68] sm:$0xff]  }
 0x529   :  { %v1348_v31 = vmul.f32 %v5906_v60, %v6874_v57  ;;  %v5748_v57 = vld [vmem:[%s8378_s6 + $0xf8] sm:$0xff]   ;;  %4971 = vmatprep.subr.bf16.mxu0 %v5747_v7  ;;  %v6105_v11 = vld [vmem:[%s8372_s0 + $0x28] sm:$0xff] }
 0x52a   :  { %1365 = vst [vmem:[#allocation2 + $0xe8] sm:$0xff] %v1346_v48  ;;  %v1483_v3 = vpack.c.bf16 %v1346_v48, %v1344_v58  ;;  %5035 = vmatprep.subr.bf16.mxu1 %v5748_v57  ;;  %v5759_v57 = vld [vmem:[%s8378_s6 + $0x60] sm:$0xff]  }
 0x52b   :  { %v5908_v51 = vpop.eup %5907  ;;  %1366 = vst [vmem:[#allocation2 + $0xf0] sm:$0xff] %v1348_v31 }
 0x52c   :  { %5509 = vmatprep.mubr.bf16.mxu1 %v1483_v3  ;;  %v1350_v55 = vmul.f32 %v5908_v51, %v6878_v62  ;;  %v6932_v62 = vld [vmem:[%s8375_s3] ss:$0 sm:$0xff] }
 0x52d   :  { %v292_v43 = vadd.f32 %v6101_v46, %v6932_v62  ;;  %v293_v29 = vadd.f32 %v6102_v32, %v6932_v62  ;;  %v295_v28 = vadd.f32 %v6103_v2, %v6932_v62  ;;  %v297_v60 = vadd.f32 %v6105_v11, %v6932_v62  ;;  %v6108_v2 = vld [vmem:[%s8372_s0 + $0x30] sm:$0xff]  ;;  %v6110_v11 = vld [vmem:[%s8372_s0 + $0x40] sm:$0xff] }
 0x52e   :  { %1367 = vst [vmem:[#allocation2 + $0xf8] sm:$0xff] %v1350_v55  ;;  %v1484_v20 = vpack.c.bf16 %v1350_v55, %v1348_v31  ;;  %v6106_v31 = vld [vmem:[%s8372_s0 + $0x20] sm:$0xff]  ;;  %v5757_v55 = vld [vmem:[%s8378_s6 + $0x28] sm:$0xff]  }
 0x52f   :  { %v953_v35 = vadd.f32 %v6723_v10, %v292_v43  ;;  %v954_v24 = vadd.f32 %v6727_v19, %v293_v29  ;;  %v294_v10 = vadd.f32 %v6104_v13, %v6932_v62  ;;  %v956_v61 = vadd.f32 %v6725_v12, %v295_v28  ;;  %v5754_v12 = vld [vmem:[%s8378_s6 + $0xb0] sm:$0xff]   ;;  %v5761_v29 = vld [vmem:[%s8378_s6 + $0x20] sm:$0xff]  }
 0x530   :  { %5510 = vmatmul.mubr.bf16.gmra.mxu1 %v1484_v20  ;;  %v296_v3 = vadd.f32 %v6106_v31, %v6932_v62  ;;  %v5758_v20 = vld [vmem:[%s8378_s6 + $0xa8] sm:$0xff]   ;;  %v958_v46 = vadd.f32 %v6735_v18, %v297_v60  ;;  %v5762_v18 = vld [vmem:[%s8378_s6 + $0xa0] sm:$0xff]   ;;  %v298_v28 = vadd.f32 %v6108_v2, %v6932_v62  ;;  %v300_v60 = vadd.f32 %v6110_v11, %v6932_v62 }
 0x531   :  { %1823 = vmatprep.mubr.bf16.mxu1 %v8400_v6  ;;  %v955_v63 = vadd.f32 %v6721_v4, %v294_v10  ;;  %v5756_v4 = vld [vmem:[%s8378_s6 + $0xe8] sm:$0xff]   ;;  %v5765_v10 = vld [vmem:[%s8378_s6 + $0x18] sm:$0xff]  }
 0x532   :  { %v957_v43 = vadd.f32 %v6731_v17, %v296_v3  ;;  %v5763_v17 = vld [vmem:[%s8378_s6 + $0x58] sm:$0xff]   ;;  %v5773_v3 = vld [vmem:[%s8378_s6 + $0x8] sm:$0xff]  }
 0x533   :  { %v6113_v2 = vld [vmem:[%s8372_s0 + $0x68] sm:$0xff] }
 0x534   :  { %v6117_v11 = vld [vmem:[%s8373_s1 + $0x8] sm:$0xff]  }
 0x5d8   :  { %v5499_v1 = vpop.f32.mrf.mxu1 }
 0x5d9   :  { %v6996_v48 = vadd.f32 %v5499_v1, %v955_v63  ;;  %v5760_v1 = vld [vmem:[%s8378_s6 + $0xe0] sm:$0xff]   ;;  %v5769_v63 = vld [vmem:[%s8378_s6 + $0x10] sm:$0xff]  }
 0x5da   :  { %v1527_v16 = vpop.f32.mrf.mxu1 }
 0x5db   :  { %v6948_v36 = vadd.f32 %v1527_v16, %v953_v35  ;;  %v6107_v35 = vld [vmem:[%s8372_s0 + $0x38] sm:$0xff] }
 0x5dc   :  { %v5500_v52 = vpop.f32.mrf.mxu1 }
 0x5dd   :  { %v6978_v39 = vadd.f32 %v5500_v52, %v956_v61  ;;  %v5764_v52 = vld [vmem:[%s8378_s6 + $0xd8] sm:$0xff]  }
 0x5de   :  { %v1530_v40 = vpop.f32.mrf.mxu1 }
 0x5df   :  { %v6950_v44 = vadd.f32 %v1530_v40, %v954_v24  ;;  %v1607_v51 = vpack.c.bf16 %v6978_v39, %v6996_v48  ;;  %v299_v24 = vadd.f32 %v6107_v35, %v6932_v62 }
 0x5e0   :  { %v6952_v9 = vpop.f32.mrf.mxu1 }
 0x5e1   :  { %v1606_v19 = vpack.c.bf16 %v6950_v44, %v6948_v36 }
 0x5e2   :  { %v1543_v56 = vpop.f32.mrf.mxu1 }
 0x5e3   :  { %4756 = vmatmul.mubr.msk.bf16.vlgmr.msra.gmra.mxu0 %vm320_vm0, %v1606_v19  ;;  %4764 = vmatmul.mubr.msk.bf16.vlgmr.msra.gmra.mxu1 %vm320_vm0, %v1606_v19  ;;  %v7042_v40 = vadd.f32 %v1543_v56, %v957_v43  ;;  %v5766_v19 = vld [vmem:[%s8378_s6 + $0x98] sm:$0xff]   ;;  %v5768_v56 = vld [vmem:[%s8378_s6 + $0xd0] sm:$0xff]  }
 0x5e4   :  { %1720 = vmatprep.mubr.bf16.mxu0 %v8400_v6  ;;  %1833 = vmatprep.mubr.bf16.mxu1 %v8400_v6  ;;  %v5504_v58 = vpop.f32.mrf.mxu1  ;;  %v6112_v43 = vld [vmem:[%s8372_s0 + $0x50] sm:$0xff] }
 0x5e5   :  { %4972 = vmatpush3.bf16.msra.mxu0 %v5749_v5  ;;  %5036 = vmatpush3.bf16.msra.mxu1 %v5750_v53  ;;  %v5767_v53 = vld [vmem:[%s8378_s6 + $0x50] sm:$0xff]  }
 0x5e6   :  { %4973 = vmatprep.subr.bf16.mxu0 %v5751_v45  ;;  %5037 = vmatprep.subr.bf16.mxu1 %v5752_v33  ;;  %v1546_v7 = vpop.f32.mrf.mxu1  ;;  %v960_v45 = vadd.f32 %v6733_v41, %v299_v24  ;;  %v959_v33 = vadd.f32 %v6729_v26, %v298_v28  ;;  %v5770_v41 = vld [vmem:[%s8378_s6 + $0x90] sm:$0xff]   ;;  %v5772_v26 = vld [vmem:[%s8378_s6 + $0xc8] sm:$0xff]   ;;  %v305_v28 = vadd.f32 %v6113_v2, %v6932_v62 }
 0x5e7   :  { %v7022_v32 = vadd.f32 %v1546_v7, %v958_v46 }
 0x5e8   :  { %v7030_v16 = vpop.f32.mrf.mxu1  ;;  %v7068_v61 = vadd.f32 %v5504_v58, %v960_v45  ;;  %v6109_v58 = vld [vmem:[%s8372_s0 + $0x48] sm:$0xff] }
 0x5e9   :  { %4974 = vmatpush3.bf16.msra.mxu0 %v5753_v14  ;;  %5038 = vmatpush3.bf16.msra.mxu1 %v5754_v12  ;;  %v1608_v13 = vpack.c.bf16 %v7022_v32, %v7042_v40  ;;  %v5771_v12 = vld [vmem:[%s8378_s6 + $0x48] sm:$0xff]  }
 0x5ea   :  { %4975 = vmatprep.subr.bf16.mxu0 %v5755_v8  ;;  %5039 = vmatprep.subr.bf16.mxu1 %v5756_v4  ;;  %v1559_v5 = vpop.f32.mrf.mxu1  ;;  %v301_v8 = vadd.f32 %v6109_v58, %v6932_v62  ;;  %v7087_v4 = vadd.f32 %v6952_v9, %v959_v33  ;;  %v5774_v9 = vld [vmem:[%s8378_s6 + $0x88] sm:$0xff]   ;;  %v5776_v58 = vld [vmem:[%s8378_s6 + $0xc0] sm:$0xff]  }
 0x5eb   :  { %4757 = vmatmul.mubr.msk.bf16.gmra.mxu0 %vm320_vm0, %v1607_v51  ;;  %4765 = vmatmul.mubr.msk.bf16.gmra.mxu1 %vm320_vm0, %v1607_v51 }
 0x5ec   :  { %1730 = vmatprep.mubr.bf16.mxu0 %v8400_v6  ;;  %1843 = vmatprep.mubr.bf16.mxu1 %v8400_v6  ;;  %v5508_v14 = vpop.f32.mrf.mxu1  ;;  %v1609_v31 = vpack.c.bf16 %v7068_v61, %v7087_v4 }
 0x5ed   :  { %4976 = vmatpush3.bf16.msra.mxu0 %v5757_v55  ;;  %5040 = vmatpush3.bf16.msra.mxu1 %v5758_v20  ;;  %v962_v55 = vadd.f32 %v6743_v37, %v301_v8  ;;  %v961_v20 = vadd.f32 %v6739_v21, %v300_v60  ;;  %v5778_v8 = vld [vmem:[%s8378_s6 + $0x80] sm:$0xff]   ;;  %v229_v60 = vsub.s32 1, %v6404_v25 }
 0x5ee   :  { %4977 = vmatprep.subr.bf16.mxu0 %v5759_v57  ;;  %5041 = vmatprep.subr.bf16.mxu1 %v5760_v1  ;;  %v1562_v51 = vpop.f32.mrf.mxu1  ;;  %v6111_v1 = vld [vmem:[%s8372_s0 + $0x58] sm:$0xff] }
 0x5ef   :  { %v7107_v7 = vadd.f32 %v1562_v51, %v962_v55  ;;  %v303_v37 = vadd.f32 %v6111_v1, %v6932_v62  ;;  %v7113_v46 = vadd.f32 %v1559_v5, %v961_v20  ;;  %v966_v5 = vadd.f32 %v6751_v49, %v305_v28  ;;  %v6116_v49 = vld [vmem:[%s8372_s0 + $0x70] sm:$0xff]  ;;  %v221_v51 = vld [vmem:[%s8377_s5] sm:$0xf] }
 0x5f0   :  { %v5511_v57 = vpop.f32.mrf.mxu1 }
 0x5f1   :  { %4978 = vmatpush3.bf16.msra.mxu0 %v5761_v29  ;;  %5042 = vmatpush3.bf16.msra.mxu1 %v5762_v18  ;;  %v302_v29 = vadd.f32 %v6112_v43, %v6932_v62  ;;  %v1610_v21 = vpack.c.bf16 %v7107_v7, %v7113_v46 }
 0x5f2   :  { %4979 = vmatprep.subr.bf16.mxu0 %v5763_v17  ;;  %5043 = vmatprep.subr.bf16.mxu1 %v5764_v52  ;;  %v1575_v18 = vpop.f32.mrf.mxu1  ;;  %v964_v17 = vadd.f32 %v6741_v27, %v303_v37 }
 0x5f3   :  { %4758 = vmatmul.mubr.msk.bf16.gmra.mxu0 %vm320_vm0, %v1608_v13  ;;  %4766 = vmatmul.mubr.msk.bf16.gmra.mxu1 %vm320_vm0, %v1608_v13  ;;  %v963_v52 = vadd.f32 %v6737_v23, %v302_v29  ;;  %v6114_v13 = vld [vmem:[%s8372_s0 + $0x60] sm:$0xff] }
 0x5f4   :  { %1740 = vmatprep.mubr.bf16.mxu0 %v8400_v6  ;;  %1853 = vmatprep.mubr.bf16.mxu1 %v8400_v6  ;;  %v7127_v35 = vadd.f32 %v5508_v14, %v964_v17  ;;  %v5512_v24 = vpop.f32.mrf.mxu1 }
 0x5f5   :  { %4980 = vmatpush3.bf16.msra.mxu0 %v5765_v10  ;;  %5044 = vmatpush3.bf16.msra.mxu1 %v5766_v19  ;;  %v7134_v27 = vadd.f32 %v7030_v16, %v963_v52  ;;  %v304_v10 = vadd.f32 %v6114_v13, %v6932_v62 }
 0x5f6   :  { %4981 = vmatprep.subr.bf16.mxu0 %v5767_v53  ;;  %5045 = vmatprep.subr.bf16.mxu1 %v5768_v56  ;;  %v1578_v19 = vpop.f32.mrf.mxu1  ;;  %v6115_v56 = vld [vmem:[%s8372_s0 + $0x78] sm:$0xff] }
 0x5f7   :  { %v1611_v23 = vpack.c.bf16 %v7127_v35, %v7134_v27  ;;  %v965_v16 = vadd.f32 %v6747_v22, %v304_v10  ;;  %v7148_v53 = vadd.f32 %v1578_v19, %v966_v5  ;;  %v307_v45 = vadd.f32 %v6115_v56, %v6932_v62 }
 0x5f9   :  { %4982 = vmatpush3.bf16.msra.mxu0 %v5769_v63  ;;  %5046 = vmatpush3.bf16.msra.mxu1 %v5770_v41  ;;  %v7154_v33 = vadd.f32 %v1575_v18, %v965_v16  ;;  %v306_v63 = vadd.f32 %v6116_v49, %v6932_v62  ;;  %v968_v22 = vadd.f32 %v6749_v15, %v307_v45  ;;  %v5775_v15 = vld [vmem:[%s8378_s6 + $0x40] sm:$0xff]  }
 0x5fa   :  { %4983 = vmatprep.subr.bf16.mxu0 %v5771_v12  ;;  %5047 = vmatprep.subr.bf16.mxu1 %v5772_v26 }
 0x5fb   :  { %4759 = vmatmul.mubr.msk.bf16.gmra.mxu0 %vm320_vm0, %v1609_v31  ;;  %4767 = vmatmul.mubr.msk.bf16.gmra.mxu1 %vm320_vm0, %v1609_v31  ;;  %v1612_v41 = vpack.c.bf16 %v7148_v53, %v7154_v33  ;;  %v967_v14 = vadd.f32 %v6745_v30, %v306_v63  ;;  %v7168_v12 = vadd.f32 %v5512_v24, %v968_v22  ;;  %v5777_v30 = vld [vmem:[%s8378_s6] sm:$0xff]   ;;  %v237_v31 = vsub.s32 3, %v6404_v25 }
 0x5fc   :  { %1750 = vmatprep.mubr.bf16.mxu0 %v8400_v6  ;;  %1863 = vmatprep.mubr.bf16.mxu1 %v8400_v6 }
 0x5fd   :  { %4984 = vmatpush3.bf16.msra.mxu0 %v5773_v3  ;;  %5048 = vmatpush3.bf16.msra.mxu1 %v5774_v9  ;;  %v7170_v26 = vadd.f32 %v5511_v57, %v967_v14  ;;  %v225_v3 = vsub.s32 0, %v6404_v25  ;;  %v233_v9 = vsub.s32 2, %v6404_v25  ;;  %v7198_v57 = vrot.slane %v221_v51, %v229_v60 }
 0x5fe   :  { %4985 = vmatprep.subr.bf16.mxu0 %v5775_v15  ;;  %5049 = vmatprep.subr.bf16.mxu1 %v5776_v58  ;;  %v7200_v1 = vrot.slane %v221_v51, %v237_v31 }
 0x5ff   :  { %v1613_v62 = vpack.c.bf16 %v7168_v12, %v7170_v26  ;;  %8443 = vst [vmem:[#allocation24_spill] sm:$0xff] %v7198_v57  ;;  %v7202_v37 = vrot.slane %v221_v51, %v225_v3  ;;  %v7204_v43 = vrot.slane %v221_v51, %v233_v9 }
 0x600   :  { %8444 = vst [vmem:[#allocation25_spill] sm:$0xff] %v7200_v1 }
 0x601   :  { %4986 = vmatpush3.bf16.msra.mxu0 %v5777_v30  ;;  %5050 = vmatpush3.bf16.msra.mxu1 %v5778_v8  ;;  %8445 = vst [vmem:[#allocation26_spill] sm:$0xff] %v7202_v37  ;;  %8446 = vst [vmem:[#allocation27_spill] sm:$0xff] %v7204_v43 }
 0x602   :  { %5513 = vmatprep.subr.bf16.mxu0 %v6117_v11 }
 0x603   :  { %4760 = vmatmul.mubr.msk.bf16.gmra.mxu0 %vm320_vm0, %v1610_v21  ;;  %4768 = vmatmul.mubr.msk.bf16.gmra.mxu1 %vm320_vm0, %v1610_v21 }
 0x604   :  { %1760 = vmatprep.mubr.bf16.mxu0 %v8400_v6  ;;  %1873 = vmatprep.mubr.bf16.mxu1 %v8400_v6 }
 0x60b   :  { %4761 = vmatmul.mubr.msk.bf16.gmra.mxu0 %vm320_vm0, %v1611_v23  ;;  %4769 = vmatmul.mubr.msk.bf16.gmra.mxu1 %vm320_vm0, %v1611_v23 }
 0x60c   :  { %1770 = vmatprep.mubr.bf16.mxu0 %v8400_v6  ;;  %1883 = vmatprep.mubr.bf16.mxu1 %v8400_v6 }
 0x613   :  { %4762 = vmatmul.mubr.msk.bf16.gmra.mxu0 %vm320_vm0, %v1612_v41  ;;  %4770 = vmatmul.mubr.msk.bf16.gmra.mxu1 %vm320_vm0, %v1612_v41 }
 0x614   :  { %1780 = vmatprep.mubr.bf16.mxu0 %v8400_v6  ;;  %1893 = vmatprep.mubr.bf16.mxu1 %v8400_v6 }
 0x61b   :  { %4763 = vmatmul.mubr.msk.bf16.gmra.mxu0 %vm320_vm0, %v1613_v62  ;;  %4771 = vmatmul.mubr.msk.bf16.gmra.mxu1 %vm320_vm0, %v1613_v62 }
 0x6a3   :  { %v1712_v55 = vpop.f32.mrf.mxu0  ;;  %v1825_v20 = vpop.f32.mrf.mxu1 }
 0x6a4   :  { %v1713_v28 = vadd.f32 %v1712_v55, %v7202_v37  ;;  %v1826_v13 = vadd.f32 %v1825_v20, %v7204_v43 }
 0x6a5   :  { %v1714_v29 = vpop.f32.mrf.mxu0  ;;  %v1827_v21 = vpop.f32.mrf.mxu1 }
 0x6a6   :  { %v1715_v25 = vadd.f32 %v1714_v29, %v7198_v57  ;;  %v1828_v52 = vadd.f32 %v1827_v21, %v7200_v1  ;;  %v1904_v62 = vmax.f32 %v1713_v28, 0.0  ;;  %v1906_v15 = vmax.f32 %v1826_v13, 0.0 }
 0x6a7   :  { %v1716_v18 = vpop.f32.mrf.mxu0  ;;  %v1829_v17 = vpop.f32.mrf.mxu1 }
 0x6a8   :  { %v1717_v24 = vadd.f32 %v1716_v18, %v7202_v37  ;;  %v1830_v2 = vadd.f32 %v1829_v17, %v7204_v43  ;;  %v1905_v63 = vmax.f32 %v1715_v25, 0.0  ;;  %v1907_v41 = vmax.f32 %v1828_v52, 0.0 }
 0x6a9   :  { %v1718_v10 = vpop.f32.mrf.mxu0  ;;  %v1831_v23 = vpop.f32.mrf.mxu1 }
 0x6aa   :  { %v1719_v19 = vadd.f32 %v1718_v10, %v7198_v57  ;;  %v1832_v5 = vadd.f32 %v1831_v23, %v7200_v1  ;;  %v1908_v16 = vmax.f32 %v1717_v24, 0.0  ;;  %v1910_v56 = vmax.f32 %v1830_v2, 0.0 }
 0x6ab   :  { %v1722_v45 = vpop.f32.mrf.mxu0  ;;  %v1835_v49 = vpop.f32.mrf.mxu1 }
 0x6ac   :  { %v1909_v22 = vmax.f32 %v1719_v19, 0.0  ;;  %v1911_v14 = vmax.f32 %v1832_v5, 0.0  ;;  %v1968_v31 = vpack.c.bf16 %v1908_v16, %v1904_v62  ;;  %v1970_v3 = vpack.c.bf16 %v1910_v56, %v1906_v15  ;;  %v6118_v19 = vld [vmem:[%s8373_s1] sm:$0xff]  }
 0x6ad   :  { %v1724_v58 = vpop.f32.mrf.mxu0  ;;  %v1837_v30 = vpop.f32.mrf.mxu1  ;;  %v1723_v18 = vadd.f32 %v1722_v45, %v7202_v37  ;;  %v1836_v17 = vadd.f32 %v1835_v49, %v7204_v43 }
 0x6ae   :  { %v1969_v8 = vpack.c.bf16 %v1909_v22, %v1905_v63  ;;  %v1971_v60 = vpack.c.bf16 %v1911_v14, %v1907_v41  ;;  %v1725_v9 = vadd.f32 %v1724_v58, %v7198_v57  ;;  %v1838_v20 = vadd.f32 %v1837_v30, %v7200_v1 }
 0x6af   :  { %v1726_v51 = vpop.f32.mrf.mxu0  ;;  %v1839_v55 = vpop.f32.mrf.mxu1  ;;  %v1912_v49 = vmax.f32 %v1723_v18, 0.0  ;;  %v1914_v63 = vmax.f32 %v1836_v17, 0.0 }
 0x6b0   :  { %v1727_v29 = vadd.f32 %v1726_v51, %v7202_v37  ;;  %v1840_v21 = vadd.f32 %v1839_v55, %v7204_v43  ;;  %2224 = vmatprep.mubr.bf16.mxu0 %v1969_v8  ;;  %2321 = vmatprep.mubr.bf16.mxu1 %v1971_v60  ;;  %v1913_v5 = vmax.f32 %v1725_v9, 0.0  ;;  %v1915_v16 = vmax.f32 %v1838_v20, 0.0  ;;  %v7229_v60 = vld [vmem:[%s8374_s2 + $0x8] sm:$0xff]  }
 0x6b1   :  { %v1728_v25 = vpop.f32.mrf.mxu0  ;;  %v1841_v52 = vpop.f32.mrf.mxu1  ;;  %2225 = vmatmul.mubr.bf16.vlgmr.msra.gmra.mxu0 %v1968_v31  ;;  %2322 = vmatmul.mubr.bf16.vlgmr.msra.gmra.mxu1 %v1970_v3 }
 0x6b2   :  { %v1729_v24 = vadd.f32 %v1728_v25, %v7198_v57  ;;  %v1842_v2 = vadd.f32 %v1841_v52, %v7200_v1  ;;  %5514 = vmatpush3.bf16.msra.mxu0 %v6117_v11  ;;  %v1916_v28 = vmax.f32 %v1727_v29, 0.0  ;;  %v1918_v13 = vmax.f32 %v1840_v21, 0.0 }
 0x6b3   :  { %v1732_v10 = vpop.f32.mrf.mxu0  ;;  %v1845_v23 = vpop.f32.mrf.mxu1  ;;  %5515 = vmatprep.subr.bf16.mxu0 %v6118_v19 }
 0x6b4   :  { %v1917_v56 = vmax.f32 %v1729_v24, 0.0  ;;  %v1919_v45 = vmax.f32 %v1842_v2, 0.0  ;;  %v1972_v11 = vpack.c.bf16 %v1916_v28, %v1912_v49  ;;  %v1974_v15 = vpack.c.bf16 %v1918_v13, %v1914_v63 }
 0x6b5   :  { %v1734_v41 = vpop.f32.mrf.mxu0  ;;  %v1847_v22 = vpop.f32.mrf.mxu1  ;;  %v1733_v51 = vadd.f32 %v1732_v10, %v7202_v37  ;;  %v1846_v55 = vadd.f32 %v1845_v23, %v7204_v43 }
 0x6b6   :  { %v1973_v14 = vpack.c.bf16 %v1917_v56, %v1913_v5  ;;  %v1975_v62 = vpack.c.bf16 %v1919_v45, %v1915_v16  ;;  %5516 = vmatpush3.bf16.msra.mxu0 %v6118_v19  ;;  %v1735_v58 = vadd.f32 %v1734_v41, %v7198_v57  ;;  %v1848_v31 = vadd.f32 %v1847_v22, %v7200_v1 }
 0x6b7   :  { %v1736_v30 = vpop.f32.mrf.mxu0  ;;  %v1849_v8 = vpop.f32.mrf.mxu1  ;;  %5553 = vmatprep.subr.bf16.mxu0 %v7229_v60  ;;  %v1920_v5 = vmax.f32 %v1733_v51, 0.0  ;;  %v1922_v10 = vmax.f32 %v1846_v55, 0.0 }
 0x6b8   :  { %v1737_v3 = vadd.f32 %v1736_v30, %v7202_v37  ;;  %v1850_v9 = vadd.f32 %v1849_v8, %v7204_v43  ;;  %2232 = vmatprep.mubr.bf16.mxu0 %v1973_v14  ;;  %2329 = vmatprep.mubr.bf16.mxu1 %v1975_v62  ;;  %v1921_v2 = vmax.f32 %v1735_v58, 0.0  ;;  %v1923_v28 = vmax.f32 %v1848_v31, 0.0 }
 0x6b9   :  { %v1738_v20 = vpop.f32.mrf.mxu0  ;;  %v1851_v29 = vpop.f32.mrf.mxu1  ;;  %2233 = vmatmul.mubr.bf16.gmra.mxu0 %v1972_v11  ;;  %2330 = vmatmul.mubr.bf16.gmra.mxu1 %v1974_v15 }
 0x6ba   :  { %v1739_v21 = vadd.f32 %v1738_v20, %v7198_v57  ;;  %v1852_v18 = vadd.f32 %v1851_v29, %v7200_v1  ;;  %v1924_v17 = vmax.f32 %v1737_v3, 0.0  ;;  %v1926_v25 = vmax.f32 %v1850_v9, 0.0 }
 0x6bb   :  { %v1742_v52 = vpop.f32.mrf.mxu0  ;;  %v1855_v24 = vpop.f32.mrf.mxu1 }
 0x6bc   :  { %v1925_v13 = vmax.f32 %v1739_v21, 0.0  ;;  %v1927_v19 = vmax.f32 %v1852_v18, 0.0  ;;  %v1976_v49 = vpack.c.bf16 %v1924_v17, %v1920_v5  ;;  %v1978_v63 = vpack.c.bf16 %v1926_v25, %v1922_v10 }
 0x6bd   :  { %v1744_v16 = vpop.f32.mrf.mxu0  ;;  %v1857_v23 = vpop.f32.mrf.mxu1  ;;  %v1743_v58 = vadd.f32 %v1742_v52, %v7202_v37  ;;  %v1856_v30 = vadd.f32 %v1855_v24, %v7204_v43 }
 0x6be   :  { %v1977_v56 = vpack.c.bf16 %v1925_v13, %v1921_v2  ;;  %v1979_v45 = vpack.c.bf16 %v1927_v19, %v1923_v28  ;;  %v1745_v41 = vadd.f32 %v1744_v16, %v7198_v57  ;;  %v1858_v62 = vadd.f32 %v1857_v23, %v7200_v1 }
 0x6bf   :  { %v1746_v22 = vpop.f32.mrf.mxu0  ;;  %v1859_v14 = vpop.f32.mrf.mxu1  ;;  %v1928_v2 = vmax.f32 %v1743_v58, 0.0  ;;  %v1930_v52 = vmax.f32 %v1856_v30, 0.0 }
 0x6c0   :  { %v1747_v11 = vadd.f32 %v1746_v22, %v7202_v37  ;;  %v1860_v15 = vadd.f32 %v1859_v14, %v7204_v43  ;;  %2240 = vmatprep.mubr.bf16.mxu0 %v1977_v56  ;;  %2337 = vmatprep.mubr.bf16.mxu1 %v1979_v45  ;;  %v1929_v21 = vmax.f32 %v1745_v41, 0.0  ;;  %v1931_v18 = vmax.f32 %v1858_v62, 0.0 }
 0x6c1   :  { %v1748_v8 = vpop.f32.mrf.mxu0  ;;  %v1861_v31 = vpop.f32.mrf.mxu1  ;;  %2241 = vmatmul.mubr.bf16.gmra.mxu0 %v1976_v49  ;;  %2338 = vmatmul.mubr.bf16.gmra.mxu1 %v1978_v63 }
 0x6c2   :  { %v1749_v3 = vadd.f32 %v1748_v8, %v7198_v57  ;;  %v1862_v9 = vadd.f32 %v1861_v31, %v7200_v1  ;;  %v1932_v51 = vmax.f32 %v1747_v11, 0.0  ;;  %v1934_v55 = vmax.f32 %v1860_v15, 0.0 }
 0x6c3   :  { %v1752_v20 = vpop.f32.mrf.mxu0  ;;  %v1865_v29 = vpop.f32.mrf.mxu1 }
 0x6c4   :  { %v1933_v17 = vmax.f32 %v1749_v3, 0.0  ;;  %v1935_v25 = vmax.f32 %v1862_v9, 0.0  ;;  %v1980_v5 = vpack.c.bf16 %v1932_v51, %v1928_v2  ;;  %v1982_v10 = vpack.c.bf16 %v1934_v55, %v1930_v52 }
 0x6c5   :  { %v1754_v28 = vpop.f32.mrf.mxu0  ;;  %v1867_v24 = vpop.f32.mrf.mxu1  ;;  %v1753_v41 = vadd.f32 %v1752_v20, %v7202_v37  ;;  %v1866_v22 = vadd.f32 %v1865_v29, %v7204_v43 }
 0x6c6   :  { %v1981_v13 = vpack.c.bf16 %v1933_v17, %v1929_v21  ;;  %v1983_v19 = vpack.c.bf16 %v1935_v25, %v1931_v18  ;;  %v1755_v16 = vadd.f32 %v1754_v28, %v7198_v57  ;;  %v1868_v45 = vadd.f32 %v1867_v24, %v7200_v1 }
 0x6c7   :  { %v1756_v23 = vpop.f32.mrf.mxu0  ;;  %v1869_v56 = vpop.f32.mrf.mxu1  ;;  %v1936_v21 = vmax.f32 %v1753_v41, 0.0  ;;  %v1938_v20 = vmax.f32 %v1866_v22, 0.0 }
 0x6c8   :  { %v1757_v49 = vadd.f32 %v1756_v23, %v7202_v37  ;;  %v1870_v63 = vadd.f32 %v1869_v56, %v7204_v43  ;;  %2248 = vmatprep.mubr.bf16.mxu0 %v1981_v13  ;;  %2345 = vmatprep.mubr.bf16.mxu1 %v1983_v19  ;;  %v1937_v3 = vmax.f32 %v1755_v16, 0.0  ;;  %v1939_v9 = vmax.f32 %v1868_v45, 0.0 }
 0x6c9   :  { %v1758_v14 = vpop.f32.mrf.mxu0  ;;  %v1871_v62 = vpop.f32.mrf.mxu1  ;;  %2249 = vmatmul.mubr.bf16.gmra.mxu0 %v1980_v5  ;;  %2346 = vmatmul.mubr.bf16.gmra.mxu1 %v1982_v10 }
 0x6ca   :  { %v1759_v11 = vadd.f32 %v1758_v14, %v7198_v57  ;;  %v1872_v15 = vadd.f32 %v1871_v62, %v7200_v1  ;;  %v1940_v58 = vmax.f32 %v1757_v49, 0.0  ;;  %v1942_v30 = vmax.f32 %v1870_v63, 0.0 }
 0x6cb   :  { %v1762_v8 = vpop.f32.mrf.mxu0  ;;  %v1875_v31 = vpop.f32.mrf.mxu1 }
 0x6cc   :  { %v1941_v51 = vmax.f32 %v1759_v11, 0.0  ;;  %v1943_v55 = vmax.f32 %v1872_v15, 0.0  ;;  %v1984_v2 = vpack.c.bf16 %v1940_v58, %v1936_v21  ;;  %v1986_v52 = vpack.c.bf16 %v1942_v30, %v1938_v20 }
 0x6cd   :  { %v1764_v18 = vpop.f32.mrf.mxu0  ;;  %v1877_v29 = vpop.f32.mrf.mxu1  ;;  %v1763_v16 = vadd.f32 %v1762_v8, %v7202_v37  ;;  %v1876_v23 = vadd.f32 %v1875_v31, %v7204_v43 }
 0x6ce   :  { %v1985_v17 = vpack.c.bf16 %v1941_v51, %v1937_v3  ;;  %v1987_v25 = vpack.c.bf16 %v1943_v55, %v1939_v9  ;;  %v1765_v28 = vadd.f32 %v1764_v18, %v7198_v57  ;;  %v1878_v19 = vadd.f32 %v1877_v29, %v7200_v1 }
 0x6cf   :  { %v1766_v24 = vpop.f32.mrf.mxu0  ;;  %v1879_v13 = vpop.f32.mrf.mxu1  ;;  %v1944_v3 = vmax.f32 %v1763_v16, 0.0  ;;  %v1946_v8 = vmax.f32 %v1876_v23, 0.0 }
 0x6d0   :  { %v1767_v5 = vadd.f32 %v1766_v24, %v7202_v37  ;;  %v1880_v10 = vadd.f32 %v1879_v13, %v7204_v43  ;;  %2256 = vmatprep.mubr.bf16.mxu0 %v1985_v17  ;;  %2353 = vmatprep.mubr.bf16.mxu1 %v1987_v25  ;;  %v1945_v11 = vmax.f32 %v1765_v28, 0.0  ;;  %v1947_v15 = vmax.f32 %v1878_v19, 0.0 }
 0x6d1   :  { %v1768_v56 = vpop.f32.mrf.mxu0  ;;  %v1881_v45 = vpop.f32.mrf.mxu1  ;;  %2257 = vmatmul.mubr.bf16.gmra.mxu0 %v1984_v2  ;;  %2354 = vmatmul.mubr.bf16.gmra.mxu1 %v1986_v52 }
 0x6d2   :  { %v1769_v49 = vadd.f32 %v1768_v56, %v7198_v57  ;;  %v1882_v63 = vadd.f32 %v1881_v45, %v7200_v1  ;;  %v1948_v41 = vmax.f32 %v1767_v5, 0.0  ;;  %v1950_v22 = vmax.f32 %v1880_v10, 0.0 }
 0x6d3   :  { %v1772_v14 = vpop.f32.mrf.mxu0  ;;  %v1885_v62 = vpop.f32.mrf.mxu1 }
 0x6d4   :  { %v1949_v58 = vmax.f32 %v1769_v49, 0.0  ;;  %v1951_v30 = vmax.f32 %v1882_v63, 0.0  ;;  %v1988_v21 = vpack.c.bf16 %v1948_v41, %v1944_v3  ;;  %v1990_v20 = vpack.c.bf16 %v1950_v22, %v1946_v8 }
 0x6d5   :  { %v1774_v9 = vpop.f32.mrf.mxu0  ;;  %v1887_v31 = vpop.f32.mrf.mxu1  ;;  %v1773_v28 = vadd.f32 %v1772_v14, %v7202_v37  ;;  %v1886_v24 = vadd.f32 %v1885_v62, %v7204_v43 }
 0x6d6   :  { %v1989_v51 = vpack.c.bf16 %v1949_v58, %v1945_v11  ;;  %v1991_v55 = vpack.c.bf16 %v1951_v30, %v1947_v15  ;;  %v1775_v18 = vadd.f32 %v1774_v9, %v7198_v57  ;;  %v1888_v25 = vadd.f32 %v1887_v31, %v7200_v1 }
 0x6d7   :  { %v1776_v29 = vpop.f32.mrf.mxu0  ;;  %v1889_v17 = vpop.f32.mrf.mxu1  ;;  %v1952_v11 = vmax.f32 %v1773_v28, 0.0  ;;  %v1954_v14 = vmax.f32 %v1886_v24, 0.0 }
 0x6d8   :  { %v1777_v2 = vadd.f32 %v1776_v29, %v7202_v37  ;;  %v1890_v52 = vadd.f32 %v1889_v17, %v7204_v43  ;;  %2264 = vmatprep.mubr.bf16.mxu0 %v1989_v51  ;;  %2361 = vmatprep.mubr.bf16.mxu1 %v1991_v55  ;;  %v1953_v49 = vmax.f32 %v1775_v18, 0.0  ;;  %v1955_v63 = vmax.f32 %v1888_v25, 0.0 }
 0x6d9   :  { %v1778_v13 = vpop.f32.mrf.mxu0  ;;  %v1891_v19 = vpop.f32.mrf.mxu1  ;;  %2265 = vmatmul.mubr.bf16.gmra.mxu0 %v1988_v21  ;;  %2362 = vmatmul.mubr.bf16.gmra.mxu1 %v1990_v20 }
 0x6da   :  { %v1779_v5 = vadd.f32 %v1778_v13, %v7198_v57  ;;  %v1892_v10 = vadd.f32 %v1891_v19, %v7200_v1  ;;  %v1956_v16 = vmax.f32 %v1777_v2, 0.0  ;;  %v1958_v23 = vmax.f32 %v1890_v52, 0.0 }
 0x6db   :  { %v1782_v56 = vpop.f32.mrf.mxu0  ;;  %v1895_v45 = vpop.f32.mrf.mxu1 }
 0x6dc   :  { %v1957_v41 = vmax.f32 %v1779_v5, 0.0  ;;  %v1959_v22 = vmax.f32 %v1892_v10, 0.0  ;;  %v1992_v3 = vpack.c.bf16 %v1956_v16, %v1952_v11  ;;  %v1994_v8 = vpack.c.bf16 %v1958_v23, %v1954_v14 }
 0x6dd   :  { %v1784_v15 = vpop.f32.mrf.mxu0  ;;  %v1897_v62 = vpop.f32.mrf.mxu1  ;;  %v1783_v18 = vadd.f32 %v1782_v56, %v7202_v37  ;;  %v1896_v29 = vadd.f32 %v1895_v45, %v7204_v43 }
 0x6de   :  { %v1993_v58 = vpack.c.bf16 %v1957_v41, %v1953_v49  ;;  %v1995_v30 = vpack.c.bf16 %v1959_v22, %v1955_v63  ;;  %v1785_v9 = vadd.f32 %v1784_v15, %v7198_v57  ;;  %v1898_v55 = vadd.f32 %v1897_v62, %v7200_v1 }
 0x6df   :  { %v1786_v31 = vpop.f32.mrf.mxu0  ;;  %v1899_v51 = vpop.f32.mrf.mxu1  ;;  %v1960_v16 = vmax.f32 %v1783_v18, 0.0  ;;  %v1962_v23 = vmax.f32 %v1896_v29, 0.0 }
 0x6e0   :  { %v1787_v21 = vadd.f32 %v1786_v31, %v7202_v37  ;;  %v1900_v20 = vadd.f32 %v1899_v51, %v7204_v43  ;;  %2272 = vmatprep.mubr.bf16.mxu0 %v1993_v58  ;;  %2369 = vmatprep.mubr.bf16.mxu1 %v1995_v30  ;;  %v1961_v13 = vmax.f32 %v1785_v9, 0.0  ;;  %v1963_v19 = vmax.f32 %v1898_v55, 0.0  ;;  %v7282_v31 = vld [vmem:[%s8379_s7] ss:$0 sm:$0xff] }
 0x6e1   :  { %v1788_v17 = vpop.f32.mrf.mxu0  ;;  %v1901_v25 = vpop.f32.mrf.mxu1  ;;  %2273 = vmatmul.mubr.bf16.gmra.mxu0 %v1992_v3  ;;  %2370 = vmatmul.mubr.bf16.gmra.mxu1 %v1994_v8 }
 0x6e2   :  { %v1789_v2 = vadd.f32 %v1788_v17, %v7198_v57  ;;  %v1902_v52 = vadd.f32 %v1901_v25, %v7200_v1  ;;  %v1964_v28 = vmax.f32 %v1787_v21, 0.0  ;;  %v1966_v24 = vmax.f32 %v1900_v20, 0.0  ;;  %v8456_v1 = vld [vmem:[#allocation16_spill] sm:$0xff] }
 0x6e4   :  { %v1965_v5 = vmax.f32 %v1789_v2, 0.0  ;;  %v1967_v10 = vmax.f32 %v1902_v52, 0.0  ;;  %v1996_v63 = vpack.c.bf16 %v1964_v28, %v1960_v16  ;;  %v1998_v45 = vpack.c.bf16 %v1966_v24, %v1962_v23 }
 0x6e6   :  { %v1997_v49 = vpack.c.bf16 %v1965_v5, %v1961_v13  ;;  %v1999_v56 = vpack.c.bf16 %v1967_v10, %v1963_v19 }
 0x6e8   :  { %2280 = vmatprep.mubr.bf16.mxu0 %v1997_v49  ;;  %2377 = vmatprep.mubr.bf16.mxu1 %v1999_v56 }
 0x6e9   :  { %2281 = vmatmul.mubr.bf16.gmra.mxu0 %v1996_v63  ;;  %2378 = vmatmul.mubr.bf16.gmra.mxu1 %v1998_v45 }
 0x771   :  { %v4987_v41 = vpop.f32.mrf.mxu0  ;;  %v5051_v22 = vpop.f32.mrf.mxu1 }
 0x773   :  { %v4988_v11 = vpop.f32.mrf.mxu0  ;;  %v5052_v14 = vpop.f32.mrf.mxu1 }
 0x774   :  { %v4989_v15 = vadd.f32 %v4988_v11, %v4987_v41  ;;  %v5053_v62 = vadd.f32 %v5052_v14, %v5051_v22 }
 0x775   :  { %v4990_v58 = vpop.f32.mrf.mxu0  ;;  %v5054_v30 = vpop.f32.mrf.mxu1 }
 0x776   :  { %v2324_v3 = vadd.f32 %v5053_v62, %v4989_v15 }
 0x777   :  { %v4991_v8 = vpop.f32.mrf.mxu0  ;;  %v5055_v9 = vpop.f32.mrf.mxu1 }
 0x778   :  { %v2386_v51 = vadd.f32 %v2324_v3, %v6948_v36  ;;  %v4992_v55 = vadd.f32 %v4991_v8, %v4990_v58  ;;  %v5056_v21 = vadd.f32 %v5055_v9, %v5054_v30 }
 0x779   :  { %v4993_v20 = vpop.f32.mrf.mxu0  ;;  %v5057_v18 = vpop.f32.mrf.mxu1 }
 0x77a   :  { %v2327_v29 = vadd.f32 %v5056_v21, %v4992_v55  ;;  %v7286_v17 = vadd.f32 %v7282_v31, %v2386_v51 }
 0x77b   :  { %v4994_v25 = vpop.f32.mrf.mxu0  ;;  %v5058_v2 = vpop.f32.mrf.mxu1 }
 0x77c   :  { %v2387_v52 = vadd.f32 %v2327_v29, %v6950_v44  ;;  %v4995_v28 = vadd.f32 %v4994_v25, %v4993_v20  ;;  %v5059_v24 = vadd.f32 %v5058_v2, %v5057_v18  ;;  %2426 = vxpose.xlu1.b32.start [1/16] (narrow) %v7286_v17, 32 }
 0x77d   :  { %v4996_v13 = vpop.f32.mrf.mxu0  ;;  %v5060_v19 = vpop.f32.mrf.mxu1 }
 0x77e   :  { %v2332_v5 = vadd.f32 %v5059_v24, %v4995_v28  ;;  %v7291_v36 = vadd.f32 %v7282_v31, %v2387_v52 }
 0x77f   :  { %v4997_v10 = vpop.f32.mrf.mxu0  ;;  %v5061_v16 = vpop.f32.mrf.mxu1 }
 0x780   :  { %v2388_v23 = vadd.f32 %v2332_v5, %v6996_v48  ;;  %v4998_v49 = vadd.f32 %v4997_v10, %v4996_v13  ;;  %v5062_v56 = vadd.f32 %v5061_v16, %v5060_v19  ;;  %2427 = vxpose.xlu1.b32.cont [2/16] (narrow) %v7291_v36, 32  ;;  %v7297_v44 = vpack.c.bf16 %v7291_v36, %v7286_v17  ;;  %v6120_v19 = vld [vmem:[%s8374_s2] sm:$0xff]  }
 0x781   :  { %v4999_v63 = vpop.f32.mrf.mxu0  ;;  %v5063_v45 = vpop.f32.mrf.mxu1 }
 0x782   :  { %v2335_v41 = vadd.f32 %v5062_v56, %v4998_v49  ;;  %5517 = vmatprep.mubr.msk.bf16.mxu0 %vm320_vm0, %v7297_v44  ;;  %v7302_v22 = vadd.f32 %v7282_v31, %v2388_v23 }
 0x783   :  { %v5000_v11 = vpop.f32.mrf.mxu0  ;;  %v5064_v14 = vpop.f32.mrf.mxu1 }
 0x784   :  { %v2389_v48 = vadd.f32 %v2335_v41, %v6978_v39  ;;  %v5001_v15 = vadd.f32 %v5000_v11, %v4999_v63  ;;  %v5065_v62 = vadd.f32 %v5064_v14, %v5063_v45  ;;  %2428 = vxpose.xlu1.b32.cont [3/16] (narrow) %v7302_v22, 32  ;;  %v7338_v14 = vld [vmem:[%s8373_s1 + $0x18] sm:$0xff]  }
 0x785   :  { %v5002_v58 = vpop.f32.mrf.mxu0  ;;  %v5066_v30 = vpop.f32.mrf.mxu1 }
 0x786   :  { %v2340_v3 = vadd.f32 %v5065_v62, %v5001_v15  ;;  %v7307_v8 = vadd.f32 %v7282_v31, %v2389_v48 }
 0x787   :  { %v5003_v9 = vpop.f32.mrf.mxu0  ;;  %v5067_v51 = vpop.f32.mrf.mxu1 }
 0x788   :  { %v2390_v55 = vadd.f32 %v2340_v3, %v7042_v40  ;;  %v5004_v21 = vadd.f32 %v5003_v9, %v5002_v58  ;;  %v5068_v20 = vadd.f32 %v5067_v51, %v5066_v30  ;;  %v7312_v18 = vpack.c.bf16 %v7307_v8, %v7302_v22  ;;  %2429 = vxpose.xlu1.b32.cont [4/16] (narrow) %v7307_v8, 32 }
 0x789   :  { %v5005_v39 = vpop.f32.mrf.mxu0  ;;  %v5069_v29 = vpop.f32.mrf.mxu1 }
 0x78a   :  { %v2343_v25 = vadd.f32 %v5068_v20, %v5004_v21  ;;  %5518 = vmatmul.mubr.msk.bf16.vlgmr.msra.gmra.mxu0 %vm320_vm0, %v7312_v18  ;;  %v7318_v2 = vadd.f32 %v7282_v31, %v2390_v55 }
 0x78b   :  { %v5006_v52 = vpop.f32.mrf.mxu0  ;;  %v5070_v28 = vpop.f32.mrf.mxu1  ;;  %5554 = vmatpush3.bf16.msra.mxu0 %v7229_v60 }
 0x78c   :  { %v2391_v40 = vadd.f32 %v2343_v25, %v7022_v32  ;;  %v5007_v24 = vadd.f32 %v5006_v52, %v5005_v39  ;;  %v5071_v13 = vadd.f32 %v5070_v28, %v5069_v29  ;;  %2430 = vxpose.xlu1.b32.cont [5/16] (narrow) %v7318_v2, 32  ;;  %5555 = vmatprep.subr.bf16.mxu0 %v6120_v19 }
 0x78d   :  { %v5008_v5 = vpop.f32.mrf.mxu0  ;;  %v5072_v10 = vpop.f32.mrf.mxu1 }
 0x78e   :  { %v2348_v16 = vadd.f32 %v5071_v13, %v5007_v24  ;;  %v7327_v23 = vadd.f32 %v7282_v31, %v2391_v40 }
 0x78f   :  { %v5009_v49 = vpop.f32.mrf.mxu0  ;;  %v5073_v56 = vpop.f32.mrf.mxu1  ;;  %5556 = vmatpush3.bf16.msra.mxu0 %v6120_v19 }
 0x790   :  { %8447 = vst [vmem:[#allocation28_spill] sm:$0xff] %v7327_v23  ;;  %v2392_v32 = vadd.f32 %v2348_v16, %v7087_v4  ;;  %v5010_v60 = vadd.f32 %v5009_v49, %v5008_v5  ;;  %v5074_v63 = vadd.f32 %v5073_v56, %v5072_v10  ;;  %2431 = vxpose.xlu1.b32.cont [6/16] (narrow) %v7327_v23, 32 }
 0x791   :  { %v7333_v45 = vpack.c.bf16 %v7327_v23, %v7318_v2  ;;  %v5011_v41 = vpop.f32.mrf.mxu0  ;;  %v5075_v11 = vpop.f32.mrf.mxu1  ;;  %5605 = vmatprep.subr.bf16.mxu0 %v7338_v14 }
 0x792   :  { %v2351_v48 = vadd.f32 %v5074_v63, %v5010_v60  ;;  %v7344_v4 = vadd.f32 %v7282_v31, %v2392_v32 }
 0x793   :  { %5521 = vmatprep.mubr.msk.bf16.mxu0 %vm320_vm0, %v7333_v45  ;;  %v5012_v15 = vpop.f32.mrf.mxu0  ;;  %v5076_v62 = vpop.f32.mrf.mxu1 }
 0x794   :  { %v2393_v58 = vadd.f32 %v2351_v48, %v7068_v61  ;;  %v5013_v30 = vadd.f32 %v5012_v15, %v5011_v41  ;;  %v5077_v3 = vadd.f32 %v5076_v62, %v5075_v11  ;;  %2432 = vxpose.xlu1.b32.cont [7/16] (narrow) %v7344_v4, 32 }
 0x795   :  { %v5014_v9 = vpop.f32.mrf.mxu0  ;;  %v5078_v51 = vpop.f32.mrf.mxu1 }
 0x796   :  { %v2356_v55 = vadd.f32 %v5077_v3, %v5013_v30  ;;  %v7349_v21 = vadd.f32 %v7282_v31, %v2393_v58 }
 0x797   :  { %v5015_v20 = vpop.f32.mrf.mxu0  ;;  %v5079_v39 = vpop.f32.mrf.mxu1 }
 0x798   :  { %v2394_v29 = vadd.f32 %v2356_v55, %v7113_v46  ;;  %v5016_v25 = vadd.f32 %v5015_v20, %v5014_v9  ;;  %v5080_v52 = vadd.f32 %v5079_v39, %v5078_v51  ;;  %v7354_v28 = vpack.c.bf16 %v7349_v21, %v7344_v4  ;;  %2433 = vxpose.xlu1.b32.cont [8/16] (narrow) %v7349_v21, 32 }
 0x799   :  { %v5017_v61 = vpop.f32.mrf.mxu0  ;;  %v5081_v40 = vpop.f32.mrf.mxu1 }
 0x79a   :  { %v2359_v24 = vadd.f32 %v5080_v52, %v5016_v25  ;;  %5522 = vmatmul.mubr.msk.bf16.gmra.mxu0 %vm320_vm0, %v7354_v28  ;;  %v7360_v13 = vadd.f32 %v7282_v31, %v2394_v29 }
 0x79b   :  { %v5018_v19 = vpop.f32.mrf.mxu0  ;;  %v5082_v5 = vpop.f32.mrf.mxu1 }
 0x79c   :  { %8448 = vst [vmem:[#allocation29_spill] sm:$0xff] %v7360_v13  ;;  %v2395_v46 = vadd.f32 %v2359_v24, %v7107_v7  ;;  %v5019_v10 = vadd.f32 %v5018_v19, %v5017_v61  ;;  %v5083_v16 = vadd.f32 %v5082_v5, %v5081_v40  ;;  %2434 = vxpose.xlu1.b32.cont [9/16] (narrow) %v7360_v13, 32 }
 0x79d   :  { %v5020_v49 = vpop.f32.mrf.mxu0  ;;  %v5084_v56 = vpop.f32.mrf.mxu1 }
 0x79e   :  { %v2364_v32 = vadd.f32 %v5083_v16, %v5019_v10  ;;  %v7365_v60 = vadd.f32 %v7282_v31, %v2395_v46 }
 0x79f   :  { %v5021_v63 = vpop.f32.mrf.mxu0  ;;  %v5085_v41 = vpop.f32.mrf.mxu1 }
 0x7a0   :  { %8449 = vst [vmem:[#allocation30_spill] sm:$0xff] %v7365_v60  ;;  %v2396_v11 = vadd.f32 %v2364_v32, %v7134_v27  ;;  %v5022_v48 = vadd.f32 %v5021_v63, %v5020_v49  ;;  %v5086_v15 = vadd.f32 %v5085_v41, %v5084_v56  ;;  %2435 = vxpose.xlu1.b32.cont [10/16] (narrow) %v7365_v60, 32 }
 0x7a1   :  { %v7371_v7 = vpack.c.bf16 %v7365_v60, %v7360_v13  ;;  %v5023_v62 = vpop.f32.mrf.mxu0  ;;  %v5087_v58 = vpop.f32.mrf.mxu1 }
 0x7a2   :  { %v2367_v30 = vadd.f32 %v5086_v15, %v5022_v48  ;;  %v7376_v3 = vadd.f32 %v7282_v31, %v2396_v11 }
 0x7a3   :  { %5525 = vmatprep.mubr.msk.bf16.mxu0 %vm320_vm0, %v7371_v7  ;;  %v5024_v9 = vpop.f32.mrf.mxu0  ;;  %v5088_v51 = vpop.f32.mrf.mxu1 }
 0x7a4   :  { %8450 = vst [vmem:[#allocation31_spill] sm:$0xff] %v7376_v3  ;;  %v2397_v27 = vadd.f32 %v2367_v30, %v7127_v35  ;;  %v5025_v55 = vadd.f32 %v5024_v9, %v5023_v62  ;;  %v5089_v20 = vadd.f32 %v5088_v51, %v5087_v58  ;;  %2436 = vxpose.xlu1.b32.cont [11/16] (narrow) %v7376_v3, 32 }
 0x7a5   :  { %v5026_v39 = vpop.f32.mrf.mxu0  ;;  %v5090_v29 = vpop.f32.mrf.mxu1 }
 0x7a6   :  { %v2372_v25 = vadd.f32 %v5089_v20, %v5025_v55  ;;  %v7381_v52 = vadd.f32 %v7282_v31, %v2397_v27 }
 0x7a7   :  { %v5027_v61 = vpop.f32.mrf.mxu0  ;;  %v5091_v40 = vpop.f32.mrf.mxu1 }
 0x7a8   :  { %8451 = vst [vmem:[#allocation32_spill] sm:$0xff] %v7381_v52  ;;  %v2398_v24 = vadd.f32 %v2372_v25, %v7154_v33  ;;  %v5028_v19 = vadd.f32 %v5027_v61, %v5026_v39  ;;  %v5092_v5 = vadd.f32 %v5091_v40, %v5090_v29  ;;  %v7386_v46 = vpack.c.bf16 %v7381_v52, %v7376_v3  ;;  %v6125_v25 = vld [vmem:[%s8376_s4 + $0x24] ss:$16 sps:$4 sm:$0xff]  }
 0x7a9   :  { %2437 = vxpose.xlu1.b32.cont [12/16] (narrow) %v7381_v52, 32  ;;  %v5029_v35 = vpop.f32.mrf.mxu0  ;;  %v5093_v10 = vpop.f32.mrf.mxu1 }
 0x7aa   :  { %v2375_v16 = vadd.f32 %v5092_v5, %v5028_v19  ;;  %5526 = vmatmul.mubr.msk.bf16.gmra.mxu0 %vm320_vm0, %v7386_v46  ;;  %v7392_v49 = vadd.f32 %v7282_v31, %v2398_v24  ;;  %v6126_v19 = vld [vmem:[%s8376_s4 + $0x20] ss:$16 sps:$4 sm:$0xff]  }
 0x7ab   :  { %v5030_v56 = vpop.f32.mrf.mxu0  ;;  %v5094_v32 = vpop.f32.mrf.mxu1 }
 0x7ac   :  { %8452 = vst [vmem:[#allocation33_spill] sm:$0xff] %v7392_v49  ;;  %v2399_v33 = vadd.f32 %v2375_v16, %v7148_v53  ;;  %v5031_v63 = vadd.f32 %v5030_v56, %v5029_v35  ;;  %v5095_v41 = vadd.f32 %v5094_v32, %v5093_v10  ;;  %v6127_v35 = vld [vmem:[%s8376_s4 + $0x4] ss:$16 sps:$4 sm:$0xff]  }
 0x7ad   :  { %2438 = vxpose.xlu1.b32.cont [13/16] (narrow) %v7392_v49, 32  ;;  %v5032_v11 = vpop.f32.mrf.mxu0  ;;  %v5096_v48 = vpop.f32.mrf.mxu1 }
 0x7ae   :  { %v2380_v15 = vadd.f32 %v5095_v41, %v5031_v63  ;;  %v7397_v62 = vadd.f32 %v7282_v31, %v2399_v33 }
 0x7af   :  { %v5033_v58 = vpop.f32.mrf.mxu0  ;;  %v5097_v30 = vpop.f32.mrf.mxu1 }
 0x7b0   :  { %8453 = vst [vmem:[#allocation34_spill] sm:$0xff] %v7397_v62  ;;  %v2400_v9 = vadd.f32 %v2380_v15, %v7170_v26  ;;  %v5034_v51 = vadd.f32 %v5033_v58, %v5032_v11  ;;  %v5098_v27 = vadd.f32 %v5097_v30, %v5096_v48  ;;  %v2424_v53 = vpack.c.bf16 %v7397_v62, %v7392_v49 }
 0x7b1   :  { %2439 = vxpose.xlu1.b32.cont [14/16] (narrow) %v7397_v62, 32 }
 0x7b2   :  { %v2383_v55 = vadd.f32 %v5098_v27, %v5034_v51  ;;  %5529 = vmatprep.mubr.msk.bf16.mxu0 %vm320_vm0, %v2424_v53  ;;  %v7405_v20 = vadd.f32 %v7282_v31, %v2400_v9 }
 0x7b4   :  { %8454 = vst [vmem:[#allocation35_spill] sm:$0xff] %v7405_v20  ;;  %v2401_v39 = vadd.f32 %v2383_v55, %v7168_v12  ;;  %v6122_v12 = vld [vmem:[%s8373_s1 + $0x10] sm:$0xff]  }
 0x7b5   :  { %2440 = vxpose.xlu1.b32.cont [15/16] (narrow) %v7405_v20, 32 }
 0x7b6   :  { %v7410_v29 = vadd.f32 %v7282_v31, %v2401_v39  ;;  %v6123_v31 = vld [vmem:[%s8374_s2 + $0x18] sm:$0xff]  }
 0x7b8   :  { %8455 = vst [vmem:[#allocation36_spill] sm:$0xff] %v7410_v29  ;;  %v2425_v26 = vpack.c.bf16 %v7410_v29, %v7405_v20 }
 0x7b9   :  { %2441 = vxpose.xlu1.b32.end [16/16] (narrow) %v7410_v29, 32 }
 0x7ba   :  { %5530 = vmatmul.mubr.msk.bf16.gmra.mxu0 %vm320_vm0, %v2425_v26 }
 0x7bb   :  { %5557 = vmatprep.mubr.msk.bf16.mxu0 %vm320_vm0, %v7297_v44 }
 0x7c2   :  { %5558 = vmatmul.mubr.msk.bf16.vlgmr.msra.gmra.mxu0 %vm320_vm0, %v7312_v18 }
 0x7c3   :  { %5561 = vmatprep.mubr.msk.bf16.mxu0 %vm320_vm0, %v7333_v45  ;;  %5606 = vmatpush3.bf16.msra.mxu0 %v7338_v14  ;;  %v6124_v14 = vld [vmem:[%s8374_s2 + $0x10] sm:$0xff]  }
 0x7c4   :  { %5607 = vmatprep.subr.bf16.mxu0 %v6122_v12 }
 0x7c7   :  { %5608 = vmatpush3.bf16.msra.mxu0 %v6122_v12 }
 0x7c8   :  { %5645 = vmatprep.subr.bf16.mxu0 %v6123_v31 }
 0x7ca   :  { %5562 = vmatmul.mubr.msk.bf16.gmra.mxu0 %vm320_vm0, %v7354_v28 }
 0x7cb   :  { %5565 = vmatprep.mubr.msk.bf16.mxu0 %vm320_vm0, %v7371_v7 }
 0x7d2   :  { %5566 = vmatmul.mubr.msk.bf16.gmra.mxu0 %vm320_vm0, %v7386_v46 }
 0x7d3   :  { %5569 = vmatprep.mubr.msk.bf16.mxu0 %vm320_vm0, %v2424_v53 }
 0x7da   :  { %5570 = vmatmul.mubr.msk.bf16.gmra.mxu0 %vm320_vm0, %v2425_v26 }
 0x7db   :  { %5609 = vmatprep.mubr.msk.bf16.mxu0 %vm320_vm0, %v7297_v44 }
 0x7e2   :  { %5610 = vmatmul.mubr.msk.bf16.vlgmr.msra.gmra.mxu0 %vm320_vm0, %v7312_v18 }
 0x7e3   :  { %5613 = vmatprep.mubr.msk.bf16.mxu0 %vm320_vm0, %v7333_v45  ;;  %5646 = vmatpush3.bf16.msra.mxu0 %v6123_v31 }
 0x7e4   :  { %5647 = vmatprep.subr.bf16.mxu0 %v6124_v14 }
 0x7e7   :  { %5648 = vmatpush3.bf16.msra.mxu0 %v6124_v14 }
 0x7e8   :  { %3770 = vmatprep.subr.bf16.mxu0 %v6125_v25 }
 0x7ea   :  { %5614 = vmatmul.mubr.msk.bf16.gmra.mxu0 %vm320_vm0, %v7354_v28 }
 0x7eb   :  { %5617 = vmatprep.mubr.msk.bf16.mxu0 %vm320_vm0, %v7371_v7 }
 0x7f2   :  { %5618 = vmatmul.mubr.msk.bf16.gmra.mxu0 %vm320_vm0, %v7386_v46 }
 0x7f3   :  { %5621 = vmatprep.mubr.msk.bf16.mxu0 %vm320_vm0, %v2424_v53 }
 0x7f9   :  { %v2442_v61 = vpop.trf.xlu1 }
 0x7fa   :  { %5622 = vmatmul.mubr.msk.bf16.gmra.mxu0 %vm320_vm0, %v2425_v26 }
 0x7fb   :  { %5649 = vmatprep.mubr.msk.bf16.mxu0 %vm320_vm0, %v7297_v44 }
 0x7fd   :  { %v2443_v40 = vpop.trf.xlu1 }
 0x7fe   :  { %v7469_v44 = vpack.c.bf16 %v2443_v40, %v2442_v61 }
 0x801   :  { %v2444_v24 = vpop.trf.xlu1 }
 0x802   :  { %5650 = vmatmul.mubr.msk.bf16.vlgmr.msra.gmra.mxu0 %vm320_vm0, %v7312_v18  ;;  %v6128_v18 = vld [vmem:[%s8376_s4] ss:$16 sps:$4 sm:$0xff]  }
 0x803   :  { %5653 = vmatprep.mubr.msk.bf16.mxu0 %vm320_vm0, %v7333_v45  ;;  %3771 = vmatpush1.bf16.msra.mxu0 %v6126_v19  ;;  %v6129_v45 = vld [vmem:[%s8378_s6 + $0x78] sm:$0xff]  }
 0x804   :  { %3772 = vmatprep.subr.bf16.mxu0 %v6127_v35 }
 0x805   :  { %v2445_v5 = vpop.trf.xlu1 }
 0x806   :  { %v7471_v10 = vpack.c.bf16 %v2445_v5, %v2444_v24 }
 0x807   :  { %3773 = vmatpush1.bf16.msra.mxu0 %v6128_v18 }
 0x808   :  { %5533 = vmatprep.subr.bf16.mxu1 %v7471_v10  ;;  %5191 = vmatprep.subr.bf16.mxu0 %v6129_v45 }
 0x809   :  { %5534 = vmatpush3.bf16.msra.mxu1 %v7471_v10 }
 0x80a   :  { %5535 = vmatprep.subr.bf16.mxu1 %v7469_v44  ;;  %5654 = vmatmul.mubr.msk.bf16.gmra.mxu0 %vm320_vm0, %v7354_v28 }
 0x80b   :  { %5657 = vmatprep.mubr.msk.bf16.mxu0 %vm320_vm0, %v7371_v7 }
 0x80d   :  { %5536 = vmatpush3.bf16.msra.mxu1 %v7469_v44 }
 0x812   :  { %5658 = vmatmul.mubr.msk.bf16.gmra.mxu0 %vm320_vm0, %v7386_v46 }
 0x813   :  { %5661 = vmatprep.mubr.msk.bf16.mxu0 %vm320_vm0, %v2424_v53 }
 0x81a   :  { %5662 = vmatmul.mubr.msk.bf16.gmra.mxu0 %vm320_vm0, %v2425_v26 }
 0x81b   :  { %3790 = vmatprep.mubr.bf16.mxu0 %v8400_v6 }
 0x84a   :  { %v5519_v16 = vpop.f32.mrf.mxu0 }
 0x84c   :  { %v2534_v56 = vpop.f32.mrf.mxu0 }
 0x84e   :  { %v5520_v32 = vpop.f32.mrf.mxu0 }
 0x84f   :  { %v2598_v28 = vpack.c.bf16 %v5520_v32, %v5519_v16 }
 0x850   :  { %v2537_v33 = vpop.f32.mrf.mxu0 }
 0x851   :  { %v2597_v63 = vpack.c.bf16 %v2537_v33, %v2534_v56 }
 0x853   :  { %5537 = vmatprep.mubr.msk.bf16.mxu1 %vm320_vm0, %v2597_v63 }
 0x854   :  { %5538 = vmatmul.mubr.msk.bf16.vlgmr.msra.gmra.mxu1 %vm320_vm0, %v2598_v28 }
 0x85a   :  { %v5523_v7 = vpop.f32.mrf.mxu0 }
 0x85c   :  { %v2550_v41 = vpop.f32.mrf.mxu0 }
 0x85e   :  { %v5524_v11 = vpop.f32.mrf.mxu0 }
 0x85f   :  { %v2600_v15 = vpack.c.bf16 %v5524_v11, %v5523_v7 }
 0x860   :  { %v2553_v46 = vpop.f32.mrf.mxu0 }
 0x861   :  { %v2599_v48 = vpack.c.bf16 %v2553_v46, %v2550_v41 }
 0x863   :  { %5541 = vmatprep.mubr.msk.bf16.mxu1 %vm320_vm0, %v2599_v48 }
 0x864   :  { %5542 = vmatmul.mubr.msk.bf16.gmra.mxu1 %vm320_vm0, %v2600_v15 }
 0x86a   :  { %v5527_v58 = vpop.f32.mrf.mxu0 }
 0x86c   :  { %v2566_v30 = vpop.f32.mrf.mxu0 }
 0x86e   :  { %v5528_v9 = vpop.f32.mrf.mxu0 }
 0x86f   :  { %v2602_v53 = vpack.c.bf16 %v5528_v9, %v5527_v58 }
 0x870   :  { %v2569_v51 = vpop.f32.mrf.mxu0 }
 0x871   :  { %v2601_v27 = vpack.c.bf16 %v2569_v51, %v2566_v30 }
 0x873   :  { %5545 = vmatprep.mubr.msk.bf16.mxu1 %vm320_vm0, %v2601_v27 }
 0x874   :  { %5546 = vmatmul.mubr.msk.bf16.gmra.mxu1 %vm320_vm0, %v2602_v53 }
 0x87a   :  { %v5531_v55 = vpop.f32.mrf.mxu0 }
 0x87c   :  { %v2582_v39 = vpop.f32.mrf.mxu0 }
 0x87e   :  { %v5532_v26 = vpop.f32.mrf.mxu0 }
 0x87f   :  { %v2604_v14 = vpack.c.bf16 %v5532_v26, %v5531_v55 }
 0x880   :  { %v2585_v12 = vpop.f32.mrf.mxu0 }
 0x881   :  { %v2603_v31 = vpack.c.bf16 %v2585_v12, %v2582_v39 }
 0x882   :  { %v5559_v25 = vpop.f32.mrf.mxu0 }
 0x883   :  { %5549 = vmatprep.mubr.msk.bf16.mxu1 %vm320_vm0, %v2603_v31 }
 0x884   :  { %5550 = vmatmul.mubr.msk.bf16.gmra.mxu1 %vm320_vm0, %v2604_v14  ;;  %v2921_v61 = vpop.f32.mrf.mxu0 }
 0x886   :  { %v5560_v40 = vpop.f32.mrf.mxu0 }
 0x888   :  { %v2924_v24 = vpop.f32.mrf.mxu0 }
 0x88a   :  { %v5563_v19 = vpop.f32.mrf.mxu0 }
 0x88c   :  { %v2937_v5 = vpop.f32.mrf.mxu0 }
 0x88e   :  { %v5564_v35 = vpop.f32.mrf.mxu0 }
 0x88f   :  { %v2995_v39 = vpack.c.bf16 %v5564_v35, %v5563_v19  ;;  %v2993_v19 = vpack.c.bf16 %v5560_v40, %v5559_v25 }
 0x890   :  { %v2940_v18 = vpop.f32.mrf.mxu0 }
 0x891   :  { %v2994_v14 = vpack.c.bf16 %v2940_v18, %v2937_v5  ;;  %v2992_v5 = vpack.c.bf16 %v2924_v24, %v2921_v61 }
 0x892   :  { %v5567_v45 = vpop.f32.mrf.mxu0 }
 0x894   :  { %v2953_v16 = vpop.f32.mrf.mxu0 }
 0x896   :  { %v5568_v56 = vpop.f32.mrf.mxu0 }
 0x897   :  { %v2997_v15 = vpack.c.bf16 %v5568_v56, %v5567_v45 }
 0x898   :  { %v2956_v32 = vpop.f32.mrf.mxu0 }
 0x899   :  { %v2996_v51 = vpack.c.bf16 %v2956_v32, %v2953_v16 }
 0x89a   :  { %v5571_v33 = vpop.f32.mrf.mxu0 }
 0x89c   :  { %v2969_v63 = vpop.f32.mrf.mxu0 }
 0x89e   :  { %v5572_v28 = vpop.f32.mrf.mxu0 }
 0x89f   :  { %v2999_v7 = vpack.c.bf16 %v5572_v28, %v5571_v33 }
 0x8a0   :  { %v2972_v41 = vpop.f32.mrf.mxu0 }
 0x8a1   :  { %v2998_v11 = vpack.c.bf16 %v2972_v41, %v2969_v63  ;;  %5573 = vmatprep.subr.bf16.mxu1 %v2999_v7 }
 0x8a2   :  { %5574 = vmatpush3.bf16.msra.mxu1 %v2999_v7  ;;  %v7500_v46 = vpop.f32.mrf.mxu0 }
 0x8a3   :  { %5575 = vmatprep.subr.bf16.mxu1 %v2998_v11 }
 0x8a4   :  { %v7502_v48 = vpop.f32.mrf.mxu0 }
 0x8a6   :  { %5576 = vmatpush3.bf16.msra.mxu1 %v2998_v11  ;;  %v7504_v58 = vpop.f32.mrf.mxu0 }
 0x8a7   :  { %5577 = vmatprep.subr.bf16.mxu1 %v2997_v15 }
 0x8a8   :  { %v7508_v9 = vpop.f32.mrf.mxu0 }
 0x8aa   :  { %5578 = vmatpush3.bf16.msra.mxu1 %v2997_v15  ;;  %v7512_v53 = vpop.f32.mrf.mxu0 }
 0x8ab   :  { %5579 = vmatprep.subr.bf16.mxu1 %v2996_v51 }
 0x8ac   :  { %v7514_v55 = vpop.f32.mrf.mxu0 }
 0x8ae   :  { %5580 = vmatpush3.bf16.msra.mxu1 %v2996_v51  ;;  %v7516_v26 = vpop.f32.mrf.mxu0 }
 0x8af   :  { %5581 = vmatprep.subr.bf16.mxu1 %v2995_v39 }
 0x8b0   :  { %v7520_v31 = vpop.f32.mrf.mxu0 }
 0x8b2   :  { %5582 = vmatpush3.bf16.msra.mxu1 %v2995_v39  ;;  %v7524_v16 = vpop.f32.mrf.mxu0 }
 0x8b3   :  { %5583 = vmatprep.subr.bf16.mxu1 %v2994_v14 }
 0x8b4   :  { %v7526_v56 = vpop.f32.mrf.mxu0 }
 0x8b6   :  { %5584 = vmatpush3.bf16.msra.mxu1 %v2994_v14  ;;  %v7528_v35 = vpop.f32.mrf.mxu0 }
 0x8b7   :  { %5585 = vmatprep.subr.bf16.mxu1 %v2993_v19 }
 0x8b8   :  { %v7532_v33 = vpop.f32.mrf.mxu0 }
 0x8ba   :  { %5586 = vmatpush3.bf16.msra.mxu1 %v2993_v19  ;;  %v7536_v63 = vpop.f32.mrf.mxu0 }
 0x8bb   :  { %5587 = vmatprep.subr.bf16.mxu1 %v2992_v5 }
 0x8bc   :  { %v7538_v28 = vpop.f32.mrf.mxu0 }
 0x8be   :  { %5588 = vmatpush3.bf16.msra.mxu1 %v2992_v5  ;;  %v7540_v25 = vpop.f32.mrf.mxu0 }
 0x8bf   :  { %5625 = vmatprep.subr.bf16.mxu1 %v7471_v10 }
 0x8c0   :  { %v7545_v7 = vpop.f32.mrf.mxu0 }
 0x8c2   :  { %v5651_v24 = vpop.f32.mrf.mxu0 }
 0x8c4   :  { %v3534_v41 = vpop.f32.mrf.mxu0 }
 0x8c6   :  { %v5652_v11 = vpop.f32.mrf.mxu0 }
 0x8c7   :  { %v7549_v15 = vpack.c.bf16 %v5652_v11, %v5651_v24 }
 0x8c8   :  { %v3537_v51 = vpop.f32.mrf.mxu0 }
 0x8c9   :  { %v7551_v39 = vpack.c.bf16 %v3537_v51, %v3534_v41 }
 0x8ca   :  { %v5655_v14 = vpop.f32.mrf.mxu0 }
 0x8cc   :  { %v3550_v19 = vpop.f32.mrf.mxu0 }
 0x8ce   :  { %v5656_v5 = vpop.f32.mrf.mxu0 }
 0x8cf   :  { %v7553_v6 = vpack.c.bf16 %v5656_v5, %v5655_v14 }
 0x8d0   :  { %v3553_v40 = vpop.f32.mrf.mxu0 }
 0x8d1   :  { %v7555_v32 = vpack.c.bf16 %v3553_v40, %v3550_v19 }
 0x8d2   :  { %v7557_v18 = vpop.f32.mrf.mxu0 }
 0x8d4   :  { %v3566_v12 = vpop.f32.mrf.mxu0 }
 0x8d6   :  { %v7559_v61 = vpop.f32.mrf.mxu0 }
 0x8d8   :  { %v3569_v45 = vpop.f32.mrf.mxu0 }
 0x8d9   :  { %v7561_v30 = vpack.c.bf16 %v3569_v45, %v3566_v12 }
 0x914   :  { %v5539_v24 = vpop.f32.mrf.mxu1 }
 0x915   :  { %v2672_v41 = vadd.f32 %v5539_v24, %v6417_v34 }
 0x916   :  { %v2663_v11 = vpop.f32.mrf.mxu1 }
 0x917   :  { %2730 = vmax.xlane.f32.xlu0 %v2672_v41  ;;  %v2664_v51 = vadd.f32 %v2663_v11, %v6427_v38  ;;  %v8461_v38 = vld [vmem:[#allocation21_spill] sm:$0xff] }
 0x918   :  { %v5540_v14 = vpop.f32.mrf.mxu1 }
 0x919   :  { %v2675_v40 = vadd.f32 %v5540_v14, %v6438_v42 }
 0x91a   :  { %v2666_v19 = vpop.f32.mrf.mxu1 }
 0x91b   :  { %2726 = vmax.xlane.f32.xlu0 %v2664_v51  ;;  %v2667_v5 = vadd.f32 %v2666_v19, %v6449_v47 }
 0x91f   :  { %2732 = vmax.xlane.f32.xlu0 %v2675_v40 }
 0x923   :  { %2728 = vmax.xlane.f32.xlu0 %v2667_v5 }
 0x924   :  { %v5543_v27 = vpop.f32.mrf.mxu1 }
 0x925   :  { %v2688_v12 = vadd.f32 %v5543_v27, %v6460_v50  ;;  %v8457_v50 = vld [vmem:[#allocation17_spill] sm:$0xff] }
 0x926   :  { %v2679_v45 = vpop.f32.mrf.mxu1 }
 0x927   :  { %2738 = vmax.xlane.f32.xlu0 %v2688_v12  ;;  %v2680_v24 = vadd.f32 %v2679_v45, %v6471_v54 }
 0x928   :  { %v5544_v43 = vpop.f32.mrf.mxu1 }
 0x929   :  { %v2691_v11 = vadd.f32 %v5544_v43, %v6485_v59  ;;  %v8458_v43 = vld [vmem:[#allocation18_spill] sm:$0xff] }
 0x92a   :  { %v2682_v37 = vpop.f32.mrf.mxu1 }
 0x92b   :  { %2734 = vmax.xlane.f32.xlu0 %v2680_v24  ;;  %v7571_v14 = vadd.f32 %v2682_v37, %v6496_v0  ;;  %v8459_v0 = vld [vmem:[#allocation19_spill] sm:$0xff] }
 0x92f   :  { %2740 = vmax.xlane.f32.xlu0 %v2691_v11 }
 0x933   :  { %2736 = vmax.xlane.f32.xlu0 %v7571_v14 }
 0x934   :  { %v5547_v19 = vpop.f32.mrf.mxu1 }
 0x935   :  { %v7575_v57 = vadd.f32 %v5547_v19, %v8456_v1  ;;  %v8460_v1 = vld [vmem:[#allocation20_spill] sm:$0xff] }
 0x936   :  { %v2695_v27 = vpop.f32.mrf.mxu1 }
 0x937   :  { %2746 = vmax.xlane.f32.xlu0 %v7575_v57  ;;  %v7579_v45 = vadd.f32 %v2695_v27, %v8457_v50 }
 0x938   :  { %v5548_v54 = vpop.f32.mrf.mxu1 }
 0x939   :  { %v7583_v59 = vadd.f32 %v5548_v54, %v8458_v43  ;;  %v8462_v43 = vld [vmem:[#allocation22_spill] sm:$0xff] }
 0x93a   :  { %v2698_v37 = vpop.f32.mrf.mxu1 }
 0x93b   :  { %2742 = vmax.xlane.f32.xlu0 %v7579_v45  ;;  %v7587_v42 = vadd.f32 %v2698_v37, %v8459_v0  ;;  %v8463_v37 = vld [vmem:[#allocation23_spill] sm:$0xff] }
 0x93f   :  { %2748 = vmax.xlane.f32.xlu0 %v7583_v59 }
 0x943   :  { %2744 = vmax.xlane.f32.xlu0 %v7587_v42 }
 0x944   :  { %v5551_v19 = vpop.f32.mrf.mxu1 }
 0x945   :  { %v7591_v47 = vadd.f32 %v5551_v19, %v8460_v1 }
 0x946   :  { %v2711_v27 = vpop.f32.mrf.mxu1 }
 0x947   :  { %2754 = vmax.xlane.f32.xlu0 %v7591_v47  ;;  %v7595_v34 = vadd.f32 %v2711_v27, %v8461_v38 }
 0x948   :  { %v5552_v50 = vpop.f32.mrf.mxu1 }
 0x949   :  { %v7603_v0 = vadd.f32 %v5552_v50, %v8463_v37 }
 0x94a   :  { %v2714_v54 = vpop.f32.mrf.mxu1 }
 0x94b   :  { %2750 = vmax.xlane.f32.xlu0 %v7595_v34  ;;  %v7599_v62 = vadd.f32 %v2714_v54, %v8462_v43 }
 0x94f   :  { %2752 = vmax.xlane.f32.xlu0 %v7599_v62 }
 0x953   :  { %2756 = vmax.xlane.f32.xlu0 %v7603_v0 }
 0x9a0   :  { %v2731_v19 = vpop.xlane.xlu0 %2730 }
 0x9a1   :  { %v2760_v1 = vsub.f32 %v2672_v41, %v2731_v19 }
 0x9a3   :  { %v2778_v29 = vmul.f32 1.442695, %v2760_v1 }
 0x9a4   :  { %v2727_v49 = vpop.xlane.xlu0 %2726 }
 0x9a5   :  { %5909 = vpow2.f32 %v2778_v29  ;;  %v2758_v27 = vsub.f32 %v2664_v51, %v2727_v49 }
 0x9a7   :  { %v2774_v38 = vmul.f32 1.442695, %v2758_v27 }
 0x9a8   :  { %v2733_v20 = vpop.xlane.xlu0 %2732 }
 0x9a9   :  { %5911 = vpow2.f32 %v2774_v38  ;;  %v2761_v60 = vsub.f32 %v2675_v40, %v2733_v20 }
 0x9ab   :  { %v2780_v52 = vmul.f32 1.442695, %v2761_v60 }
 0x9ac   :  { %v2729_v54 = vpop.xlane.xlu0 %2728 }
 0x9ad   :  { %5913 = vpow2.f32 %v2780_v52  ;;  %v2759_v43 = vsub.f32 %v2667_v5, %v2729_v54 }
 0x9af   :  { %v2776_v13 = vmul.f32 1.442695, %v2759_v43 }
 0x9b0   :  { %v2739_v3 = vpop.xlane.xlu0 %2738 }
 0x9b1   :  { %5915 = vpow2.f32 %v2776_v13  ;;  %v2764_v50 = vsub.f32 %v2688_v12, %v2739_v3 }
 0x9b2   :  { %v7606_v37 = vpop.eup %5909 }
 0x9b3   :  { %v2786_v23 = vmul.f32 1.442695, %v2764_v50  ;;  %2810 = vadd.xlane.f32.xlu0 %v7606_v37 }
 0x9b4   :  { %v2735_v1 = vpop.xlane.xlu0 %2734 }
 0x9b5   :  { %5917 = vpow2.f32 %v2786_v23  ;;  %v2762_v49 = vsub.f32 %v2680_v24, %v2735_v1 }
 0x9b6   :  { %v7609_v29 = vpop.eup %5911 }
 0x9b7   :  { %v2782_v38 = vmul.f32 1.442695, %v2762_v49  ;;  %2806 = vadd.xlane.f32.xlu0 %v7609_v29 }
 0x9b8   :  { %v2741_v60 = vpop.xlane.xlu0 %2740 }
 0x9b9   :  { %5919 = vpow2.f32 %v2782_v38  ;;  %v2765_v52 = vsub.f32 %v2691_v11, %v2741_v60 }
 0x9ba   :  { %v7612_v20 = vpop.eup %5913 }
 0x9bb   :  { %v2788_v13 = vmul.f32 1.442695, %v2765_v52  ;;  %2812 = vadd.xlane.f32.xlu0 %v7612_v20 }
 0x9bc   :  { %v2737_v3 = vpop.xlane.xlu0 %2736 }
 0x9bd   :  { %5921 = vpow2.f32 %v2788_v13  ;;  %v2763_v41 = vsub.f32 %v7571_v14, %v2737_v3 }
 0x9be   :  { %v7616_v51 = vpop.eup %5915 }
 0x9bf   :  { %v2784_v23 = vmul.f32 1.442695, %v2763_v41  ;;  %2808 = vadd.xlane.f32.xlu0 %v7616_v51 }
 0x9c0   :  { %v2747_v40 = vpop.xlane.xlu0 %2746 }
 0x9c1   :  { %5923 = vpow2.f32 %v2784_v23  ;;  %v2768_v5 = vsub.f32 %v7575_v57, %v2747_v40 }
 0x9c2   :  { %v7620_v12 = vpop.eup %5917 }
 0x9c3   :  { %v2794_v24 = vmul.f32 1.442695, %v2768_v5  ;;  %2818 = vadd.xlane.f32.xlu0 %v7620_v12 }
 0x9c4   :  { %v2743_v11 = vpop.xlane.xlu0 %2742 }
 0x9c5   :  { %5925 = vpow2.f32 %v2794_v24  ;;  %v2766_v43 = vsub.f32 %v7579_v45, %v2743_v11 }
 0x9c6   :  { %v7624_v19 = vpop.eup %5919 }
 0x9c7   :  { %v2790_v14 = vmul.f32 1.442695, %v2766_v43  ;;  %2814 = vadd.xlane.f32.xlu0 %v7624_v19 }
 0x9c8   :  { %v2749_v27 = vpop.xlane.xlu0 %2748 }
 0x9c9   :  { %5927 = vpow2.f32 %v2790_v14  ;;  %v2769_v54 = vsub.f32 %v7583_v59, %v2749_v27 }
 0x9ca   :  { %v7628_v50 = vpop.eup %5921 }
 0x9cb   :  { %v2796_v57 = vmul.f32 1.442695, %v2769_v54  ;;  %2820 = vadd.xlane.f32.xlu0 %v7628_v50 }
 0x9cc   :  { %v2745_v1 = vpop.xlane.xlu0 %2744 }
 0x9cd   :  { %5929 = vpow2.f32 %v2796_v57  ;;  %v2767_v49 = vsub.f32 %v7587_v42, %v2745_v1 }
 0x9ce   :  { %v7632_v38 = vpop.eup %5923 }
 0x9cf   :  { %v2792_v45 = vmul.f32 1.442695, %v2767_v49  ;;  %2816 = vadd.xlane.f32.xlu0 %v7632_v38 }
 0x9d0   :  { %v2755_v60 = vpop.xlane.xlu0 %2754 }
 0x9d1   :  { %5931 = vpow2.f32 %v2792_v45  ;;  %v2772_v52 = vsub.f32 %v7591_v47, %v2755_v60 }
 0x9d2   :  { %v7636_v13 = vpop.eup %5925 }
 0x9d3   :  { %v2802_v59 = vmul.f32 1.442695, %v2772_v52  ;;  %2826 = vadd.xlane.f32.xlu0 %v7636_v13 }
 0x9d4   :  { %v2751_v3 = vpop.xlane.xlu0 %2750 }
 0x9d5   :  { %5933 = vpow2.f32 %v2802_v59  ;;  %v2770_v41 = vsub.f32 %v7595_v34, %v2751_v3 }
 0x9d6   :  { %v7640_v23 = vpop.eup %5927 }
 0x9d7   :  { %v2798_v42 = vmul.f32 1.442695, %v2770_v41  ;;  %2822 = vadd.xlane.f32.xlu0 %v7640_v23 }
 0x9d8   :  { %v2753_v40 = vpop.xlane.xlu0 %2752 }
 0x9d9   :  { %5935 = vpow2.f32 %v2798_v42  ;;  %v2771_v5 = vsub.f32 %v7599_v62, %v2753_v40 }
 0x9da   :  { %v7644_v24 = vpop.eup %5929 }
 0x9db   :  { %v2800_v47 = vmul.f32 1.442695, %v2771_v5  ;;  %2828 = vadd.xlane.f32.xlu0 %v7644_v24 }
 0x9dc   :  { %v2757_v11 = vpop.xlane.xlu0 %2756 }
 0x9dd   :  { %5937 = vpow2.f32 %v2800_v47  ;;  %v2773_v43 = vsub.f32 %v7603_v0, %v2757_v11  ;;  %v5663_v11 = vpop.f32.mrf.mxu0 }
 0x9de   :  { %v7648_v14 = vpop.eup %5931 }
 0x9df   :  { %v2804_v34 = vmul.f32 1.442695, %v2773_v43  ;;  %2824 = vadd.xlane.f32.xlu0 %v7648_v14 }
 0x9e1   :  { %5939 = vpow2.f32 %v2804_v34 }
 0x9e2   :  { %v7651_v27 = vpop.eup %5933 }
 0x9e3   :  { %2834 = vadd.xlane.f32.xlu0 %v7651_v27 }
 0x9e6   :  { %v7654_v62 = vpop.eup %5935 }
 0x9e7   :  { %2830 = vadd.xlane.f32.xlu1 %v7654_v62 }
 0x9ea   :  { %v7657_v54 = vpop.eup %5937 }
 0x9eb   :  { %2832 = vadd.xlane.f32.xlu0 %v7657_v54 }
 0x9ee   :  { %v7660_v57 = vpop.eup %5939 }
 0x9ef   :  { %2836 = vadd.xlane.f32.xlu0 %v7660_v57 }
 0xa3c   :  { %v2811_v0 = vpop.xlane.xlu0 %2810 }
 0xa3d   :  { %5941 = vrcp.f32 %v2811_v0  ;;  %v7667_v0 = vpop.f32.mrf.mxu0 }
 0xa40   :  { %v2807_v1 = vpop.xlane.xlu0 %2806 }
 0xa41   :  { %5943 = vrcp.f32 %v2807_v1 }
 0xa44   :  { %v2813_v49 = vpop.xlane.xlu0 %2812 }
 0xa45   :  { %5945 = vrcp.f32 %v2813_v49 }
 0xa48   :  { %v2809_v45 = vpop.xlane.xlu0 %2808 }
 0xa49   :  { %5947 = vrcp.f32 %v2809_v45 }
 0xa4a   :  { %v5942_v60 = vpop.eup %5941 }
 0xa4b   :  { %v2843_v52 = vmul.f32 %v5942_v60, %v7606_v37  ;;  %v5664_v60 = vpop.f32.mrf.mxu0 }
 0xa4c   :  { %v2819_v59 = vpop.xlane.xlu0 %2818 }
 0xa4d   :  { %2873 = vst [vmem:[#allocation2 + $0x110] sm:$0xff] %v2843_v52  ;;  %5949 = vrcp.f32 %v2819_v59 }
 0xa4e   :  { %v5944_v3 = vpop.eup %5943 }
 0xa4f   :  { %v2839_v41 = vmul.f32 %v5944_v3, %v7609_v29  ;;  %v7673_v3 = vpack.c.bf16 %v5664_v60, %v5663_v11 }
 0xa50   :  { %v2815_v42 = vpop.xlane.xlu0 %2814 }
 0xa51   :  { %5951 = vrcp.f32 %v2815_v42  ;;  %2871 = vst [vmem:[#allocation2 + $0x100] sm:$0xff] %v2839_v41 }
 0xa52   :  { %v5946_v40 = vpop.eup %5945 }
 0xa53   :  { %v2845_v5 = vmul.f32 %v5946_v40, %v7612_v20 }
 0xa54   :  { %v2821_v47 = vpop.xlane.xlu0 %2820 }
 0xa55   :  { %2874 = vst [vmem:[#allocation2 + $0x118] sm:$0xff] %v2845_v5  ;;  %5953 = vrcp.f32 %v2821_v47  ;;  %v2985_v49 = vpack.c.bf16 %v2845_v5, %v2843_v52 }
 0xa56   :  { %v5948_v43 = vpop.eup %5947 }
 0xa57   :  { %v2841_v34 = vmul.f32 %v5948_v43, %v7616_v51 }
 0xa58   :  { %v2817_v37 = vpop.xlane.xlu0 %2816 }
 0xa59   :  { %5955 = vrcp.f32 %v2817_v37  ;;  %2872 = vst [vmem:[#allocation2 + $0x108] sm:$0xff] %v2841_v34  ;;  %v2984_v1 = vpack.c.bf16 %v2841_v34, %v2839_v41 }
 0xa5a   :  { %v5950_v29 = vpop.eup %5949 }
 0xa5b   :  { %5589 = vmatprep.mubr.bf16.mxu1 %v2984_v1  ;;  %v2851_v45 = vmul.f32 %v5950_v29, %v7620_v12 }
 0xa5c   :  { %5590 = vmatmul.mubr.bf16.vlgmr.msra.gmra.mxu1 %v2985_v49  ;;  %v2827_v20 = vpop.xlane.xlu0 %2826 }
 0xa5d   :  { %5626 = vmatpush3.bf16.msra.mxu1 %v7471_v10  ;;  %5957 = vrcp.f32 %v2827_v20  ;;  %2877 = vst [vmem:[#allocation2 + $0x130] sm:$0xff] %v2851_v45 }
 0xa5e   :  { %v5952_v59 = vpop.eup %5951  ;;  %5627 = vmatprep.subr.bf16.mxu1 %v7469_v44 }
 0xa5f   :  { %v2847_v51 = vmul.f32 %v5952_v59, %v7624_v19 }
 0xa60   :  { %v2823_v41 = vpop.xlane.xlu0 %2822 }
 0xa61   :  { %5628 = vmatpush3.bf16.msra.mxu1 %v7469_v44  ;;  %5959 = vrcp.f32 %v2823_v41  ;;  %2875 = vst [vmem:[#allocation2 + $0x120] sm:$0xff] %v2847_v51 }
 0xa62   :  { %v5954_v12 = vpop.eup %5953  ;;  %5665 = vmatprep.subr.bf16.mxu1 %v7673_v3 }
 0xa63   :  { %v2853_v52 = vmul.f32 %v5954_v12, %v7628_v50 }
 0xa64   :  { %v2829_v10 = vpop.xlane.xlu0 %2828 }
 0xa65   :  { %5961 = vrcp.f32 %v2829_v10  ;;  %2878 = vst [vmem:[#allocation2 + $0x138] sm:$0xff] %v2853_v52  ;;  %v2987_v11 = vpack.c.bf16 %v2853_v52, %v2851_v45 }
 0xa66   :  { %v5956_v42 = vpop.eup %5955 }
 0xa67   :  { %v2849_v40 = vmul.f32 %v5956_v42, %v7632_v38 }
 0xa68   :  { %v2825_v5 = vpop.xlane.xlu0 %2824 }
 0xa69   :  { %5963 = vrcp.f32 %v2825_v5  ;;  %2876 = vst [vmem:[#allocation2 + $0x128] sm:$0xff] %v2849_v40  ;;  %v2986_v19 = vpack.c.bf16 %v2849_v40, %v2847_v51  ;;  %v3585_v40 = vpop.f32.mrf.mxu0 }
 0xa6a   :  { %v5958_v47 = vpop.eup %5957 }
 0xa6b   :  { %5593 = vmatprep.mubr.bf16.mxu1 %v2986_v19  ;;  %v2859_v44 = vmul.f32 %v5958_v47, %v7636_v13  ;;  %v8472_v19 = vld [vmem:[#allocation28_spill] sm:$0xff] }
 0xa6c   :  { %5594 = vmatmul.mubr.bf16.gmra.mxu1 %v2987_v11  ;;  %v2835_v43 = vpop.xlane.xlu0 %2834 }
 0xa6d   :  { %5965 = vrcp.f32 %v2835_v43  ;;  %2881 = vst [vmem:[#allocation2 + $0x150] sm:$0xff] %v2859_v44 }
 0xa6e   :  { %v5960_v50 = vpop.eup %5959 }
 0xa6f   :  { %v2855_v34 = vmul.f32 %v5960_v50, %v7640_v23 }
 0xa70   :  { %v2831_v37 = vpop.xlane.xlu1 %2830 }
 0xa71   :  { %5967 = vrcp.f32 %v2831_v37  ;;  %2879 = vst [vmem:[#allocation2 + $0x140] sm:$0xff] %v2855_v34 }
 0xa72   :  { %v5962_v38 = vpop.eup %5961 }
 0xa73   :  { %v2861_v1 = vmul.f32 %v5962_v38, %v7644_v24 }
 0xa74   :  { %v2833_v29 = vpop.xlane.xlu0 %2832 }
 0xa75   :  { %5969 = vrcp.f32 %v2833_v29  ;;  %2882 = vst [vmem:[#allocation2 + $0x158] sm:$0xff] %v2861_v1  ;;  %v2989_v59 = vpack.c.bf16 %v2861_v1, %v2859_v44  ;;  %v8473_v44 = vld [vmem:[#allocation31_spill] sm:$0xff]  ;;  %v8475_v1 = vld [vmem:[#allocation32_spill] sm:$0xff] }
 0xa76   :  { %v5964_v49 = vpop.eup %5963 }
 0xa77   :  { %v2857_v45 = vmul.f32 %v5964_v49, %v7648_v14 }
 0xa78   :  { %v2837_v13 = vpop.xlane.xlu0 %2836 }
 0xa79   :  { %5971 = vrcp.f32 %v2837_v13  ;;  %2880 = vst [vmem:[#allocation2 + $0x148] sm:$0xff] %v2857_v45  ;;  %v2988_v20 = vpack.c.bf16 %v2857_v45, %v2855_v34  ;;  %v8474_v34 = vld [vmem:[#allocation29_spill] sm:$0xff]  ;;  %v8476_v45 = vld [vmem:[#allocation30_spill] sm:$0xff] }
 0xa7a   :  { %v5966_v60 = vpop.eup %5965 }
 0xa7b   :  { %5597 = vmatprep.mubr.bf16.mxu1 %v2988_v20  ;;  %v2867_v23 = vmul.f32 %v5966_v60, %v7651_v27  ;;  %v8464_v27 = vpack.c.bf16 %v7508_v9, %v7502_v48  ;;  %v3610_v48 = vpack.c.bf16 %v7559_v61, %v7557_v18  ;;  %v8467_v9 = vpack.c.bf16 %v7516_v26, %v7512_v53 }
 0xa7c   :  { %5598 = vmatmul.mubr.bf16.gmra.mxu1 %v2989_v59  ;;  %v8470_v53 = vpack.c.bf16 %v7545_v7, %v7538_v28  ;;  %v8477_v59 = vld [vmem:[#allocation35_spill] sm:$0xff] }
 0xa7d   :  { %2885 = vst [vmem:[#allocation2 + $0x170] sm:$0xff] %v2867_v23 }
 0xa7e   :  { %v5968_v51 = vpop.eup %5967 }
 0xa7f   :  { %v2863_v24 = vmul.f32 %v5968_v51, %v7654_v62  ;;  %v3611_v62 = vpack.c.bf16 %v3585_v40, %v7667_v0 }
 0xa81   :  { %2883 = vst [vmem:[#allocation2 + $0x160] sm:$0xff] %v2863_v24 }
 0xa82   :  { %v5970_v41 = vpop.eup %5969 }
 0xa83   :  { %v2865_v12 = vmul.f32 %v5970_v41, %v7657_v54  ;;  %v8465_v54 = vpack.c.bf16 %v7504_v58, %v7500_v46  ;;  %v8468_v46 = vpack.c.bf16 %v7532_v33, %v7526_v56  ;;  %v8469_v58 = vpack.c.bf16 %v7528_v35, %v7524_v16  ;;  %v8478_v41 = vld [vmem:[#allocation33_spill] sm:$0xff] }
 0xa85   :  { %2884 = vst [vmem:[#allocation2 + $0x168] sm:$0xff] %v2865_v12  ;;  %v2990_v14 = vpack.c.bf16 %v2865_v12, %v2863_v24 }
 0xa86   :  { %v5972_v52 = vpop.eup %5971 }
 0xa87   :  { %5601 = vmatprep.mubr.bf16.mxu1 %v2990_v14  ;;  %v2869_v10 = vmul.f32 %v5972_v52, %v7660_v57  ;;  %v8466_v57 = vpack.c.bf16 %v7520_v31, %v7514_v55  ;;  %v6131_v55 = vld [vmem:[%s8375_s3] ss:$0 sm:$0xff] }
 0xa88   :  { %v2462_v26 = vadd.f32 %v6131_v55, %v7302_v22  ;;  %v2460_v56 = vadd.f32 %v6131_v55, %v7286_v17  ;;  %v2463_v33 = vadd.f32 %v6131_v55, %v7307_v8  ;;  %v2461_v28 = vadd.f32 %v6131_v55, %v7291_v36 }
 0xa89   :  { %2886 = vst [vmem:[#allocation2 + $0x178] sm:$0xff] %v2869_v10  ;;  %v2991_v42 = vpack.c.bf16 %v2869_v10, %v2867_v23  ;;  %v2466_v22 = vadd.f32 %v6131_v55, %v7344_v4  ;;  %v2464_v17 = vadd.f32 %v6131_v55, %v7318_v2  ;;  %v2467_v8 = vadd.f32 %v6131_v55, %v7349_v21  ;;  %v8479_v10 = vld [vmem:[#allocation36_spill] sm:$0xff] }
 0xa8a   :  { %v2465_v36 = vadd.f32 %v6131_v55, %v8472_v19  ;;  %v2470_v4 = vadd.f32 %v6131_v55, %v8473_v44  ;;  %v2468_v2 = vadd.f32 %v6131_v55, %v8474_v34  ;;  %v2471_v21 = vadd.f32 %v6131_v55, %v8475_v1 }
 0xa8b   :  { %5602 = vmatmul.mubr.bf16.gmra.mxu1 %v2991_v42  ;;  %v2469_v13 = vadd.f32 %v6131_v55, %v8476_v45  ;;  %v2474_v23 = vadd.f32 %v6131_v55, %v8477_v59  ;;  %v2472_v12 = vadd.f32 %v6131_v55, %v8478_v41  ;;  %v2475_v42 = vadd.f32 %v6131_v55, %v8479_v10  ;;  %v8494_v10 = vld [vmem:[#allocation23_spill] sm:$0xff] }
 0xa8c   :  { %5629 = vmatprep.mubr.msk.bf16.mxu1 %vm320_vm0, %v8464_v27 }
 0xa93   :  { %5630 = vmatmul.mubr.msk.bf16.vlgmr.msra.gmra.mxu1 %vm320_vm0, %v8465_v54 }
 0xa94   :  { %5666 = vmatpush3.bf16.msra.mxu1 %v7673_v3  ;;  %5633 = vmatprep.mubr.msk.bf16.mxu1 %vm320_vm0, %v8466_v57 }
 0xa95   :  { %5667 = vmatprep.subr.bf16.mxu1 %v3611_v62 }
 0xa98   :  { %5668 = vmatpush3.bf16.msra.mxu1 %v3611_v62  ;;  %v8480_v62 = vld [vmem:[#allocation34_spill] sm:$0xff] }
 0xa99   :  { %5669 = vmatprep.subr.bf16.mxu1 %v3610_v48  ;;  %v2473_v54 = vadd.f32 %v6131_v55, %v8480_v62  ;;  %v8484_v55 = vld [vmem:[#allocation10_spill] sm:$0xff] }
 0xa9b   :  { %5634 = vmatmul.mubr.msk.bf16.gmra.mxu1 %vm320_vm0, %v8467_v9 }
 0xa9c   :  { %5670 = vmatpush3.bf16.msra.mxu1 %v3610_v48  ;;  %5637 = vmatprep.mubr.msk.bf16.mxu1 %vm320_vm0, %v8468_v46  ;;  %v8481_v46 = vld [vmem:[#allocation8_spill] sm:$0xff] }
 0xa9d   :  { %5671 = vmatprep.subr.bf16.mxu1 %v7561_v30 }
 0xaa0   :  { %5672 = vmatpush3.bf16.msra.mxu1 %v7561_v30  ;;  %v8471_v30 = vpack.c.bf16 %v7540_v25, %v7536_v63 }
 0xaa1   :  { %5673 = vmatprep.subr.bf16.mxu1 %v7553_v6 }
 0xaa3   :  { %5638 = vmatmul.mubr.msk.bf16.gmra.mxu1 %vm320_vm0, %v8469_v58 }
 0xaa4   :  { %5674 = vmatpush3.bf16.msra.mxu1 %v7553_v6  ;;  %5641 = vmatprep.mubr.msk.bf16.mxu1 %vm320_vm0, %v8470_v53  ;;  %v6130_v6 = vld [vmem:[%s8376_s4 + $0x2c] ss:$16 sps:$4 sm:$0xff]  }
 0xaa5   :  { %5675 = vmatprep.subr.bf16.mxu1 %v7555_v32 }
 0xaa8   :  { %5676 = vmatpush3.bf16.msra.mxu1 %v7555_v32 }
 0xaa9   :  { %5677 = vmatprep.subr.bf16.mxu1 %v7549_v15 }
 0xaab   :  { %5642 = vmatmul.mubr.msk.bf16.gmra.mxu1 %vm320_vm0, %v8471_v30 }
 0xaac   :  { %5678 = vmatpush3.bf16.msra.mxu1 %v7549_v15 }
 0xaad   :  { %5679 = vmatprep.subr.bf16.mxu1 %v7551_v39 }
 0xab0   :  { %5680 = vmatpush3.bf16.msra.mxu1 %v7551_v39 }
 0xab1   :  { %3883 = vmatprep.subr.bf16.mxu1 %v6130_v6  ;;  %v8482_v6 = vld [vmem:[#allocation9_spill] sm:$0xff] }
 0xb1c   :  { %v5591_v31 = vpop.f32.mrf.mxu1 }
 0xb1d   :  { %v7740_v16 = vadd.f32 %v5591_v31, %v2462_v26 }
 0xb1e   :  { %v3034_v35 = vpop.f32.mrf.mxu1 }
 0xb1f   :  { %v7743_v32 = vadd.f32 %v3034_v35, %v2460_v56  ;;  %v8483_v35 = vld [vmem:[#allocation11_spill] sm:$0xff] }
 0xb20   :  { %v5592_v18 = vpop.f32.mrf.mxu1 }
 0xb21   :  { %v7746_v63 = vadd.f32 %v5592_v18, %v2463_v33 }
 0xb22   :  { %v3037_v25 = vpop.f32.mrf.mxu1 }
 0xb23   :  { %v7749_v7 = vadd.f32 %v3037_v25, %v2461_v28 }
 0xb2c   :  { %v5595_v61 = vpop.f32.mrf.mxu1 }
 0xb2d   :  { %v7752_v15 = vadd.f32 %v5595_v61, %v2466_v22  ;;  %v8485_v22 = vld [vmem:[#allocation14_spill] sm:$0xff] }
 0xb2e   :  { %v3050_v39 = vpop.f32.mrf.mxu1 }
 0xb2f   :  { %v7755_v0 = vadd.f32 %v3050_v39, %v2464_v17 }
 0xb30   :  { %v5596_v3 = vpop.f32.mrf.mxu1 }
 0xb31   :  { %v7758_v5 = vadd.f32 %v5596_v3, %v2467_v8  ;;  %v8486_v8 = vld [vmem:[#allocation13_spill] sm:$0xff] }
 0xb32   :  { %v3053_v47 = vpop.f32.mrf.mxu1 }
 0xb33   :  { %v7761_v11 = vadd.f32 %v3053_v47, %v2465_v36  ;;  %v8487_v47 = vld [vmem:[#allocation15_spill] sm:$0xff] }
 0xb3c   :  { %v5599_v43 = vpop.f32.mrf.mxu1 }
 0xb3d   :  { %v7764_v50 = vadd.f32 %v5599_v43, %v2470_v4  ;;  %v8488_v43 = vld [vmem:[#allocation19_spill] sm:$0xff] }
 0xb3e   :  { %v3066_v37 = vpop.f32.mrf.mxu1 }
 0xb3f   :  { %v7767_v38 = vadd.f32 %v3066_v37, %v2468_v2  ;;  %v8489_v37 = vld [vmem:[#allocation12_spill] sm:$0xff] }
 0xb40   :  { %v5600_v29 = vpop.f32.mrf.mxu1 }
 0xb41   :  { %v7770_v49 = vadd.f32 %v5600_v29, %v2471_v21  ;;  %v8490_v29 = vld [vmem:[#allocation18_spill] sm:$0xff] }
 0xb42   :  { %v3069_v20 = vpop.f32.mrf.mxu1 }
 0xb43   :  { %v7773_v60 = vadd.f32 %v3069_v20, %v2469_v13  ;;  %v8491_v20 = vld [vmem:[#allocation17_spill] sm:$0xff] }
 0xb4b   :  { %v5603_v51 = vpop.f32.mrf.mxu1 }
 0xb4c   :  { %v7776_v24 = vadd.f32 %v5603_v51, %v2474_v23  ;;  %v8492_v51 = vld [vmem:[#allocation22_spill] sm:$0xff] }
 0xb4d   :  { %v3082_v14 = vpop.f32.mrf.mxu1 }
 0xb4e   :  { %v7779_v52 = vadd.f32 %v3082_v14, %v2472_v12  ;;  %v8493_v12 = vld [vmem:[#allocation16_spill] sm:$0xff] }
 0xb4f   :  { %v5604_v27 = vpop.f32.mrf.mxu1 }
 0xb50   :  { %v7782_v40 = vadd.f32 %v5604_v27, %v2475_v42  ;;  %v8495_v27 = vld [vmem:[#allocation21_spill] sm:$0xff] }
 0xb51   :  { %v3085_v57 = vpop.f32.mrf.mxu1 }
 0xb52   :  { %v7785_v48 = vadd.f32 %v3085_v57, %v2473_v54  ;;  %v8496_v54 = vld [vmem:[#allocation20_spill] sm:$0xff] }
 0xb53   :  { %v5631_v9 = vpop.f32.mrf.mxu1 }
 0xb54   :  { %v3285_v58 = vadd.f32 %v5631_v9, %v8481_v46 }
 0xb55   :  { %v3276_v53 = vpop.f32.mrf.mxu1 }
 0xb56   :  { %3343 = vmax.xlane.f32.xlu0 %v3285_v58  ;;  %v3277_v26 = vadd.f32 %v3276_v53, %v8482_v6 }
 0xb57   :  { %v5632_v30 = vpop.f32.mrf.mxu1 }
 0xb58   :  { %v3288_v25 = vadd.f32 %v5632_v30, %v8484_v55 }
 0xb59   :  { %v3279_v31 = vpop.f32.mrf.mxu1 }
 0xb5a   :  { %3339 = vmax.xlane.f32.xlu0 %v3277_v26  ;;  %v3280_v33 = vadd.f32 %v3279_v31, %v8483_v35 }
 0xb5b   :  { %v5635_v56 = vpop.f32.mrf.mxu1 }
 0xb5c   :  { %v3301_v1 = vadd.f32 %v5635_v56, %v8489_v37 }
 0xb5d   :  { %v3292_v18 = vpop.f32.mrf.mxu1 }
 0xb5e   :  { %3341 = vmax.xlane.f32.xlu0 %v3280_v33  ;;  %v3293_v3 = vadd.f32 %v3292_v18, %v8486_v8 }
 0xb5f   :  { %v5636_v28 = vpop.f32.mrf.mxu1 }
 0xb60   :  { %v3304_v61 = vadd.f32 %v5636_v28, %v8485_v22 }
 0xb61   :  { %v3295_v17 = vpop.f32.mrf.mxu1 }
 0xb62   :  { %3353 = vmax.xlane.f32.xlu1 %v3304_v61  ;;  %3345 = vmax.xlane.f32.xlu0 %v3288_v25  ;;  %v3296_v44 = vadd.f32 %v3295_v17, %v8487_v47 }
 0xb63   :  { %v5639_v39 = vpop.f32.mrf.mxu1 }
 0xb64   :  { %v7808_v14 = vadd.f32 %v5639_v39, %v8493_v12 }
 0xb65   :  { %v3308_v19 = vpop.f32.mrf.mxu1 }
 0xb66   :  { %3347 = vmax.xlane.f32.xlu0 %v3293_v3  ;;  %v3309_v59 = vadd.f32 %v3308_v19, %v8491_v20 }
 0xb67   :  { %v5640_v36 = vpop.f32.mrf.mxu1 }
 0xb68   :  { %v7800_v45 = vadd.f32 %v5640_v36, %v8490_v29 }
 0xb69   :  { %v3311_v4 = vpop.f32.mrf.mxu1 }
 0xb6a   :  { %v7795_v34 = vadd.f32 %v3311_v4, %v8488_v43  ;;  %3349 = vmax.xlane.f32.xlu0 %v3296_v44 }
 0xb6b   :  { %v5643_v2 = vpop.f32.mrf.mxu1 }
 0xb6c   :  { %3357 = vmax.xlane.f32.xlu1 %v7795_v34  ;;  %v7821_v57 = vadd.f32 %v5643_v2, %v8496_v54 }
 0xb6d   :  { %v3324_v21 = vpop.f32.mrf.mxu1 }
 0xb6e   :  { %3351 = vmax.xlane.f32.xlu0 %v3301_v1  ;;  %v7816_v62 = vadd.f32 %v3324_v21, %v8495_v27 }
 0xb6f   :  { %v5644_v13 = vpop.f32.mrf.mxu1 }
 0xb70   :  { %3361 = vmax.xlane.f32.xlu1 %v7800_v45  ;;  %v7812_v42 = vadd.f32 %v5644_v13, %v8494_v10 }
 0xb71   :  { %v3327_v23 = vpop.f32.mrf.mxu1 }
 0xb72   :  { %v7805_v41 = vadd.f32 %v3327_v23, %v8492_v51  ;;  %3355 = vmax.xlane.f32.xlu0 %v3309_v59 }
 0xb74   :  { %3365 = vmax.xlane.f32.xlu1 %v7805_v41 }
 0xb76   :  { %3359 = vmax.xlane.f32.xlu0 %v7808_v14 }
 0xb78   :  { %3369 = vmax.xlane.f32.xlu1 %v7812_v42 }
 0xb7a   :  { %3363 = vmax.xlane.f32.xlu0 %v7816_v62 }
 0xb7e   :  { %3367 = vmax.xlane.f32.xlu0 %v7821_v57 }
 0xbdf   :  { %v3344_v9 = vpop.xlane.xlu0 %3343 }
 0xbe0   :  { %v3373_v46 = vsub.f32 %v3285_v58, %v3344_v9 }
 0xbe2   :  { %v3391_v31 = vmul.f32 1.442695, %v3373_v46 }
 0xbe3   :  { %v3340_v53 = vpop.xlane.xlu0 %3339 }
 0xbe4   :  { %v3371_v30 = vsub.f32 %v3277_v26, %v3340_v53 }
 0xbe6   :  { %v3387_v6 = vmul.f32 1.442695, %v3371_v30 }
 0xbe7   :  { %v3342_v56 = vpop.xlane.xlu0 %3341 }
 0xbe8   :  { %5973 = vpow2.f32 %v3387_v6  ;;  %v3372_v35 = vsub.f32 %v3280_v33, %v3342_v56 }
 0xbe9   :  { %5975 = vpow2.f32 %v3391_v31 }
 0xbea   :  { %v3389_v18 = vmul.f32 1.442695, %v3372_v35 }
 0xbeb   :  { %v3346_v28 = vpop.xlane.xlu0 %3345  ;;  %v3354_v39 = vpop.xlane.xlu1 %3353 }
 0xbec   :  { %5977 = vpow2.f32 %v3389_v18  ;;  %v3374_v55 = vsub.f32 %v3288_v25, %v3346_v28  ;;  %v3378_v36 = vsub.f32 %v3304_v61, %v3354_v39 }
 0xbee   :  { %v3393_v22 = vmul.f32 1.442695, %v3374_v55  ;;  %v3401_v33 = vmul.f32 1.442695, %v3378_v36 }
 0xbef   :  { %v3348_v17 = vpop.xlane.xlu0 %3347 }
 0xbf0   :  { %v3375_v8 = vsub.f32 %v3293_v3, %v3348_v17  ;;  %5979 = vpow2.f32 %v3393_v22 }
 0xbf2   :  { %v3395_v19 = vmul.f32 1.442695, %v3375_v8 }
 0xbf3   :  { %v3350_v58 = vpop.xlane.xlu0 %3349 }
 0xbf4   :  { %5981 = vpow2.f32 %v3395_v19  ;;  %v3376_v26 = vsub.f32 %v3296_v44, %v3350_v58 }
 0xbf5   :  { %v7824_v47 = vpop.eup %5973  ;;  %v3358_v4 = vpop.xlane.xlu1 %3357 }
 0xbf6   :  { %v3397_v43 = vmul.f32 1.442695, %v3376_v26  ;;  %3419 = vadd.xlane.f32.xlu0 %v7824_v47  ;;  %v3380_v2 = vsub.f32 %v7795_v34, %v3358_v4  ;;  %v7828_v37 = vpop.eup %5975 }
 0xbf7   :  { %v3352_v25 = vpop.xlane.xlu0 %3351 }
 0xbf8   :  { %5983 = vpow2.f32 %v3397_v43  ;;  %v3377_v3 = vsub.f32 %v3301_v1, %v3352_v25  ;;  %v3405_v44 = vmul.f32 1.442695, %v3380_v2 }
 0xbf9   :  { %v7830_v21 = vpop.eup %5977  ;;  %v3362_v61 = vpop.xlane.xlu1 %3361  ;;  %5985 = vpow2.f32 %v3401_v33 }
 0xbfa   :  { %v3399_v29 = vmul.f32 1.442695, %v3377_v3  ;;  %3423 = vadd.xlane.f32.xlu0 %v7828_v37  ;;  %3421 = vadd.xlane.f32.xlu1 %v7830_v21  ;;  %v3382_v13 = vsub.f32 %v7800_v45, %v3362_v61 }
 0xbfb   :  { %v3356_v20 = vpop.xlane.xlu0 %3355 }
 0xbfc   :  { %5987 = vpow2.f32 %v3399_v29  ;;  %v3379_v34 = vsub.f32 %v3309_v59, %v3356_v20  ;;  %v3409_v1 = vmul.f32 1.442695, %v3382_v13 }
 0xbfd   :  { %v3366_v23 = vpop.xlane.xlu1 %3365  ;;  %v7835_v51 = vpop.eup %5979  ;;  %5989 = vpow2.f32 %v3405_v44 }
 0xbfe   :  { %v3403_v12 = vmul.f32 1.442695, %v3379_v34  ;;  %v3384_v10 = vsub.f32 %v7805_v41, %v3366_v23  ;;  %3425 = vadd.xlane.f32.xlu1 %v7835_v51 }
 0xbff   :  { %v3360_v27 = vpop.xlane.xlu0 %3359 }
 0xc00   :  { %5991 = vpow2.f32 %v3403_v12  ;;  %v3381_v54 = vsub.f32 %v7808_v14, %v3360_v27  ;;  %v3413_v59 = vmul.f32 1.442695, %v3384_v10 }
 0xc01   :  { %v7840_v9 = vpop.eup %5981  ;;  %v3370_v45 = vpop.xlane.xlu1 %3369  ;;  %5993 = vpow2.f32 %v3409_v1 }
 0xc02   :  { %v3407_v46 = vmul.f32 1.442695, %v3381_v54  ;;  %3427 = vadd.xlane.f32.xlu0 %v7840_v9  ;;  %v3386_v53 = vsub.f32 %v7812_v42, %v3370_v45  ;;  %v6132_v45 = vld [vmem:[%s8376_s4 + $0x28] ss:$16 sps:$4 sm:$0xff]  }
 0xc03   :  { %v3364_v30 = vpop.xlane.xlu0 %3363 }
 0xc04   :  { %5995 = vpow2.f32 %v3407_v46  ;;  %v3383_v41 = vsub.f32 %v7816_v62, %v3364_v30  ;;  %v3417_v14 = vmul.f32 1.442695, %v3386_v53  ;;  %v6133_v46 = vld [vmem:[%s8376_s4 + $0xc] ss:$16 sps:$4 sm:$0xff]  }
 0xc05   :  { %v7845_v6 = vpop.eup %5983  ;;  %5997 = vpow2.f32 %v3413_v59 }
 0xc06   :  { %v3411_v31 = vmul.f32 1.442695, %v3383_v41  ;;  %3429 = vadd.xlane.f32.xlu1 %v7845_v6  ;;  %v7848_v35 = vpop.eup %5985  ;;  %v6134_v41 = vld [vmem:[%s8376_s4 + $0x8] ss:$16 sps:$4 sm:$0xff]  }
 0xc07   :  { %v3368_v56 = vpop.xlane.xlu0 %3367 }
 0xc08   :  { %5999 = vpow2.f32 %v3411_v31  ;;  %v3385_v18 = vsub.f32 %v7821_v57, %v3368_v56 }
 0xc09   :  { %v7851_v28 = vpop.eup %5987  ;;  %6001 = vpow2.f32 %v3417_v14  ;;  %v6135_v14 = vld [vmem:[%s8378_s6 + $0xf8] sm:$0xff]  }
 0xc0a   :  { %v3415_v42 = vmul.f32 1.442695, %v3385_v18  ;;  %3433 = vadd.xlane.f32.xlu1 %v7848_v35  ;;  %3431 = vadd.xlane.f32.xlu0 %v7851_v28  ;;  %v7855_v62 = vpop.eup %5989 }
 0xc0c   :  { %6003 = vpow2.f32 %v3415_v42 }
 0xc0d   :  { %v7857_v55 = vpop.eup %5991 }
 0xc0e   :  { %3437 = vadd.xlane.f32.xlu1 %v7855_v62  ;;  %3435 = vadd.xlane.f32.xlu0 %v7857_v55  ;;  %v7861_v22 = vpop.eup %5993 }
 0xc11   :  { %v7863_v57 = vpop.eup %5995 }
 0xc12   :  { %3441 = vadd.xlane.f32.xlu1 %v7861_v22  ;;  %3439 = vadd.xlane.f32.xlu0 %v7863_v57  ;;  %v7867_v17 = vpop.eup %5997 }
 0xc15   :  { %v7869_v39 = vpop.eup %5999 }
 0xc16   :  { %3445 = vadd.xlane.f32.xlu1 %v7867_v17  ;;  %3443 = vadd.xlane.f32.xlu0 %v7869_v39  ;;  %v7873_v8 = vpop.eup %6001 }
 0xc19   :  { %v7875_v19 = vpop.eup %6003 }
 0xc1a   :  { %3449 = vadd.xlane.f32.xlu1 %v7873_v8  ;;  %3447 = vadd.xlane.f32.xlu0 %v7875_v19 }
 0xc7f   :  { %v3420_v36 = vpop.xlane.xlu0 %3419 }
 0xc80   :  { %6005 = vrcp.f32 %v3420_v36 }
 0xc83   :  { %v3422_v58 = vpop.xlane.xlu1 %3421  ;;  %v3424_v26 = vpop.xlane.xlu0 %3423 }
 0xc84   :  { %6007 = vrcp.f32 %v3422_v58 }
 0xc85   :  { %6009 = vrcp.f32 %v3424_v26 }
 0xc87   :  { %v3426_v4 = vpop.xlane.xlu1 %3425 }
 0xc88   :  { %6011 = vrcp.f32 %v3426_v4 }
 0xc8b   :  { %v3428_v43 = vpop.xlane.xlu0 %3427 }
 0xc8c   :  { %6013 = vrcp.f32 %v3428_v43 }
 0xc8d   :  { %v6006_v33 = vpop.eup %6005 }
 0xc8e   :  { %v3452_v2 = vmul.f32 %v6006_v33, %v7824_v47 }
 0xc8f   :  { %v3430_v25 = vpop.xlane.xlu1 %3429 }
 0xc90   :  { %6015 = vrcp.f32 %v3430_v25  ;;  %3484 = vst [vmem:[#allocation2 + $0x180] sm:$0xff] %v3452_v2 }
 0xc91   :  { %v6008_v3 = vpop.eup %6007 }
 0xc92   :  { %v6010_v61 = vpop.eup %6009  ;;  %v3454_v29 = vmul.f32 %v6008_v3, %v7830_v21 }
 0xc93   :  { %v3456_v44 = vmul.f32 %v6010_v61, %v7828_v37  ;;  %v3434_v13 = vpop.xlane.xlu1 %3433  ;;  %v3432_v20 = vpop.xlane.xlu0 %3431 }
 0xc94   :  { %6017 = vrcp.f32 %v3434_v13  ;;  %3485 = vst [vmem:[#allocation2 + $0x188] sm:$0xff] %v3454_v29  ;;  %v3597_v34 = vpack.c.bf16 %v3454_v29, %v3452_v2 }
 0xc95   :  { %3486 = vst [vmem:[#allocation2 + $0x190] sm:$0xff] %v3456_v44  ;;  %6019 = vrcp.f32 %v3432_v20  ;;  %v6012_v23 = vpop.eup %6011 }
 0xc96   :  { %5681 = vmatprep.mubr.bf16.mxu1 %v3597_v34  ;;  %v3458_v47 = vmul.f32 %v6012_v23, %v7835_v51 }
 0xc97   :  { %v3438_v12 = vpop.xlane.xlu1 %3437  ;;  %v3436_v1 = vpop.xlane.xlu0 %3435 }
 0xc98   :  { %6021 = vrcp.f32 %v3438_v12  ;;  %3487 = vst [vmem:[#allocation2 + $0x198] sm:$0xff] %v3458_v47  ;;  %v3598_v27 = vpack.c.bf16 %v3458_v47, %v3456_v44  ;;  %v8497_v47 = vmov 0  }
 0xc99   :  { %v6014_v10 = vpop.eup %6013  ;;  %6023 = vrcp.f32 %v3436_v1 }
 0xc9a   :  { %v3460_v37 = vmul.f32 %v6014_v10, %v7840_v9  ;;  %5682 = vmatmul.mubr.bf16.vlgmr.msra.gmra.mxu1 %v3598_v27 }
 0xc9b   :  { %v3442_v21 = vpop.xlane.xlu1 %3441  ;;  %v3440_v54 = vpop.xlane.xlu0 %3439  ;;  %3884 = vmatpush1.bf16.msra.mxu1 %v6132_v45 }
 0xc9c   :  { %6025 = vrcp.f32 %v3442_v21  ;;  %3488 = vst [vmem:[#allocation2 + $0x1a0] sm:$0xff] %v3460_v37  ;;  %3885 = vmatprep.subr.bf16.mxu1 %v6133_v46 }
 0xc9d   :  { %v6016_v51 = vpop.eup %6015  ;;  %6027 = vrcp.f32 %v3440_v54  ;;  %v6138_v54 = vld [vmem:[%s8378_s6 + $0x70] sm:$0xff]  }
 0xc9e   :  { %v3462_v59 = vmul.f32 %v6016_v51, %v7845_v6 }
 0xc9f   :  { %v3446_v9 = vpop.xlane.xlu1 %3445  ;;  %v3444_v53 = vpop.xlane.xlu0 %3443  ;;  %3886 = vmatpush1.bf16.msra.mxu1 %v6134_v41 }
 0xca0   :  { %6029 = vrcp.f32 %v3446_v9  ;;  %3489 = vst [vmem:[#allocation2 + $0x1a8] sm:$0xff] %v3462_v59  ;;  %v3599_v30 = vpack.c.bf16 %v3462_v59, %v3460_v37  ;;  %5255 = vmatprep.subr.bf16.mxu1 %v6135_v14  ;;  %v6140_v59 = vld [vmem:[%s8378_s6 + $0x30] sm:$0xff]   ;;  %v6145_v14 = vld [vmem:[%s8378_s6 + $0xa8] sm:$0xff]  }
 0xca1   :  { %v6018_v31 = vpop.eup %6017  ;;  %6031 = vrcp.f32 %v3444_v53  ;;  %v6141_v9 = vld [vmem:[%s8378_s6 + $0xb0] sm:$0xff]  }
 0xca2   :  { %v6020_v56 = vpop.eup %6019  ;;  %5685 = vmatprep.mubr.bf16.mxu1 %v3599_v30  ;;  %v3466_v6 = vmul.f32 %v6018_v31, %v7848_v35  ;;  %v6143_v30 = vld [vmem:[%s8378_s6 + $0xe8] sm:$0xff]  }
 0xca3   :  { %v3450_v18 = vpop.xlane.xlu1 %3449  ;;  %v3448_v42 = vpop.xlane.xlu0 %3447  ;;  %v3464_v36 = vmul.f32 %v6020_v56, %v7851_v28  ;;  %v6144_v31 = vld [vmem:[%s8378_s6 + $0x28] sm:$0xff]  }
 0xca4   :  { %6033 = vrcp.f32 %v3450_v18  ;;  %3491 = vst [vmem:[#allocation2 + $0x1b8] sm:$0xff] %v3466_v6 }
 0xca5   :  { %v6022_v58 = vpop.eup %6021  ;;  %6035 = vrcp.f32 %v3448_v42  ;;  %3490 = vst [vmem:[#allocation2 + $0x1b0] sm:$0xff] %v3464_v36  ;;  %v3600_v26 = vpack.c.bf16 %v3466_v6, %v3464_v36  ;;  %v6146_v6 = vld [vmem:[%s8378_s6 + $0x60] sm:$0xff]  }
 0xca6   :  { %v6024_v4 = vpop.eup %6023  ;;  %v3470_v43 = vmul.f32 %v6022_v58, %v7855_v62  ;;  %v6148_v36 = vld [vmem:[%s8378_s6 + $0x20] sm:$0xff]  }
 0xca7   :  { %5686 = vmatmul.mubr.bf16.gmra.mxu1 %v3600_v26  ;;  %v3468_v33 = vmul.f32 %v6024_v4, %v7857_v55  ;;  %v6149_v58 = vld [vmem:[%s8378_s6 + $0xa0] sm:$0xff]   ;;  %v6150_v4 = vld [vmem:[%s8378_s6 + $0x58] sm:$0xff]  }
 0xca8   :  { %3493 = vst [vmem:[#allocation2 + $0x1c8] sm:$0xff] %v3470_v43 }
 0xca9   :  { %v6026_v2 = vpop.eup %6025  ;;  %3492 = vst [vmem:[#allocation2 + $0x1c0] sm:$0xff] %v3468_v33  ;;  %v3601_v35 = vpack.c.bf16 %v3470_v43, %v3468_v33  ;;  %v6152_v33 = vld [vmem:[%s8378_s6 + $0x18] sm:$0xff]  }
 0xcaa   :  { %v6028_v25 = vpop.eup %6027  ;;  %v3474_v3 = vmul.f32 %v6026_v2, %v7861_v22  ;;  %v6153_v2 = vld [vmem:[%s8378_s6 + $0x98] sm:$0xff]  }
 0xcab   :  { %5689 = vmatprep.mubr.bf16.mxu1 %v3601_v35  ;;  %v3472_v28 = vmul.f32 %v6028_v25, %v7863_v57  ;;  %v6154_v25 = vld [vmem:[%s8378_s6 + $0x50] sm:$0xff]  }
 0xcac   :  { %3495 = vst [vmem:[#allocation2 + $0x1d8] sm:$0xff] %v3474_v3 }
 0xcad   :  { %v6030_v61 = vpop.eup %6029  ;;  %3494 = vst [vmem:[#allocation2 + $0x1d0] sm:$0xff] %v3472_v28  ;;  %v3602_v29 = vpack.c.bf16 %v3474_v3, %v3472_v28 }
 0xcae   :  { %v6032_v44 = vpop.eup %6031  ;;  %v3478_v62 = vmul.f32 %v6030_v61, %v7867_v17  ;;  %v6156_v61 = vld [vmem:[%s8378_s6 + $0x10] sm:$0xff]  }
 0xcaf   :  { %5690 = vmatmul.mubr.bf16.gmra.mxu1 %v3602_v29  ;;  %v3476_v55 = vmul.f32 %v6032_v44, %v7869_v39  ;;  %v6157_v29 = vld [vmem:[%s8378_s6 + $0x90] sm:$0xff]  }
 0xcb0   :  { %3497 = vst [vmem:[#allocation2 + $0x1e8] sm:$0xff] %v3478_v62 }
 0xcb1   :  { %v6034_v13 = vpop.eup %6033  ;;  %3496 = vst [vmem:[#allocation2 + $0x1e0] sm:$0xff] %v3476_v55  ;;  %v3603_v20 = vpack.c.bf16 %v3478_v62, %v3476_v55  ;;  %v6158_v62 = vld [vmem:[%s8378_s6 + $0x48] sm:$0xff]  }
 0xcb2   :  { %v6036_v34 = vpop.eup %6035  ;;  %v3482_v22 = vmul.f32 %v6034_v13, %v7873_v8  ;;  %v6160_v13 = vld [vmem:[%s8378_s6 + $0x8] sm:$0xff]  }
 0xcb3   :  { %5693 = vmatprep.mubr.bf16.mxu1 %v3603_v20  ;;  %v3480_v57 = vmul.f32 %v6036_v34, %v7875_v19  ;;  %v6161_v20 = vld [vmem:[%s8378_s6 + $0x88] sm:$0xff]  }
 0xcb4   :  { %3499 = vst [vmem:[#allocation2 + $0x1f8] sm:$0xff] %v3482_v22 }
 0xcb5   :  { %3498 = vst [vmem:[#allocation2 + $0x1f0] sm:$0xff] %v3480_v57  ;;  %v3604_v23 = vpack.c.bf16 %v3482_v22, %v3480_v57  ;;  %v6162_v22 = vld [vmem:[%s8378_s6 + $0x40] sm:$0xff]  }
 0xcb7   :  { %5694 = vmatmul.mubr.bf16.gmra.mxu1 %v3604_v23 }
 0xcb8   :  { %3903 = vmatprep.mubr.bf16.mxu1 %v8497_v47 }
 0xd5a   :  { %v5683_v17 = vpop.f32.mrf.mxu1 }
 0xd5b   :  { %v7938_v45 = vadd.f32 %v5683_v17, %v7740_v16  ;;  %v6142_v16 = vld [vmem:[%s8378_s6 + $0x68] sm:$0xff]   ;;  %v6164_v17 = vld [vmem:[%s8378_s6] sm:$0xff]  }
 0xd5c   :  { %v3647_v12 = vpop.f32.mrf.mxu1 }
 0xd5d   :  { %v7909_v10 = vadd.f32 %v3647_v12, %v7743_v32  ;;  %v6136_v32 = vld [vmem:[%s8378_s6 + $0x38] sm:$0xff]   ;;  %v6165_v12 = vld [vmem:[%s8378_s6 + $0x80] sm:$0xff]  }
 0xd5e   :  { %v5684_v1 = vpop.f32.mrf.mxu1 }
 0xd5f   :  { %v7923_v37 = vadd.f32 %v5684_v1, %v7746_v63  ;;  %v6139_v63 = vld [vmem:[%s8378_s6 + $0xf0] sm:$0xff]  }
 0xd60   :  { %v3650_v39 = vpop.f32.mrf.mxu1 }
 0xd61   :  { %v7912_v27 = vadd.f32 %v3650_v39, %v7749_v7  ;;  %v6137_v7 = vld [vmem:[%s8378_s6 + $0xb8] sm:$0xff]   ;;  %v3727_v46 = vpack.c.bf16 %v7923_v37, %v7938_v45 }
 0xd63   :  { %v3726_v8 = vpack.c.bf16 %v7912_v27, %v7909_v10 }
 0xd65   :  { %4852 = vmatmul.mubr.msk.bf16.vlgmr.msra.gmra.mxu0 %vm320_vm0, %v3726_v8  ;;  %4860 = vmatmul.mubr.msk.bf16.vlgmr.msra.gmra.mxu1 %vm320_vm0, %v3726_v8 }
 0xd66   :  { %3800 = vmatprep.mubr.bf16.mxu0 %v8497_v47  ;;  %3913 = vmatprep.mubr.bf16.mxu1 %v8497_v47 }
 0xd67   :  { %v7918_v19 = vpop.f32.mrf.mxu1  ;;  %5192 = vmatpush3.bf16.msra.mxu0 %v6136_v32  ;;  %5256 = vmatpush3.bf16.msra.mxu1 %v6137_v7 }
 0xd68   :  { %5193 = vmatprep.subr.bf16.mxu0 %v6138_v54  ;;  %5257 = vmatprep.subr.bf16.mxu1 %v6139_v63  ;;  %v8013_v3 = vadd.f32 %v7918_v19, %v7752_v15  ;;  %v6159_v15 = vld [vmem:[%s8378_s6 + $0xc8] sm:$0xff]  }
 0xd69   :  { %v3663_v21 = vpop.f32.mrf.mxu1  ;;  %v5779_v54 = vld [vmem:[%s8380_s8 + $0x8] sm:$0xff]  }
 0xd6a   :  { %v7976_v18 = vadd.f32 %v3663_v21, %v7755_v0  ;;  %v6151_v0 = vld [vmem:[%s8378_s6 + $0xd8] sm:$0xff]  }
 0xd6b   :  { %v5688_v51 = vpop.f32.mrf.mxu1  ;;  %5194 = vmatpush3.bf16.msra.mxu0 %v6140_v59  ;;  %5258 = vmatpush3.bf16.msra.mxu1 %v6141_v9 }
 0xd6c   :  { %5195 = vmatprep.subr.bf16.mxu0 %v6142_v16  ;;  %5259 = vmatprep.subr.bf16.mxu1 %v6143_v30  ;;  %v7997_v43 = vadd.f32 %v5688_v51, %v7758_v5  ;;  %v6155_v5 = vld [vmem:[%s8378_s6 + $0xd0] sm:$0xff]  }
 0xd6d   :  { %v3666_v53 = vpop.f32.mrf.mxu1  ;;  %4853 = vmatmul.mubr.msk.bf16.gmra.mxu0 %vm320_vm0, %v3727_v46  ;;  %4861 = vmatmul.mubr.msk.bf16.gmra.mxu1 %vm320_vm0, %v3727_v46  ;;  %v8500_v30 = vld [vmem:[#allocation26_spill] sm:$0xff] }
 0xd6e   :  { %3810 = vmatprep.mubr.bf16.mxu0 %v8497_v47  ;;  %3923 = vmatprep.mubr.bf16.mxu1 %v8497_v47  ;;  %v7959_v41 = vadd.f32 %v3666_v53, %v7761_v11  ;;  %v6147_v11 = vld [vmem:[%s8378_s6 + $0xe0] sm:$0xff]   ;;  %v3729_v28 = vpack.c.bf16 %v7997_v43, %v8013_v3  ;;  %v8499_v53 = vld [vmem:[#allocation25_spill] sm:$0xff] }
 0xd6f   :  { %5196 = vmatpush3.bf16.msra.mxu0 %v6144_v31  ;;  %5260 = vmatpush3.bf16.msra.mxu1 %v6145_v14  ;;  %v7967_v56 = vpop.f32.mrf.mxu1  ;;  %v8501_v14 = vld [vmem:[#allocation27_spill] sm:$0xff] }
 0xd70   :  { %5197 = vmatprep.subr.bf16.mxu0 %v6146_v6  ;;  %5261 = vmatprep.subr.bf16.mxu1 %v6147_v11  ;;  %v3728_v42 = vpack.c.bf16 %v7959_v41, %v7976_v18  ;;  %v8068_v8 = vadd.f32 %v7967_v56, %v7764_v50 }
 0xd71   :  { %v3679_v26 = vpop.f32.mrf.mxu1 }
 0xd72   :  { %v8049_v57 = vadd.f32 %v3679_v26, %v7767_v38 }
 0xd73   :  { %5198 = vmatpush3.bf16.msra.mxu0 %v6148_v36  ;;  %5262 = vmatpush3.bf16.msra.mxu1 %v6149_v58  ;;  %v5692_v35 = vpop.f32.mrf.mxu1 }
 0xd74   :  { %5199 = vmatprep.subr.bf16.mxu0 %v6150_v4  ;;  %5263 = vmatprep.subr.bf16.mxu1 %v6151_v0  ;;  %v8064_v38 = vadd.f32 %v5692_v35, %v7770_v49 }
 0xd75   :  { %4854 = vmatmul.mubr.msk.bf16.gmra.mxu0 %vm320_vm0, %v3728_v42  ;;  %4862 = vmatmul.mubr.msk.bf16.gmra.mxu1 %vm320_vm0, %v3728_v42  ;;  %v3682_v44 = vpop.f32.mrf.mxu1 }
 0xd76   :  { %3820 = vmatprep.mubr.bf16.mxu0 %v8497_v47  ;;  %3933 = vmatprep.mubr.bf16.mxu1 %v8497_v47  ;;  %v8034_v55 = vadd.f32 %v3682_v44, %v7773_v60  ;;  %v6163_v60 = vld [vmem:[%s8378_s6 + $0xc0] sm:$0xff]   ;;  %v3731_v19 = vpack.c.bf16 %v8064_v38, %v8068_v8 }
 0xd77   :  { %5200 = vmatpush3.bf16.msra.mxu0 %v6152_v33  ;;  %5264 = vmatpush3.bf16.msra.mxu1 %v6153_v2  ;;  %v5695_v34 = vpop.f32.mrf.mxu1 }
 0xd78   :  { %5201 = vmatprep.subr.bf16.mxu0 %v6154_v25  ;;  %5265 = vmatprep.subr.bf16.mxu1 %v6155_v5  ;;  %v3730_v23 = vpack.c.bf16 %v8034_v55, %v8049_v57 }
 0xd79   :  { %v3695_v1 = vpop.f32.mrf.mxu1 }
 0xd7a   :  { %v8080_v7 = vadd.f32 %v3695_v1, %v7779_v52 }
 0xd7b   :  { %5202 = vmatpush3.bf16.msra.mxu0 %v6156_v61  ;;  %5266 = vmatpush3.bf16.msra.mxu1 %v6157_v29  ;;  %v5696_v39 = vpop.f32.mrf.mxu1 }
 0xd7c   :  { %5203 = vmatprep.subr.bf16.mxu0 %v6158_v62  ;;  %5267 = vmatprep.subr.bf16.mxu1 %v6159_v15  ;;  %v8089_v21 = vadd.f32 %v5696_v39, %v7782_v40 }
 0xd7d   :  { %4855 = vmatmul.mubr.msk.bf16.gmra.mxu0 %vm320_vm0, %v3729_v28  ;;  %4863 = vmatmul.mubr.msk.bf16.gmra.mxu1 %vm320_vm0, %v3729_v28  ;;  %v3698_v32 = vpop.f32.mrf.mxu1 }
 0xd7e   :  { %3830 = vmatprep.mubr.bf16.mxu0 %v8497_v47  ;;  %3943 = vmatprep.mubr.bf16.mxu1 %v8497_v47  ;;  %v8077_v49 = vadd.f32 %v3698_v32, %v7785_v48  ;;  %v8092_v48 = vadd.f32 %v5695_v34, %v7776_v24  ;;  %v8498_v24 = vld [vmem:[#allocation24_spill] sm:$0xff] }
 0xd7f   :  { %5204 = vmatpush3.bf16.msra.mxu0 %v6160_v13  ;;  %5268 = vmatpush3.bf16.msra.mxu1 %v6161_v20 }
 0xd80   :  { %5205 = vmatprep.subr.bf16.mxu0 %v6162_v22  ;;  %5269 = vmatprep.subr.bf16.mxu1 %v6163_v60  ;;  %v3732_v50 = vpack.c.bf16 %v8077_v49, %v8080_v7  ;;  %v3733_v52 = vpack.c.bf16 %v8089_v21, %v8092_v48 }
 0xd83   :  { %5206 = vmatpush3.bf16.msra.mxu0 %v6164_v17  ;;  %5270 = vmatpush3.bf16.msra.mxu1 %v6165_v12 }
 0xd84   :  { %5697 = vmatprep.subr.bf16.mxu0 %v5779_v54 }
 0xd85   :  { %4856 = vmatmul.mubr.msk.bf16.gmra.mxu0 %vm320_vm0, %v3730_v23  ;;  %4864 = vmatmul.mubr.msk.bf16.gmra.mxu1 %vm320_vm0, %v3730_v23 }
 0xd86   :  { %3840 = vmatprep.mubr.bf16.mxu0 %v8497_v47  ;;  %3953 = vmatprep.mubr.bf16.mxu1 %v8497_v47 }
 0xd8d   :  { %4857 = vmatmul.mubr.msk.bf16.gmra.mxu0 %vm320_vm0, %v3731_v19  ;;  %4865 = vmatmul.mubr.msk.bf16.gmra.mxu1 %vm320_vm0, %v3731_v19 }
 0xd8e   :  { %3850 = vmatprep.mubr.bf16.mxu0 %v8497_v47  ;;  %3963 = vmatprep.mubr.bf16.mxu1 %v8497_v47 }
 0xd95   :  { %4858 = vmatmul.mubr.msk.bf16.gmra.mxu0 %vm320_vm0, %v3732_v50  ;;  %4866 = vmatmul.mubr.msk.bf16.gmra.mxu1 %vm320_vm0, %v3732_v50 }
 0xd96   :  { %3860 = vmatprep.mubr.bf16.mxu0 %v8497_v47  ;;  %3973 = vmatprep.mubr.bf16.mxu1 %v8497_v47 }
 0xd9d   :  { %4859 = vmatmul.mubr.msk.bf16.gmra.mxu0 %vm320_vm0, %v3733_v52  ;;  %4867 = vmatmul.mubr.msk.bf16.gmra.mxu1 %vm320_vm0, %v3733_v52 }
 0xe25   :  { %v3792_v63 = vpop.f32.mrf.mxu0  ;;  %v3905_v47 = vpop.f32.mrf.mxu1 }
 0xe26   :  { %v3793_v6 = vadd.f32 %v3792_v63, %v8500_v30  ;;  %v3906_v11 = vadd.f32 %v3905_v47, %v8501_v14 }
 0xe27   :  { %v3794_v51 = vpop.f32.mrf.mxu0  ;;  %v3907_v40 = vpop.f32.mrf.mxu1 }
 0xe28   :  { %v3795_v9 = vadd.f32 %v3794_v51, %v8498_v24  ;;  %v3908_v16 = vadd.f32 %v3907_v40, %v8499_v53  ;;  %v3984_v61 = vmax.f32 %v3793_v6, 0.0  ;;  %v3986_v29 = vmax.f32 %v3906_v11, 0.0 }
 0xe29   :  { %v3796_v46 = vpop.f32.mrf.mxu0  ;;  %v3909_v59 = vpop.f32.mrf.mxu1 }
 0xe2a   :  { %v3797_v31 = vadd.f32 %v3796_v46, %v8500_v30  ;;  %v3910_v56 = vadd.f32 %v3909_v59, %v8501_v14  ;;  %v3985_v35 = vmax.f32 %v3795_v9, 0.0  ;;  %v3987_v25 = vmax.f32 %v3908_v16, 0.0 }
 0xe2b   :  { %v3798_v42 = vpop.f32.mrf.mxu0  ;;  %v3911_v36 = vpop.f32.mrf.mxu1 }
 0xe2c   :  { %v3799_v58 = vadd.f32 %v3798_v42, %v8498_v24  ;;  %v3912_v26 = vadd.f32 %v3911_v36, %v8499_v53  ;;  %v3988_v4 = vmax.f32 %v3797_v31, 0.0  ;;  %v3990_v0 = vmax.f32 %v3910_v56, 0.0 }
 0xe2d   :  { %v3802_v33 = vpop.f32.mrf.mxu0  ;;  %v3915_v2 = vpop.f32.mrf.mxu1 }
 0xe2e   :  { %v3989_v5 = vmax.f32 %v3799_v58, 0.0  ;;  %v3991_v28 = vmax.f32 %v3912_v26, 0.0  ;;  %v4048_v20 = vpack.c.bf16 %v3988_v4, %v3984_v61  ;;  %v4050_v34 = vpack.c.bf16 %v3990_v0, %v3986_v29 }
 0xe2f   :  { %v3804_v44 = vpop.f32.mrf.mxu0  ;;  %v3917_v62 = vpop.f32.mrf.mxu1  ;;  %v3803_v39 = vadd.f32 %v3802_v33, %v8500_v30  ;;  %v3916_v19 = vadd.f32 %v3915_v2, %v8501_v14 }
 0xe30   :  { %v4049_v15 = vpack.c.bf16 %v3989_v5, %v3985_v35  ;;  %v4051_v13 = vpack.c.bf16 %v3991_v28, %v3987_v25  ;;  %v3805_v22 = vadd.f32 %v3804_v44, %v8498_v24  ;;  %v3918_v17 = vadd.f32 %v3917_v62, %v8499_v53 }
 0xe31   :  { %v3806_v60 = vpop.f32.mrf.mxu0  ;;  %v3919_v23 = vpop.f32.mrf.mxu1  ;;  %v3992_v56 = vmax.f32 %v3803_v39, 0.0  ;;  %v3994_v6 = vmax.f32 %v3916_v19, 0.0 }
 0xe32   :  { %v3807_v12 = vadd.f32 %v3806_v60, %v8500_v30  ;;  %v3920_v1 = vadd.f32 %v3919_v23, %v8501_v14  ;;  %4112 = vmatprep.mubr.bf16.mxu0 %v4049_v15  ;;  %4209 = vmatprep.mubr.bf16.mxu1 %v4051_v13  ;;  %v3993_v59 = vmax.f32 %v3805_v22, 0.0  ;;  %v3995_v9 = vmax.f32 %v3918_v17, 0.0 }
 0xe33   :  { %v3808_v32 = vpop.f32.mrf.mxu0  ;;  %v3921_v50 = vpop.f32.mrf.mxu1  ;;  %4113 = vmatmul.mubr.bf16.vlgmr.msra.gmra.mxu0 %v4048_v20  ;;  %4210 = vmatmul.mubr.bf16.vlgmr.msra.gmra.mxu1 %v4050_v34 }
 0xe34   :  { %v3809_v52 = vadd.f32 %v3808_v32, %v8498_v24  ;;  %v3922_v63 = vadd.f32 %v3921_v50, %v8499_v53  ;;  %5698 = vmatpush3.bf16.msra.mxu0 %v5779_v54  ;;  %v3996_v47 = vmax.f32 %v3807_v12, 0.0  ;;  %v3998_v51 = vmax.f32 %v3920_v1, 0.0 }
 0xe35   :  { %v3812_v40 = vpop.f32.mrf.mxu0  ;;  %v3925_v46 = vpop.f32.mrf.mxu1 }
 0xe36   :  { %v3997_v16 = vmax.f32 %v3809_v52, 0.0  ;;  %v3999_v31 = vmax.f32 %v3922_v63, 0.0  ;;  %v4052_v26 = vpack.c.bf16 %v3996_v47, %v3992_v56  ;;  %v4054_v4 = vpack.c.bf16 %v3998_v51, %v3994_v6 }
 0xe37   :  { %v3814_v11 = vpop.f32.mrf.mxu0  ;;  %v3927_v42 = vpop.f32.mrf.mxu1  ;;  %v3813_v5 = vadd.f32 %v3812_v40, %v8500_v30  ;;  %v3926_v28 = vadd.f32 %v3925_v46, %v8501_v14 }
 0xe38   :  { %v4053_v36 = vpack.c.bf16 %v3997_v16, %v3993_v59  ;;  %v4055_v58 = vpack.c.bf16 %v3999_v31, %v3995_v9  ;;  %v3815_v0 = vadd.f32 %v3814_v11, %v8498_v24  ;;  %v3928_v2 = vadd.f32 %v3927_v42, %v8499_v53 }
 0xe39   :  { %v3816_v33 = vpop.f32.mrf.mxu0  ;;  %v3929_v54 = vpop.f32.mrf.mxu1  ;;  %v4000_v12 = vmax.f32 %v3813_v5, 0.0  ;;  %v4002_v1 = vmax.f32 %v3926_v28, 0.0 }
 0xe3a   :  { %v3817_v35 = vadd.f32 %v3816_v33, %v8500_v30  ;;  %v3930_v25 = vadd.f32 %v3929_v54, %v8501_v14  ;;  %4120 = vmatprep.mubr.bf16.mxu0 %v4053_v36  ;;  %4217 = vmatprep.mubr.bf16.mxu1 %v4055_v58  ;;  %v4001_v22 = vmax.f32 %v3815_v0, 0.0  ;;  %v4003_v60 = vmax.f32 %v3928_v2, 0.0 }
 0xe3b   :  { %v3818_v61 = vpop.f32.mrf.mxu0  ;;  %v3931_v29 = vpop.f32.mrf.mxu1  ;;  %4121 = vmatmul.mubr.bf16.gmra.mxu0 %v4052_v26  ;;  %4218 = vmatmul.mubr.bf16.gmra.mxu1 %v4054_v4 }
 0xe3c   :  { %v3819_v44 = vadd.f32 %v3818_v61, %v8498_v24  ;;  %v3932_v62 = vadd.f32 %v3931_v29, %v8499_v53  ;;  %v4004_v15 = vmax.f32 %v3817_v35, 0.0  ;;  %v4006_v13 = vmax.f32 %v3930_v25, 0.0 }
 0xe3d   :  { %v3822_v20 = vpop.f32.mrf.mxu0  ;;  %v3935_v34 = vpop.f32.mrf.mxu1 }
 0xe3e   :  { %v4005_v23 = vmax.f32 %v3819_v44, 0.0  ;;  %v4007_v17 = vmax.f32 %v3932_v62, 0.0  ;;  %v4056_v52 = vpack.c.bf16 %v4004_v15, %v4000_v12  ;;  %v4058_v63 = vpack.c.bf16 %v4006_v13, %v4002_v1 }
 0xe3f   :  { %v3824_v39 = vpop.f32.mrf.mxu0  ;;  %v3937_v19 = vpop.f32.mrf.mxu1  ;;  %v3823_v16 = vadd.f32 %v3822_v20, %v8500_v30  ;;  %v3936_v31 = vadd.f32 %v3935_v34, %v8501_v14 }
 0xe40   :  { %v4057_v32 = vpack.c.bf16 %v4005_v23, %v4001_v22  ;;  %v4059_v50 = vpack.c.bf16 %v4007_v17, %v4003_v60  ;;  %v3825_v47 = vadd.f32 %v3824_v39, %v8498_v24  ;;  %v3938_v46 = vadd.f32 %v3937_v19, %v8499_v53 }
 0xe41   :  { %v3826_v51 = vpop.f32.mrf.mxu0  ;;  %v3939_v40 = vpop.f32.mrf.mxu1  ;;  %v4008_v35 = vmax.f32 %v3823_v16, 0.0  ;;  %v4010_v25 = vmax.f32 %v3936_v31, 0.0 }
 0xe42   :  { %v3827_v59 = vadd.f32 %v3826_v51, %v8500_v30  ;;  %v3940_v9 = vadd.f32 %v3939_v40, %v8501_v14  ;;  %4128 = vmatprep.mubr.bf16.mxu0 %v4057_v32  ;;  %4225 = vmatprep.mubr.bf16.mxu1 %v4059_v50  ;;  %v4009_v0 = vmax.f32 %v3825_v47, 0.0  ;;  %v4011_v33 = vmax.f32 %v3938_v46, 0.0 }
 0xe43   :  { %v3828_v56 = vpop.f32.mrf.mxu0  ;;  %v3941_v6 = vpop.f32.mrf.mxu1  ;;  %4129 = vmatmul.mubr.bf16.gmra.mxu0 %v4056_v52  ;;  %4226 = vmatmul.mubr.bf16.gmra.mxu1 %v4058_v63 }
 0xe44   :  { %v3829_v11 = vadd.f32 %v3828_v56, %v8498_v24  ;;  %v3942_v42 = vadd.f32 %v3941_v6, %v8499_v53  ;;  %v4012_v36 = vmax.f32 %v3827_v59, 0.0  ;;  %v4014_v58 = vmax.f32 %v3940_v9, 0.0 }
 0xe45   :  { %v3832_v26 = vpop.f32.mrf.mxu0  ;;  %v3945_v4 = vpop.f32.mrf.mxu1 }
 0xe46   :  { %v4013_v54 = vmax.f32 %v3829_v11, 0.0  ;;  %v4015_v2 = vmax.f32 %v3942_v42, 0.0  ;;  %v4060_v44 = vpack.c.bf16 %v4012_v36, %v4008_v35  ;;  %v4062_v62 = vpack.c.bf16 %v4014_v58, %v4010_v25 }
 0xe47   :  { %v3834_v5 = vpop.f32.mrf.mxu0  ;;  %v3947_v28 = vpop.f32.mrf.mxu1  ;;  %v3833_v23 = vadd.f32 %v3832_v26, %v8500_v30  ;;  %v3946_v17 = vadd.f32 %v3945_v4, %v8501_v14 }
 0xe48   :  { %v4061_v61 = vpack.c.bf16 %v4013_v54, %v4009_v0  ;;  %v4063_v29 = vpack.c.bf16 %v4015_v2, %v4011_v33  ;;  %v3835_v15 = vadd.f32 %v3834_v5, %v8498_v24  ;;  %v3948_v34 = vadd.f32 %v3947_v28, %v8499_v53 }
 0xe49   :  { %v3836_v13 = vpop.f32.mrf.mxu0  ;;  %v3949_v20 = vpop.f32.mrf.mxu1  ;;  %v4016_v59 = vmax.f32 %v3833_v23, 0.0  ;;  %v4018_v9 = vmax.f32 %v3946_v17, 0.0 }
 0xe4a   :  { %v3837_v22 = vadd.f32 %v3836_v13, %v8500_v30  ;;  %v3950_v60 = vadd.f32 %v3949_v20, %v8501_v14  ;;  %4136 = vmatprep.mubr.bf16.mxu0 %v4061_v61  ;;  %4233 = vmatprep.mubr.bf16.mxu1 %v4063_v29  ;;  %v4017_v47 = vmax.f32 %v3835_v15, 0.0  ;;  %v4019_v51 = vmax.f32 %v3948_v34, 0.0 }
 0xe4b   :  { %v3838_v12 = vpop.f32.mrf.mxu0  ;;  %v3951_v1 = vpop.f32.mrf.mxu1  ;;  %4137 = vmatmul.mubr.bf16.gmra.mxu0 %v4060_v44  ;;  %4234 = vmatmul.mubr.bf16.gmra.mxu1 %v4062_v62 }
 0xe4c   :  { %v3839_v39 = vadd.f32 %v3838_v12, %v8498_v24  ;;  %v3952_v19 = vadd.f32 %v3951_v1, %v8499_v53  ;;  %v4020_v32 = vmax.f32 %v3837_v22, 0.0  ;;  %v4022_v50 = vmax.f32 %v3950_v60, 0.0 }
 0xe4d   :  { %v3842_v52 = vpop.f32.mrf.mxu0  ;;  %v3955_v63 = vpop.f32.mrf.mxu1 }
 0xe4e   :  { %v4021_v40 = vmax.f32 %v3839_v39, 0.0  ;;  %v4023_v46 = vmax.f32 %v3952_v19, 0.0  ;;  %v4064_v11 = vpack.c.bf16 %v4020_v32, %v4016_v59  ;;  %v4066_v42 = vpack.c.bf16 %v4022_v50, %v4018_v9 }
 0xe4f   :  { %v3844_v16 = vpop.f32.mrf.mxu0  ;;  %v3957_v31 = vpop.f32.mrf.mxu1  ;;  %v3843_v54 = vadd.f32 %v3842_v52, %v8500_v30  ;;  %v3956_v2 = vadd.f32 %v3955_v63, %v8501_v14 }
 0xe50   :  { %v4065_v56 = vpack.c.bf16 %v4021_v40, %v4017_v47  ;;  %v4067_v6 = vpack.c.bf16 %v4023_v46, %v4019_v51  ;;  %v3845_v36 = vadd.f32 %v3844_v16, %v8498_v24  ;;  %v3958_v4 = vadd.f32 %v3957_v31, %v8499_v53 }
 0xe51   :  { %v3846_v58 = vpop.f32.mrf.mxu0  ;;  %v3959_v26 = vpop.f32.mrf.mxu1  ;;  %v4024_v22 = vmax.f32 %v3843_v54, 0.0  ;;  %v4026_v60 = vmax.f32 %v3956_v2, 0.0 }
 0xe52   :  { %v3847_v0 = vadd.f32 %v3846_v58, %v8500_v30  ;;  %v3960_v33 = vadd.f32 %v3959_v26, %v8501_v14  ;;  %4144 = vmatprep.mubr.bf16.mxu0 %v4065_v56  ;;  %4241 = vmatprep.mubr.bf16.mxu1 %v4067_v6  ;;  %v4025_v15 = vmax.f32 %v3845_v36, 0.0  ;;  %v4027_v13 = vmax.f32 %v3958_v4, 0.0 }
 0xe53   :  { %v3848_v35 = vpop.f32.mrf.mxu0  ;;  %v3961_v25 = vpop.f32.mrf.mxu1  ;;  %4145 = vmatmul.mubr.bf16.gmra.mxu0 %v4064_v11  ;;  %4242 = vmatmul.mubr.bf16.gmra.mxu1 %v4066_v42 }
 0xe54   :  { %v3849_v5 = vadd.f32 %v3848_v35, %v8498_v24  ;;  %v3962_v28 = vadd.f32 %v3961_v25, %v8499_v53  ;;  %v4028_v61 = vmax.f32 %v3847_v0, 0.0  ;;  %v4030_v29 = vmax.f32 %v3960_v33, 0.0 }
 0xe55   :  { %v3852_v44 = vpop.f32.mrf.mxu0  ;;  %v3965_v62 = vpop.f32.mrf.mxu1 }
 0xe56   :  { %v4029_v20 = vmax.f32 %v3849_v5, 0.0  ;;  %v4031_v34 = vmax.f32 %v3962_v28, 0.0  ;;  %v4068_v39 = vpack.c.bf16 %v4028_v61, %v4024_v22  ;;  %v4070_v19 = vpack.c.bf16 %v4030_v29, %v4026_v60 }
 0xe57   :  { %v3854_v23 = vpop.f32.mrf.mxu0  ;;  %v3967_v17 = vpop.f32.mrf.mxu1  ;;  %v3853_v40 = vadd.f32 %v3852_v44, %v8500_v30  ;;  %v3966_v46 = vadd.f32 %v3965_v62, %v8501_v14 }
 0xe58   :  { %v4069_v12 = vpack.c.bf16 %v4029_v20, %v4025_v15  ;;  %v4071_v1 = vpack.c.bf16 %v4031_v34, %v4027_v13  ;;  %v3855_v32 = vadd.f32 %v3854_v23, %v8498_v24  ;;  %v3968_v63 = vadd.f32 %v3967_v17, %v8499_v53 }
 0xe59   :  { %v3856_v50 = vpop.f32.mrf.mxu0  ;;  %v3969_v52 = vpop.f32.mrf.mxu1  ;;  %v4032_v0 = vmax.f32 %v3853_v40, 0.0  ;;  %v4034_v33 = vmax.f32 %v3966_v46, 0.0 }
 0xe5a   :  { %v3857_v47 = vadd.f32 %v3856_v50, %v8500_v30  ;;  %v3970_v51 = vadd.f32 %v3969_v52, %v8501_v14  ;;  %4152 = vmatprep.mubr.bf16.mxu0 %v4069_v12  ;;  %4249 = vmatprep.mubr.bf16.mxu1 %v4071_v1  ;;  %v4033_v36 = vmax.f32 %v3855_v32, 0.0  ;;  %v4035_v58 = vmax.f32 %v3968_v63, 0.0 }
 0xe5b   :  { %v3858_v59 = vpop.f32.mrf.mxu0  ;;  %v3971_v9 = vpop.f32.mrf.mxu1  ;;  %4153 = vmatmul.mubr.bf16.gmra.mxu0 %v4068_v39  ;;  %4250 = vmatmul.mubr.bf16.gmra.mxu1 %v4070_v19 }
 0xe5c   :  { %v3859_v16 = vadd.f32 %v3858_v59, %v8498_v24  ;;  %v3972_v31 = vadd.f32 %v3971_v9, %v8499_v53  ;;  %v4036_v56 = vmax.f32 %v3857_v47, 0.0  ;;  %v4038_v6 = vmax.f32 %v3970_v51, 0.0 }
 0xe5d   :  { %v3862_v11 = vpop.f32.mrf.mxu0  ;;  %v3975_v42 = vpop.f32.mrf.mxu1 }
 0xe5e   :  { %v4037_v26 = vmax.f32 %v3859_v16, 0.0  ;;  %v4039_v4 = vmax.f32 %v3972_v31, 0.0  ;;  %v4072_v5 = vpack.c.bf16 %v4036_v56, %v4032_v0  ;;  %v4074_v28 = vpack.c.bf16 %v4038_v6, %v4034_v33 }
 0xe5f   :  { %v3864_v54 = vpop.f32.mrf.mxu0  ;;  %v3977_v2 = vpop.f32.mrf.mxu1  ;;  %v3863_v20 = vadd.f32 %v3862_v11, %v8500_v30  ;;  %v3976_v34 = vadd.f32 %v3975_v42, %v8501_v14 }
 0xe60   :  { %v4073_v35 = vpack.c.bf16 %v4037_v26, %v4033_v36  ;;  %v4075_v25 = vpack.c.bf16 %v4039_v4, %v4035_v58  ;;  %v3865_v61 = vadd.f32 %v3864_v54, %v8498_v24  ;;  %v3978_v62 = vadd.f32 %v3977_v2, %v8499_v53 }
 0xe61   :  { %v3866_v29 = vpop.f32.mrf.mxu0  ;;  %v3979_v44 = vpop.f32.mrf.mxu1  ;;  %v4040_v52 = vmax.f32 %v3863_v20, 0.0  ;;  %v4042_v63 = vmax.f32 %v3976_v34, 0.0 }
 0xe62   :  { %v3867_v15 = vadd.f32 %v3866_v29, %v8500_v30  ;;  %v3980_v13 = vadd.f32 %v3979_v44, %v8501_v14  ;;  %4160 = vmatprep.mubr.bf16.mxu0 %v4073_v35  ;;  %4257 = vmatprep.mubr.bf16.mxu1 %v4075_v25  ;;  %v4041_v39 = vmax.f32 %v3865_v61, 0.0  ;;  %v4043_v19 = vmax.f32 %v3978_v62, 0.0  ;;  %v8173_v29 = vld [vmem:[%s8379_s7] ss:$0 sm:$0xff] }
 0xe63   :  { %v3868_v22 = vpop.f32.mrf.mxu0  ;;  %v3981_v60 = vpop.f32.mrf.mxu1  ;;  %4161 = vmatmul.mubr.bf16.gmra.mxu0 %v4072_v5  ;;  %4258 = vmatmul.mubr.bf16.gmra.mxu1 %v4074_v28 }
 0xe64   :  { %v3869_v23 = vadd.f32 %v3868_v22, %v8498_v24  ;;  %v3982_v17 = vadd.f32 %v3981_v60, %v8499_v53  ;;  %v4044_v12 = vmax.f32 %v3867_v15, 0.0  ;;  %v4046_v1 = vmax.f32 %v3980_v13, 0.0  ;;  %v5780_v24 = vld [vmem:[%s8380_s8] sm:$0xff]  }
 0xe65   :  { %5699 = vmatprep.subr.bf16.mxu0 %v5780_v24 }
 0xe66   :  { %v4045_v32 = vmax.f32 %v3869_v23, 0.0  ;;  %v4047_v50 = vmax.f32 %v3982_v17, 0.0  ;;  %v4076_v51 = vpack.c.bf16 %v4044_v12, %v4040_v52  ;;  %v4078_v14 = vpack.c.bf16 %v4046_v1, %v4042_v63  ;;  %5700 = vmatpush3.bf16.msra.mxu0 %v5780_v24 }
 0xe68   :  { %v4077_v47 = vpack.c.bf16 %v4045_v32, %v4041_v39  ;;  %v4079_v30 = vpack.c.bf16 %v4047_v50, %v4043_v19 }
 0xe6a   :  { %4168 = vmatprep.mubr.bf16.mxu0 %v4077_v47  ;;  %4265 = vmatprep.mubr.bf16.mxu1 %v4079_v30 }
 0xe6b   :  { %4169 = vmatmul.mubr.bf16.gmra.mxu0 %v4076_v51  ;;  %4266 = vmatmul.mubr.bf16.gmra.mxu1 %v4078_v14 }
 0xef3   :  { %v5207_v53 = vpop.f32.mrf.mxu0  ;;  %v5271_v40 = vpop.f32.mrf.mxu1 }
 0xef5   :  { %v5208_v46 = vpop.f32.mrf.mxu0  ;;  %v5272_v59 = vpop.f32.mrf.mxu1 }
 0xef6   :  { %v5209_v9 = vadd.f32 %v5208_v46, %v5207_v53  ;;  %v5273_v16 = vadd.f32 %v5272_v59, %v5271_v40 }
 0xef7   :  { %v5210_v31 = vpop.f32.mrf.mxu0  ;;  %v5274_v56 = vpop.f32.mrf.mxu1 }
 0xef8   :  { %v4212_v6 = vadd.f32 %v5273_v16, %v5209_v9 }
 0xef9   :  { %v5211_v11 = vpop.f32.mrf.mxu0  ;;  %v5275_v42 = vpop.f32.mrf.mxu1 }
 0xefa   :  { %v5212_v36 = vadd.f32 %v5211_v11, %v5210_v31  ;;  %v5276_v58 = vadd.f32 %v5275_v42, %v5274_v56  ;;  %v4274_v0 = vadd.f32 %v4212_v6, %v7909_v10 }
 0xefb   :  { %v5213_v26 = vpop.f32.mrf.mxu0  ;;  %v5277_v4 = vpop.f32.mrf.mxu1 }
 0xefc   :  { %v4215_v33 = vadd.f32 %v5276_v58, %v5212_v36  ;;  %v4290_v44 = vadd.f32 %v8173_v29, %v4274_v0 }
 0xefd   :  { %v5214_v54 = vpop.f32.mrf.mxu0  ;;  %v5278_v2 = vpop.f32.mrf.mxu1 }
 0xefe   :  { %v4275_v35 = vadd.f32 %v4215_v33, %v7912_v27  ;;  %v5215_v25 = vadd.f32 %v5214_v54, %v5213_v26  ;;  %v5279_v5 = vadd.f32 %v5278_v2, %v5277_v4 }
 0xeff   :  { %v5216_v28 = vpop.f32.mrf.mxu0  ;;  %v5280_v61 = vpop.f32.mrf.mxu1 }
 0xf00   :  { %v4291_v62 = vadd.f32 %v8173_v29, %v4275_v35  ;;  %v4220_v15 = vadd.f32 %v5279_v5, %v5215_v25 }
 0xf01   :  { %v5217_v10 = vpop.f32.mrf.mxu0  ;;  %v5281_v13 = vpop.f32.mrf.mxu1 }
 0xf02   :  { %v5218_v20 = vadd.f32 %v5217_v10, %v5216_v28  ;;  %v5282_v34 = vadd.f32 %v5281_v13, %v5280_v61  ;;  %v4306_v22 = vpack.c.bf16 %v4291_v62, %v4290_v44  ;;  %v4276_v23 = vadd.f32 %v4220_v15, %v7938_v45 }
 0xf03   :  { %v5219_v27 = vpop.f32.mrf.mxu0  ;;  %v5283_v60 = vpop.f32.mrf.mxu1 }
 0xf04   :  { %v4223_v17 = vadd.f32 %v5282_v34, %v5218_v20  ;;  %5701 = vmatprep.mubr.msk.bf16.mxu0 %vm320_vm0, %v4306_v22  ;;  %v4292_v63 = vadd.f32 %v8173_v29, %v4276_v23 }
 0xf05   :  { %v5220_v12 = vpop.f32.mrf.mxu0  ;;  %v5284_v1 = vpop.f32.mrf.mxu1 }
 0xf06   :  { %v4277_v39 = vadd.f32 %v4223_v17, %v7923_v37  ;;  %v5221_v19 = vadd.f32 %v5220_v12, %v5219_v27  ;;  %v5285_v32 = vadd.f32 %v5284_v1, %v5283_v60 }
 0xf07   :  { %v5222_v50 = vpop.f32.mrf.mxu0  ;;  %v5286_v52 = vpop.f32.mrf.mxu1 }
 0xf08   :  { %v4293_v47 = vadd.f32 %v8173_v29, %v4277_v39  ;;  %v4228_v30 = vadd.f32 %v5285_v32, %v5221_v19 }
 0xf09   :  { %v5223_v51 = vpop.f32.mrf.mxu0  ;;  %v5287_v14 = vpop.f32.mrf.mxu1 }
 0xf0a   :  { %v4307_v24 = vpack.c.bf16 %v4293_v47, %v4292_v63  ;;  %v5224_v45 = vadd.f32 %v5223_v51, %v5222_v50  ;;  %v5288_v53 = vadd.f32 %v5287_v14, %v5286_v52  ;;  %v4278_v59 = vadd.f32 %v4228_v30, %v7976_v18 }
 0xf0b   :  { %v5225_v40 = vpop.f32.mrf.mxu0  ;;  %v5289_v46 = vpop.f32.mrf.mxu1 }
 0xf0c   :  { %v4231_v9 = vadd.f32 %v5288_v53, %v5224_v45  ;;  %5702 = vmatmul.mubr.msk.bf16.vlgmr.msra.gmra.mxu0 %vm320_vm0, %v4307_v24  ;;  %v4294_v36 = vadd.f32 %v8173_v29, %v4278_v59 }
 0xf0d   :  { %v5226_v37 = vpop.f32.mrf.mxu0  ;;  %v5290_v16 = vpop.f32.mrf.mxu1 }
 0xf0e   :  { %v4279_v31 = vadd.f32 %v4231_v9, %v7959_v41  ;;  %v5227_v56 = vadd.f32 %v5226_v37, %v5225_v40  ;;  %v5291_v6 = vadd.f32 %v5290_v16, %v5289_v46 }
 0xf0f   :  { %v5228_v11 = vpop.f32.mrf.mxu0  ;;  %v5292_v42 = vpop.f32.mrf.mxu1 }
 0xf10   :  { %v4295_v58 = vadd.f32 %v8173_v29, %v4279_v31  ;;  %v4236_v26 = vadd.f32 %v5291_v6, %v5227_v56 }
 0xf11   :  { %v5229_v4 = vpop.f32.mrf.mxu0  ;;  %v5293_v0 = vpop.f32.mrf.mxu1 }
 0xf12   :  { %v5230_v33 = vadd.f32 %v5229_v4, %v5228_v11  ;;  %v5294_v18 = vadd.f32 %v5293_v0, %v5292_v42  ;;  %v4308_v54 = vpack.c.bf16 %v4295_v58, %v4294_v36  ;;  %v4280_v25 = vadd.f32 %v4236_v26, %v8013_v3 }
 0xf13   :  { %v5231_v2 = vpop.f32.mrf.mxu0  ;;  %v5295_v35 = vpop.f32.mrf.mxu1 }
 0xf14   :  { %v4239_v5 = vadd.f32 %v5294_v18, %v5230_v33  ;;  %5705 = vmatprep.mubr.msk.bf16.mxu0 %vm320_vm0, %v4308_v54  ;;  %v4296_v13 = vadd.f32 %v8173_v29, %v4280_v25 }
 0xf15   :  { %v5232_v41 = vpop.f32.mrf.mxu0  ;;  %v5296_v28 = vpop.f32.mrf.mxu1 }
 0xf16   :  { %v4281_v61 = vadd.f32 %v4239_v5, %v7997_v43  ;;  %v5233_v44 = vadd.f32 %v5232_v41, %v5231_v2  ;;  %v5297_v62 = vadd.f32 %v5296_v28, %v5295_v35 }
 0xf17   :  { %v5234_v15 = vpop.f32.mrf.mxu0  ;;  %v5298_v10 = vpop.f32.mrf.mxu1 }
 0xf18   :  { %v4297_v20 = vadd.f32 %v8173_v29, %v4281_v61  ;;  %v4244_v34 = vadd.f32 %v5297_v62, %v5233_v44 }
 0xf19   :  { %v5235_v22 = vpop.f32.mrf.mxu0  ;;  %v5299_v27 = vpop.f32.mrf.mxu1 }
 0xf1a   :  { %v4309_v60 = vpack.c.bf16 %v4297_v20, %v4296_v13  ;;  %v5236_v3 = vadd.f32 %v5235_v22, %v5234_v15  ;;  %v5300_v23 = vadd.f32 %v5299_v27, %v5298_v10  ;;  %v4282_v1 = vadd.f32 %v4244_v34, %v8049_v57 }
 0xf1b   :  { %v5237_v17 = vpop.f32.mrf.mxu0  ;;  %v5301_v12 = vpop.f32.mrf.mxu1 }
 0xf1c   :  { %v4247_v39 = vadd.f32 %v5300_v23, %v5236_v3  ;;  %5706 = vmatmul.mubr.msk.bf16.gmra.mxu0 %vm320_vm0, %v4309_v60  ;;  %v4298_v30 = vadd.f32 %v8173_v29, %v4282_v1  ;;  %v4868_v1 = vld [vmem:[%s8381_s9] ss:$0 sm:$0xff]  ;;  %s6213_s9 = smov [#allocation2]  }
 0xf1d   :  { %v5238_v43 = vpop.f32.mrf.mxu0  ;;  %v5302_v19 = vpop.f32.mrf.mxu1  ;;  %s4655_s15 = sshll.u32 %s6213_s9, 4  ;;  %s4656_s15 = int_to_ptr.vmem [resolvable:$true] %s4655_s15 }
 0xf1e   :  { %v4283_v32 = vadd.f32 %v4247_v39, %v8034_v55  ;;  %v5239_v50 = vadd.f32 %v5238_v43, %v5237_v17  ;;  %v5303_v52 = vadd.f32 %v5302_v19, %v5301_v12  ;;  %s6167_s16 = scalar_lea.vmem %s4656_s15, 8192  ;;  %p6172_p1 = scmp.lt.s32.totalorder %s4656_s15, %s4656_s15 }
 0xf1f   :  { %v5240_v63 = vpop.f32.mrf.mxu0  ;;  %v5304_v47 = vpop.f32.mrf.mxu1  ;;  %p6168_p0 = scmp.ne.s32.totalorder %s4656_s15, %s6167_s16  ;;  %p6173_p2 = scmp.lt.s32.totalorder %s6167_s16, %s6167_s16 }
 0xf20   :  { %v4299_v51 = vadd.f32 %v8173_v29, %v4283_v32  ;;  %v4252_v14 = vadd.f32 %v5303_v52, %v5239_v50 }
 0xf21   :  { %v5241_v24 = vpop.f32.mrf.mxu0  ;;  %v5305_v45 = vpop.f32.mrf.mxu1  ;;  %p6174_p3 = por %p6173_p2, %p6172_p1 }
 0xf22   :  { %v5242_v53 = vadd.f32 %v5241_v24, %v5240_v63  ;;  %v5306_v57 = vadd.f32 %v5305_v45, %v5304_v47  ;;  %v4310_v40 = vpack.c.bf16 %v4299_v51, %v4298_v30  ;;  %v4284_v9 = vadd.f32 %v4252_v14, %v8068_v8 }
 0xf23   :  { %v5243_v46 = vpop.f32.mrf.mxu0  ;;  %v5307_v59 = vpop.f32.mrf.mxu1  ;;  %p6175_p4 = pnand %p6174_p3, %p6168_p0 }
 0xf24   :  { %v4255_v37 = vadd.f32 %v5306_v57, %v5242_v53  ;;  %5709 = vmatprep.mubr.msk.bf16.mxu0 %vm320_vm0, %v4310_v40  ;;  %v4300_v36 = vadd.f32 %v8173_v29, %v4284_v9 }
 0xf25   :  { %v5244_v55 = vpop.f32.mrf.mxu0  ;;  %v5308_v16 = vpop.f32.mrf.mxu1 }
 0xf26   :  { %v4285_v31 = vadd.f32 %v4255_v37, %v8064_v38  ;;  %v5245_v56 = vadd.f32 %v5244_v55, %v5243_v46  ;;  %v5309_v6 = vadd.f32 %v5308_v16, %v5307_v59 }
 0xf27   :  { %v5246_v11 = vpop.f32.mrf.mxu0  ;;  %v5310_v42 = vpop.f32.mrf.mxu1 }
 0xf28   :  { %v4301_v58 = vadd.f32 %v8173_v29, %v4285_v31  ;;  %v4260_v26 = vadd.f32 %v5309_v6, %v5245_v56 }
 0xf29   :  { %v5247_v4 = vpop.f32.mrf.mxu0  ;;  %v5311_v0 = vpop.f32.mrf.mxu1 }
 0xf2a   :  { %v4311_v33 = vpack.c.bf16 %v4301_v58, %v4300_v36  ;;  %v5248_v8 = vadd.f32 %v5247_v4, %v5246_v11  ;;  %v5312_v18 = vadd.f32 %v5311_v0, %v5310_v42  ;;  %v4286_v35 = vadd.f32 %v4260_v26, %v8080_v7 }
 0xf2b   :  { %v5249_v54 = vpop.f32.mrf.mxu0  ;;  %v5313_v2 = vpop.f32.mrf.mxu1 }
 0xf2c   :  { %v4263_v25 = vadd.f32 %v5312_v18, %v5248_v8  ;;  %5710 = vmatmul.mubr.msk.bf16.gmra.mxu0 %vm320_vm0, %v4311_v33  ;;  %v4302_v15 = vadd.f32 %v8173_v29, %v4286_v35 }
 0xf2d   :  { %v5250_v38 = vpop.f32.mrf.mxu0  ;;  %v5314_v5 = vpop.f32.mrf.mxu1 }
 0xf2e   :  { %v4287_v41 = vadd.f32 %v4263_v25, %v8077_v49  ;;  %v5251_v28 = vadd.f32 %v5250_v38, %v5249_v54  ;;  %v5315_v61 = vadd.f32 %v5314_v5, %v5313_v2 }
 0xf2f   :  { %v5252_v44 = vpop.f32.mrf.mxu0  ;;  %v5316_v62 = vpop.f32.mrf.mxu1 }
 0xf30   :  { %v4303_v10 = vadd.f32 %v8173_v29, %v4287_v41  ;;  %v4268_v13 = vadd.f32 %v5315_v61, %v5251_v28 }
 0xf31   :  { %v5253_v20 = vpop.f32.mrf.mxu0  ;;  %v5317_v34 = vpop.f32.mrf.mxu1 }
 0xf32   :  { %v5254_v22 = vadd.f32 %v5253_v20, %v5252_v44  ;;  %v5318_v7 = vadd.f32 %v5317_v34, %v5316_v62  ;;  %v4312_v27 = vpack.c.bf16 %v4303_v10, %v4302_v15  ;;  %v4288_v60 = vadd.f32 %v4268_v13, %v8092_v48 }
 0xf34   :  { %v4271_v3 = vadd.f32 %v5318_v7, %v5254_v22  ;;  %5713 = vmatprep.mubr.msk.bf16.mxu0 %vm320_vm0, %v4312_v27  ;;  %v4304_v23 = vadd.f32 %v8173_v29, %v4288_v60 }
 0xf36   :  { %v4289_v49 = vadd.f32 %v4271_v3, %v8089_v21 }
 0xf38   :  { %v4305_v17 = vadd.f32 %v8173_v29, %v4289_v49 }
 0xf3a   :  { %v4313_v12 = vpack.c.bf16 %v4305_v17, %v4304_v23 }
 0xf3c   :  { %5714 = vmatmul.mubr.msk.bf16.gmra.mxu0 %vm320_vm0, %v4313_v12 }
 0xfcc   :  { %v5703_v39 = vpop.f32.mrf.mxu0 }
 0xfcd   :  { %v8216_v43 = vadd.f32 %v5703_v39, %v4868_v1 }
 0xfce   :  { %v4395_v48 = vpop.f32.mrf.mxu0 }
 0xfcf   :  { %4462 = vmax.xlane.f32.xlu0 %v8216_v43  ;;  %v8219_v32 = vadd.f32 %v4868_v1, %v4395_v48 }
 0xfd0   :  { %v5704_v19 = vpop.f32.mrf.mxu0 }
 0xfd1   :  { %v8221_v21 = vadd.f32 %v5704_v19, %v4868_v1 }
 0xfd2   :  { %v4398_v50 = vpop.f32.mrf.mxu0 }
 0xfd3   :  { %4464 = vmax.xlane.f32.xlu1 %v8221_v21  ;;  %4458 = vmax.xlane.f32.xlu0 %v8219_v32  ;;  %v8225_v29 = vadd.f32 %v4868_v1, %v4398_v50 }
 0xfd7   :  { %4460 = vmax.xlane.f32.xlu1 %v8225_v29 }
 0xfdc   :  { %v5707_v52 = vpop.f32.mrf.mxu0 }
 0xfdd   :  { %v8228_v63 = vadd.f32 %v5707_v52, %v4868_v1 }
 0xfde   :  { %v4411_v47 = vpop.f32.mrf.mxu0 }
 0xfdf   :  { %4470 = vmax.xlane.f32.xlu0 %v8228_v63  ;;  %v8231_v51 = vadd.f32 %v4868_v1, %v4411_v47 }
 0xfe0   :  { %v5708_v30 = vpop.f32.mrf.mxu0 }
 0xfe1   :  { %v8233_v14 = vadd.f32 %v5708_v30, %v4868_v1 }
 0xfe2   :  { %v4414_v24 = vpop.f32.mrf.mxu0 }
 0xfe3   :  { %4472 = vmax.xlane.f32.xlu1 %v8233_v14  ;;  %4466 = vmax.xlane.f32.xlu0 %v8231_v51  ;;  %v8237_v45 = vadd.f32 %v4868_v1, %v4414_v24 }
 0xfe7   :  { %4468 = vmax.xlane.f32.xlu1 %v8237_v45 }
 0xfec   :  { %v5711_v53 = vpop.f32.mrf.mxu0 }
 0xfed   :  { %v8240_v57 = vadd.f32 %v5711_v53, %v4868_v1 }
 0xfee   :  { %v4427_v40 = vpop.f32.mrf.mxu0 }
 0xfef   :  { %4478 = vmax.xlane.f32.xlu0 %v8240_v57  ;;  %v8243_v59 = vadd.f32 %v4868_v1, %v4427_v40 }
 0xff0   :  { %v5712_v46 = vpop.f32.mrf.mxu0 }
 0xff1   :  { %v8245_v9 = vadd.f32 %v5712_v46, %v4868_v1 }
 0xff2   :  { %v4430_v37 = vpop.f32.mrf.mxu0 }
 0xff3   :  { %4480 = vmax.xlane.f32.xlu1 %v8245_v9  ;;  %4474 = vmax.xlane.f32.xlu0 %v8243_v59  ;;  %v8249_v55 = vadd.f32 %v4868_v1, %v4430_v37 }
 0xff7   :  { %4476 = vmax.xlane.f32.xlu1 %v8249_v55 }
 0xffc   :  { %v5715_v16 = vpop.f32.mrf.mxu0 }
 0xffd   :  { %v8255_v42 = vadd.f32 %v5715_v16, %v4868_v1 }
 0xffe   :  { %v4443_v31 = vpop.f32.mrf.mxu0 }
 0xfff   :  { %v8252_v56 = vadd.f32 %v4868_v1, %v4443_v31 }
0x1000   :  { %v5716_v6 = vpop.f32.mrf.mxu0 }
0x1001   :  { %4482 = vmax.xlane.f32.xlu0 %v8252_v56  ;;  %v8261_v58 = vadd.f32 %v5716_v6, %v4868_v1 }
0x1002   :  { %v4446_v11 = vpop.f32.mrf.mxu0 }
0x1003   :  { %v8257_v36 = vadd.f32 %v4868_v1, %v4446_v11 }
0x1005   :  { %4484 = vmax.xlane.f32.xlu1 %v8257_v36  ;;  %4486 = vmax.xlane.f32.xlu0 %v8255_v42 }
0x1009   :  { %4488 = vmax.xlane.f32.xlu1 %v8261_v58 }
0x1058   :  { %v8264_v26 = vpop.xlane.xlu0 %4462 }
0x1059   :  { %v4492_v4 = vsub.f32 %v8216_v43, %v8264_v26 }
0x105b   :  { %v4510_v0 = vmul.f32 1.442695, %v4492_v4 }
0x105c   :  { %v8268_v33 = vpop.xlane.xlu1 %4464  ;;  %v8270_v8 = vpop.xlane.xlu0 %4458 }
0x105d   :  { %6037 = vpow2.f32 %v4510_v0  ;;  %v4493_v18 = vsub.f32 %v8221_v21, %v8268_v33  ;;  %v4490_v54 = vsub.f32 %v8219_v32, %v8270_v8 }
0x105f   :  { %v4512_v2 = vmul.f32 1.442695, %v4493_v18  ;;  %v4506_v35 = vmul.f32 1.442695, %v4490_v54 }
0x1060   :  { %v8276_v25 = vpop.xlane.xlu1 %4460 }
0x1061   :  { %6039 = vpow2.f32 %v4512_v2  ;;  %v4491_v38 = vsub.f32 %v8225_v29, %v8276_v25 }
0x1062   :  { %6041 = vpow2.f32 %v4506_v35 }
0x1063   :  { %v4508_v5 = vmul.f32 1.442695, %v4491_v38 }
0x1065   :  { %6043 = vpow2.f32 %v4508_v5 }
0x1068   :  { %v8280_v41 = vpop.xlane.xlu0 %4470 }
0x1069   :  { %v4496_v28 = vsub.f32 %v8228_v63, %v8280_v41 }
0x106a   :  { %v6038_v61 = vpop.eup %6037 }
0x106b   :  { %v4518_v44 = vmul.f32 1.442695, %v4496_v28  ;;  %4542 = vadd.xlane.f32.xlu0 %v6038_v61 }
0x106c   :  { %v8284_v62 = vpop.xlane.xlu1 %4472  ;;  %v8286_v15 = vpop.xlane.xlu0 %4466 }
0x106d   :  { %6045 = vpow2.f32 %v4518_v44  ;;  %v4497_v10 = vsub.f32 %v8233_v14, %v8284_v62  ;;  %v4494_v13 = vsub.f32 %v8231_v51, %v8286_v15 }
0x106e   :  { %v6040_v20 = vpop.eup %6039 }
0x106f   :  { %v6042_v34 = vpop.eup %6041  ;;  %v4520_v22 = vmul.f32 1.442695, %v4497_v10  ;;  %v4514_v7 = vmul.f32 1.442695, %v4494_v13  ;;  %4544 = vadd.xlane.f32.xlu1 %v6040_v20 }
0x1070   :  { %4538 = vadd.xlane.f32.xlu0 %v6042_v34  ;;  %v8292_v27 = vpop.xlane.xlu1 %4468 }
0x1071   :  { %6047 = vpow2.f32 %v4520_v22  ;;  %v4495_v60 = vsub.f32 %v8237_v45, %v8292_v27 }
0x1072   :  { %v6044_v3 = vpop.eup %6043  ;;  %6049 = vpow2.f32 %v4514_v7 }
0x1073   :  { %v4516_v49 = vmul.f32 1.442695, %v4495_v60  ;;  %4540 = vadd.xlane.f32.xlu1 %v6044_v3 }
0x1075   :  { %6051 = vpow2.f32 %v4516_v49 }
0x1078   :  { %v8296_v23 = vpop.xlane.xlu0 %4478 }
0x1079   :  { %v4500_v17 = vsub.f32 %v8240_v57, %v8296_v23 }
0x107a   :  { %v6046_v12 = vpop.eup %6045 }
0x107b   :  { %v4526_v1 = vmul.f32 1.442695, %v4500_v17  ;;  %4550 = vadd.xlane.f32.xlu0 %v6046_v12 }
0x107c   :  { %v8300_v39 = vpop.xlane.xlu1 %4480  ;;  %v8302_v48 = vpop.xlane.xlu0 %4474 }
0x107d   :  { %6053 = vpow2.f32 %v4526_v1  ;;  %v4501_v19 = vsub.f32 %v8245_v9, %v8300_v39  ;;  %v4498_v50 = vsub.f32 %v8243_v59, %v8302_v48 }
0x107e   :  { %v6048_v52 = vpop.eup %6047 }
0x107f   :  { %v6050_v47 = vpop.eup %6049  ;;  %v4528_v30 = vmul.f32 1.442695, %v4501_v19  ;;  %v4522_v24 = vmul.f32 1.442695, %v4498_v50  ;;  %4552 = vadd.xlane.f32.xlu1 %v6048_v52 }
0x1080   :  { %4546 = vadd.xlane.f32.xlu0 %v6050_v47  ;;  %v8308_v53 = vpop.xlane.xlu1 %4476 }
0x1081   :  { %6055 = vpow2.f32 %v4528_v30  ;;  %v4499_v40 = vsub.f32 %v8249_v55, %v8308_v53 }
0x1082   :  { %v6052_v46 = vpop.eup %6051  ;;  %6057 = vpow2.f32 %v4522_v24 }
0x1083   :  { %v4524_v37 = vmul.f32 1.442695, %v4499_v40  ;;  %4548 = vadd.xlane.f32.xlu1 %v6052_v46 }
0x1085   :  { %6059 = vpow2.f32 %v4524_v37 }
0x108a   :  { %v6054_v16 = vpop.eup %6053  ;;  %v8312_v31 = vpop.xlane.xlu0 %4482 }
0x108b   :  { %v4502_v6 = vsub.f32 %v8252_v56, %v8312_v31  ;;  %4558 = vadd.xlane.f32.xlu0 %v6054_v16 }
0x108d   :  { %v4530_v11 = vmul.f32 1.442695, %v4502_v6 }
0x108e   :  { %v6056_v4 = vpop.eup %6055  ;;  %v8316_v0 = vpop.xlane.xlu1 %4484 }
0x108f   :  { %v8318_v18 = vpop.xlane.xlu0 %4486  ;;  %v6058_v54 = vpop.eup %6057  ;;  %6061 = vpow2.f32 %v4530_v11  ;;  %v4503_v2 = vsub.f32 %v8257_v36, %v8316_v0  ;;  %4560 = vadd.xlane.f32.xlu1 %v6056_v4 }
0x1090   :  { %v4504_v35 = vsub.f32 %v8255_v42, %v8318_v18  ;;  %4554 = vadd.xlane.f32.xlu0 %v6058_v54 }
0x1091   :  { %v4532_v38 = vmul.f32 1.442695, %v4503_v2 }
0x1092   :  { %v4534_v5 = vmul.f32 1.442695, %v4504_v35  ;;  %v6060_v28 = vpop.eup %6059  ;;  %v8324_v61 = vpop.xlane.xlu1 %4488 }
0x1093   :  { %6063 = vpow2.f32 %v4532_v38  ;;  %v4505_v44 = vsub.f32 %v8261_v58, %v8324_v61  ;;  %4556 = vadd.xlane.f32.xlu1 %v6060_v28 }
0x1094   :  { %6065 = vpow2.f32 %v4534_v5 }
0x1095   :  { %v4536_v10 = vmul.f32 1.442695, %v4505_v44 }
0x1097   :  { %6067 = vpow2.f32 %v4536_v10 }
0x109c   :  { %v6062_v13 = vpop.eup %6061 }
0x109d   :  { %4562 = vadd.xlane.f32.xlu0 %v6062_v13 }
0x10a0   :  { %v6064_v20 = vpop.eup %6063 }
0x10a1   :  { %v6066_v34 = vpop.eup %6065  ;;  %4564 = vadd.xlane.f32.xlu1 %v6064_v20 }
0x10a2   :  { %4566 = vadd.xlane.f32.xlu0 %v6066_v34 }
0x10a4   :  { %v6068_v22 = vpop.eup %6067 }
0x10a5   :  { %4568 = vadd.xlane.f32.xlu1 %v6068_v22 }
0x10a6   :  { %6178 = shalt.err (!%p6175_p4)
}
0x10a7   :  { %s6214_s3 = smov 128   ;;  %s6215_s17 = smov 8  }
0x10a8   :  { %4661 = dma.vmem_to_hbm [thread:$0]  %s4656_s15, 8192, %s8382_s10, [#allocation3], %s6214_s3, %s6214_s3, %s6215_s17  }
0x10a9   :  { %s6216_s10 = smov [#allocation4]  }
0x10aa   :  { %s4667_s19 = sshll.u32 %s6216_s10, 4  ;;  %s4668_s19 = int_to_ptr.vmem [resolvable:$true] %s4667_s19 }
0x10ab   :  { %s6187_s20 = scalar_lea.vmem %s4668_s19, 2048  ;;  %p6192_p6 = scmp.lt.s32.totalorder %s4668_s19, %s4668_s19 }
0x10ac   :  { %p6188_p5 = scmp.ne.s32.totalorder %s4668_s19, %s6187_s20  ;;  %p6193_p7 = scmp.lt.s32.totalorder %s6187_s20, %s6187_s20 }
0x10ae   :  { %p6194_p8 = por %p6193_p7, %p6192_p6 }
0x10b0   :  { %p6195_p9 = pnand %p6194_p8, %p6188_p5 }
0x10f4   :  { %v4543_v7 = vpop.xlane.xlu0 %4542 }
0x10f5   :  { %6069 = vlog2.f32 %v4543_v7 }
0x10f8   :  { %v4545_v60 = vpop.xlane.xlu1 %4544 }
0x10f9   :  { %6071 = vlog2.f32 %v4545_v60  ;;  %v4539_v3 = vpop.xlane.xlu0 %4538 }
0x10fa   :  { %6073 = vlog2.f32 %v4539_v3 }
0x10fc   :  { %v4541_v49 = vpop.xlane.xlu1 %4540 }
0x10fd   :  { %6075 = vlog2.f32 %v4541_v49 }
0x1102   :  { %v6070_v17 = vpop.eup %6069 }
0x1103   :  { %v4575_v12 = vmul.f32 0.6931472, %v6070_v17 }
0x1104   :  { %v4551_v1 = vpop.xlane.xlu0 %4550 }
0x1105   :  { %v4604_v19 = vadd.f32 %v4575_v12, %v8264_v26  ;;  %6077 = vlog2.f32 %v4551_v1 }
0x1106   :  { %v6072_v50 = vpop.eup %6071 }
0x1107   :  { %v6074_v52 = vpop.eup %6073  ;;  %v4620_v47 = vsub.f32 %v8216_v43, %v4604_v19  ;;  %v4577_v30 = vmul.f32 0.6931472, %v6072_v50 }
0x1108   :  { %v4571_v24 = vmul.f32 0.6931472, %v6074_v52  ;;  %v4553_v40 = vpop.xlane.xlu1 %4552 }
0x1109   :  { %4636 = vst [vmem:[#allocation4 + $0x10] sm:$0xff] %v4620_v47  ;;  %v4605_v46 = vadd.f32 %v4577_v30, %v8268_v33  ;;  %6079 = vlog2.f32 %v4553_v40  ;;  %v4547_v37 = vpop.xlane.xlu0 %4546 }
0x110a   :  { %v6076_v16 = vpop.eup %6075  ;;  %v4602_v6 = vadd.f32 %v4571_v24, %v8270_v8  ;;  %6081 = vlog2.f32 %v4547_v37 }
0x110b   :  { %v4621_v11 = vsub.f32 %v8221_v21, %v4605_v46  ;;  %v4573_v26 = vmul.f32 0.6931472, %v6076_v16 }
0x110c   :  { %v4618_v4 = vsub.f32 %v8219_v32, %v4602_v6  ;;  %v4549_v54 = vpop.xlane.xlu1 %4548 }
0x110d   :  { %4637 = vst [vmem:[#allocation4 + $0x18] sm:$0xff] %v4621_v11  ;;  %v4603_v43 = vadd.f32 %v4573_v26, %v8276_v25  ;;  %6083 = vlog2.f32 %v4549_v54 }
0x110e   :  { %4634 = vst [vmem:[#allocation4] sm:$0xff] %v4618_v4 }
0x110f   :  { %v4619_v2 = vsub.f32 %v8225_v29, %v4603_v43 }
0x1111   :  { %4635 = vst [vmem:[#allocation4 + $0x8] sm:$0xff] %v4619_v2 }
0x1112   :  { %v6078_v33 = vpop.eup %6077 }
0x1113   :  { %v4583_v35 = vmul.f32 0.6931472, %v6078_v33 }
0x1114   :  { %v4559_v38 = vpop.xlane.xlu0 %4558 }
0x1115   :  { %v4608_v8 = vadd.f32 %v4583_v35, %v8280_v41  ;;  %6085 = vlog2.f32 %v4559_v38 }
0x1116   :  { %v6080_v5 = vpop.eup %6079 }
0x1117   :  { %v6082_v21 = vpop.eup %6081  ;;  %v4624_v28 = vsub.f32 %v8228_v63, %v4608_v8  ;;  %v4585_v32 = vmul.f32 0.6931472, %v6080_v5 }
0x1118   :  { %v4579_v44 = vmul.f32 0.6931472, %v6082_v21  ;;  %v4561_v10 = vpop.xlane.xlu1 %4560 }
0x1119   :  { %4640 = vst [vmem:[#allocation4 + $0x30] sm:$0xff] %v4624_v28  ;;  %v4609_v25 = vadd.f32 %v4585_v32, %v8284_v62  ;;  %6087 = vlog2.f32 %v4561_v10  ;;  %v4555_v13 = vpop.xlane.xlu0 %4554 }
0x111a   :  { %v6084_v29 = vpop.eup %6083  ;;  %v4606_v20 = vadd.f32 %v4579_v44, %v8286_v15  ;;  %6089 = vlog2.f32 %v4555_v13 }
0x111b   :  { %v4625_v34 = vsub.f32 %v8233_v14, %v4609_v25  ;;  %v4581_v41 = vmul.f32 0.6931472, %v6084_v29 }
0x111c   :  { %v4622_v22 = vsub.f32 %v8231_v51, %v4606_v20  ;;  %v4557_v7 = vpop.xlane.xlu1 %4556 }
0x111d   :  { %4641 = vst [vmem:[#allocation4 + $0x38] sm:$0xff] %v4625_v34  ;;  %v4607_v63 = vadd.f32 %v4581_v41, %v8292_v27  ;;  %6091 = vlog2.f32 %v4557_v7 }
0x111e   :  { %4638 = vst [vmem:[#allocation4 + $0x20] sm:$0xff] %v4622_v22 }
0x111f   :  { %v4623_v60 = vsub.f32 %v8237_v45, %v4607_v63 }
0x1121   :  { %4639 = vst [vmem:[#allocation4 + $0x28] sm:$0xff] %v4623_v60 }
0x1122   :  { %v6086_v62 = vpop.eup %6085 }
0x1123   :  { %v4591_v3 = vmul.f32 0.6931472, %v6086_v62 }
0x1125   :  { %v4612_v49 = vadd.f32 %v4591_v3, %v8296_v23 }
0x1126   :  { %v6088_v15 = vpop.eup %6087  ;;  %v4563_v17 = vpop.xlane.xlu0 %4562 }
0x1127   :  { %v6090_v12 = vpop.eup %6089  ;;  %v4628_v14 = vsub.f32 %v8240_v57, %v4612_v49  ;;  %v4593_v1 = vmul.f32 0.6931472, %v6088_v15  ;;  %6093 = vlog2.f32 %v4563_v17 }
0x1128   :  { %v4587_v51 = vmul.f32 0.6931472, %v6090_v12 }
0x1129   :  { %4644 = vst [vmem:[#allocation4 + $0x50] sm:$0xff] %v4628_v14  ;;  %v4613_v27 = vadd.f32 %v4593_v1, %v8300_v39 }
0x112a   :  { %v6092_v19 = vpop.eup %6091  ;;  %v4610_v50 = vadd.f32 %v4587_v51, %v8302_v48  ;;  %v4565_v45 = vpop.xlane.xlu1 %4564 }
0x112b   :  { %v4629_v52 = vsub.f32 %v8245_v9, %v4613_v27  ;;  %v4589_v47 = vmul.f32 0.6931472, %v6092_v19  ;;  %6095 = vlog2.f32 %v4565_v45  ;;  %v4567_v23 = vpop.xlane.xlu0 %4566 }
0x112c   :  { %v4626_v30 = vsub.f32 %v8243_v59, %v4610_v50  ;;  %6097 = vlog2.f32 %v4567_v23 }
0x112d   :  { %4645 = vst [vmem:[#allocation4 + $0x58] sm:$0xff] %v4629_v52  ;;  %v4611_v57 = vadd.f32 %v4589_v47, %v8308_v53 }
0x112e   :  { %4642 = vst [vmem:[#allocation4 + $0x40] sm:$0xff] %v4626_v30  ;;  %v4569_v24 = vpop.xlane.xlu1 %4568 }
0x112f   :  { %v4627_v40 = vsub.f32 %v8249_v55, %v4611_v57  ;;  %6099 = vlog2.f32 %v4569_v24 }
0x1131   :  { %4643 = vst [vmem:[#allocation4 + $0x48] sm:$0xff] %v4627_v40 }
0x1134   :  { %v6094_v39 = vpop.eup %6093 }
0x1135   :  { %v4595_v48 = vmul.f32 0.6931472, %v6094_v39 }
0x1137   :  { %v4614_v46 = vadd.f32 %v4595_v48, %v8312_v31 }
0x1138   :  { %v6096_v9 = vpop.eup %6095 }
0x1139   :  { %v6098_v37 = vpop.eup %6097  ;;  %v4630_v16 = vsub.f32 %v8252_v56, %v4614_v46  ;;  %v4597_v6 = vmul.f32 0.6931472, %v6096_v9 }
0x113a   :  { %v4599_v59 = vmul.f32 0.6931472, %v6098_v37 }
0x113b   :  { %4646 = vst [vmem:[#allocation4 + $0x60] sm:$0xff] %v4630_v16  ;;  %v4615_v11 = vadd.f32 %v4597_v6, %v8316_v0 }
0x113c   :  { %v6100_v53 = vpop.eup %6099  ;;  %v4616_v26 = vadd.f32 %v4599_v59, %v8318_v18 }
0x113d   :  { %v4631_v55 = vsub.f32 %v8257_v36, %v4615_v11  ;;  %v4601_v4 = vmul.f32 0.6931472, %v6100_v53 }
0x113e   :  { %v4632_v54 = vsub.f32 %v8255_v42, %v4616_v26 }
0x113f   :  { %4647 = vst [vmem:[#allocation4 + $0x68] sm:$0xff] %v4631_v55  ;;  %v4617_v31 = vadd.f32 %v4601_v4, %v8324_v61 }
0x1140   :  { %4648 = vst [vmem:[#allocation4 + $0x70] sm:$0xff] %v4632_v54 }
0x1141   :  { %v4633_v56 = vsub.f32 %v8261_v58, %v4617_v31 }
0x1143   :  { %4649 = vst [vmem:[#allocation4 + $0x78] sm:$0xff] %v4633_v56 }
0x1144   :  { %6198 = shalt.err (!%p6195_p9)
}
0x1145   :  { %4673 = dma.vmem_to_hbm [thread:$0]  %s4668_s19, 2048, %s8383_s11, [#allocation5], %s6214_s3, %s6214_s3, %s6215_s17  }
0x1146   :  { %6207 = dma.done.wait [#allocation3], 8192  }
0x1147   :  { %6208 = vsyncadd [#allocation3], 4294959104 }
0x1148   :  { %6209 = dma.done.wait [#allocation5], 2048  }
0x1149   :  { %6210 = vsyncadd [#allocation5], 4294965248 }
0x114a   :  { %4680 = vsyncpa [#allocation3], 1 }
0x114b   :  { %4681 = vsyncpa [#allocation5], 1 }

</bundles_post_ra>
